<compile_context>
chip_gen: v5e
topology: v5e:2x2
jax: 0.10.0
libtpu: 0.0.40
codegen_flags: <defaults>
</compile_context>

<pallas_src>
import jax
import jax.numpy as jnp
from jax.experimental import pallas as pl
from jax.experimental.pallas import tpu as pltpu


# ----------------------------- fused forward kernel -----------------------------
def make_fused_rnn_kernel(n_layers, T, B, H):
    """Kernel refs (in order):
        tokens (B*T,) int32 [SMEM], h0 (L,B,H), c0 (L,B,H),
        xg0_table (vocab, 4H), whh0 (H, 4H),
        [wih_l (H,4H), whh_l (H,4H), b_l (1,4H)] for layers 1..L-1,
        fc_w (H,O), fc_b (1,O)
      outputs: out (B,O), h_n (L,B,H), c_n (L,B,H)
      scratch: xg_slab VMEM (T*B, 4H), act_slab VMEM (T*B, H)
      Gate column order everywhere in-kernel is (i, f, o, g).
    """

    def kernel(*refs):
        tok_ref, h0_ref, c0_ref = refs[0], refs[1], refs[2]
        xg0_ref, whh0_ref = refs[3], refs[4]
        pos = 5
        upper = []                                   # (wih, whh, b) for layers 1..L-1
        for _ in range(n_layers - 1):
            upper.append((refs[pos], refs[pos + 1], refs[pos + 2]))
            pos += 3
        fc_w_ref, fc_b_ref = refs[pos], refs[pos + 1]
        out_ref, hN_ref, cN_ref = refs[pos + 2], refs[pos + 3], refs[pos + 4]
        xg_slab, act_slab = refs[pos + 5], refs[pos + 6]

        h = None
        for l in range(n_layers):
            last_layer = (l == n_layers - 1)

            if l == 0:
                # In-kernel embedding gather: the embedding + layer-0 input projection
                # were folded into xg0_table = emb @ W_ih0 + b0 at prep time, so each
                # token needs exactly one (1, 4H) row copy into the gate slab.
                for t in range(T):                    # time-major slab layout
                    for b in range(B):
                        tok = tok_ref[b * T + t]      # SMEM scalar read
                        xg_slab[pl.ds(t * B + b, 1), :] = xg0_ref[pl.ds(tok, 1), :]
                whh_ref = whh0_ref
            else:
                wih_ref, whh_ref, b_ref = upper[l - 1]
                # Hoisted input projection: one matmul covering all T steps.
                xg_slab[...] = (jnp.dot(act_slab[...], wih_ref[...],
                                        preferred_element_type=jnp.float32)
                                + b_ref[...])

            h = h0_ref[l]                             # (B, H)
            c = c0_ref[l]                             # (B, H)
            for t in range(T):                        # unrolled serial recurrence
                # whh streamed from VMEM per step (no value hoist -> no spill risk).
                gates = xg_slab[pl.ds(t * B, B), :] + jnp.dot(
                    h, whh_ref[...], preferred_element_type=jnp.float32)   # (B, 4H)
                sig = jax.nn.sigmoid(gates[:, :3 * H])        # [i | f | o] contiguous
                i_g = sig[:, 0 * H:1 * H]
                f_g = sig[:, 1 * H:2 * H]
                o_g = sig[:, 2 * H:3 * H]
                g_g = jnp.tanh(gates[:, 3 * H:4 * H])
                c = f_g * c + i_g * g_g
                h = o_g * jnp.tanh(c)
                if not last_layer:
                    # nn.LSTM inter-layer dropout is identity at inference.
                    act_slab[pl.ds(t * B, B), :] = h  # activations stay in VMEM

            hN_ref[l] = h                             # final states written once/layer
            cN_ref[l] = c

        # FC epilogue on the last timestep of the top layer (nn.Dropout = identity).
        out_ref[...] = (jnp.dot(h, fc_w_ref[...], preferred_element_type=jnp.float32)
                        + fc_b_ref[...]).astype(out_ref.dtype)

    return kernel


# ------------------------------- parameter prep --------------------------------
def _reorder_ifog(w, axis=-1):
    """PyTorch gate order (i, f, g, o) -> kernel order (i, f, o, g)."""
    i, f, g, o = jnp.split(w, 4, axis=axis)
    return jnp.concatenate([i, f, o, g], axis=axis)


def prepare_params(raw):
    """One-time weight layout prep (kept out of the per-call forward):
       - transpose weights to (in, 4H) / (H, 4H) / (H, O)
       - fuse b_ih + b_hh
       - reorder gate columns to (i, f, o, g)
       - fold embedding + layer-0 input projection into a (vocab, 4H) table.
    """
    lstm0 = raw["lstm"][0]
    wih0_t = jnp.transpose(lstm0["w_ih"])                                 # (E, 4H)
    b0 = (lstm0["b_ih"] + lstm0["b_hh"]).reshape(1, -1)                   # (1, 4H)
    # NOTE: for very large vocabularies keep the raw embedding table instead and
    # do the layer-0 projection in-kernel; at vocab=128 the folded table is 256 KiB.
    xg0_table = _reorder_ifog(
        jnp.dot(raw["embedding"], wih0_t, precision=jax.lax.Precision.HIGHEST) + b0)

    upper = []
    for lp in raw["lstm"][1:]:
        upper.append(dict(
            wih=_reorder_ifog(jnp.transpose(lp["w_ih"])),                 # (H, 4H)
            whh=_reorder_ifog(jnp.transpose(lp["w_hh"])),                 # (H, 4H)
            b=_reorder_ifog((lp["b_ih"] + lp["b_hh"]).reshape(1, -1)),    # (1, 4H)
        ))

    return dict(
        xg0_table=xg0_table,                                              # (V, 4H)
        whh0=_reorder_ifog(jnp.transpose(lstm0["w_hh"])),                 # (H, 4H)
        upper=upper,
        fc_w=jnp.transpose(raw["fc_w"]),                                  # (H, O)
        fc_b=raw["fc_b"].reshape(1, -1),                                  # (1, O)
    )


# ------------------------------- model forward ---------------------------------
def _rnn_forward_impl(prep, tokens, hidden):
    """Mirrors RNN.forward: returns (out (B, output_size), (h_n, c_n))."""
    h0, c0 = hidden                                         # (L, B, H) each
    B, T = tokens.shape
    H = prep["whh0"].shape[0]
    O = prep["fc_w"].shape[1]
    n_layers = 1 + len(prep["upper"])

    tok_flat = tokens.astype(jnp.int32).reshape(-1)         # (B*T,) -> SMEM

    inputs = [tok_flat, h0, c0, prep["xg0_table"], prep["whh0"]]
    for lp in prep["upper"]:
        inputs += [lp["wih"], lp["whh"], lp["b"]]
    inputs += [prep["fc_w"], prep["fc_b"]]

    vmem = pl.BlockSpec(memory_space=pltpu.MemorySpace.VMEM)
    smem = pl.BlockSpec(memory_space=pltpu.MemorySpace.SMEM)
    in_specs = [smem] + [vmem] * (len(inputs) - 1)

    out, h_n, c_n = pl.pallas_call(
        make_fused_rnn_kernel(n_layers, T, B, H),
        out_shape=(jax.ShapeDtypeStruct((B, O), jnp.float32),
                   jax.ShapeDtypeStruct((n_layers, B, H), jnp.float32),
                   jax.ShapeDtypeStruct((n_layers, B, H), jnp.float32)),
        in_specs=in_specs,
        out_specs=(vmem, vmem, vmem),
        scratch_shapes=[pltpu.VMEM((T * B, 4 * H), jnp.float32),   # per-layer gate slab
                        pltpu.VMEM((T * B, H), jnp.float32)],      # inter-layer acts
    )(*inputs)
    return out, (h_n, c_n)


rnn_forward = jax.jit(_rnn_forward_impl)


# --------------------------- pure-JAX reference ---------------------------------
def rnn_reference(params, tokens, hidden):
    h0_all, c0_all = hidden
    x = jnp.transpose(jnp.take(params["embedding"], tokens, axis=0), (1, 0, 2))
    h_last, c_last = [], []
    for l, lp in enumerate(params["lstm"]):
        H = lp["w_hh"].shape[1]

        def step(carry, xt, lp=lp, H=H):
            h, c = carry
            gates = xt @ lp["w_ih"].T + h @ lp["w_hh"].T + lp["b_ih"] + lp["b_hh"]
            i = jax.nn.sigmoid(gates[:, 0 * H:1 * H])
            f = jax.nn.sigmoid(gates[:, 1 * H:2 * H])
            g = jnp.tanh(gates[:, 2 * H:3 * H])
            o = jax.nn.sigmoid(gates[:, 3 * H:4 * H])
            c = f * c + i * g
            h = o * jnp.tanh(c)
            return (h, c), h

        (hN, cN), y = jax.lax.scan(step, (h0_all[l], c0_all[l]), x)
        h_last.append(hN); c_last.append(cN); x = y
    out = x[-1] @ params["fc_w"].T + params["fc_b"]
    return out, (jnp.stack(h_last, 0), jnp.stack(c_last, 0))


# ------------------------------------ main --------------------------------------
if __name__ == "__main__":
    vocab_size, output_size = 128, 16
    embedding_dim, hidden_dim, n_layers = 32, 128, 2
    B, T = 2, 8

    key = jax.random.PRNGKey(0)
    ks = jax.random.split(key, 3 + 4 * n_layers + 2)
    k = iter(ks)
    bound = 1.0 / jnp.sqrt(hidden_dim)

    lstm_params = []
    for l in range(n_layers):
        in_dim = embedding_dim if l == 0 else hidden_dim
        lstm_params.append(dict(
            w_ih=jax.random.uniform(next(k), (4 * hidden_dim, in_dim),
                                    jnp.float32, -bound, bound),
            w_hh=jax.random.uniform(next(k), (4 * hidden_dim, hidden_dim),
                                    jnp.float32, -bound, bound),
            b_ih=jax.random.uniform(next(k), (4 * hidden_dim,),
                                    jnp.float32, -bound, bound),
            b_hh=jax.random.uniform(next(k), (4 * hidden_dim,),
                                    jnp.float32, -bound, bound),
        ))

    params = dict(
        embedding=jax.random.normal(next(k), (vocab_size, embedding_dim), jnp.float32),
        lstm=lstm_params,
        fc_w=jax.random.uniform(next(k), (output_size, hidden_dim),
                                jnp.float32, -bound, bound),
        fc_b=jax.random.uniform(next(k), (output_size,),
                                jnp.float32, -bound, bound),
    )

    tokens = jax.random.randint(next(k), (B, T), 0, vocab_size, dtype=jnp.int32)
    hidden = (jnp.zeros((n_layers, B, hidden_dim), jnp.float32),
              jnp.zeros((n_layers, B, hidden_dim), jnp.float32))

    prep = prepare_params(params)                 # one-time weight layout prep
    out, (h_n, c_n) = rnn_forward(prep, tokens, hidden)
    jax.block_until_ready((out, h_n, c_n))

    ref_out, (ref_h, ref_c) = rnn_reference(params, tokens, hidden)
    assert out.shape == (B, output_size)
    assert h_n.shape == (n_layers, B, hidden_dim)
    assert jnp.allclose(out, ref_out, rtol=1e-4, atol=1e-4)
    assert jnp.allclose(h_n, ref_h, rtol=1e-4, atol=1e-4)
    assert jnp.allclose(c_n, ref_c, rtol=1e-4, atol=1e-4)

    # TODO(synk): nn.Dropout / inter-layer LSTM dropout are train-mode only; inference
    # semantics (identity) are implemented.  For large T the unrolled recurrence would
    # switch to pl.loop over the VMEM gate slab; for large vocab keep the raw embedding
    # table and do the layer-0 projection in-kernel instead of the folded table.
    print("KERNEL_OK")
</pallas_src>

<mosaic_0001>
module attributes {stable_mosaic.version = 11 : i64} {
  func.func @kernel(%arg0: memref<16xi32, #tpu.memory_space<smem>>, %arg1: memref<2x2x128xf32, #tpu.memory_space<vmem>>, %arg2: memref<2x2x128xf32, #tpu.memory_space<vmem>>, %arg3: memref<128x512xf32, #tpu.memory_space<vmem>>, %arg4: memref<128x512xf32, #tpu.memory_space<vmem>>, %arg5: memref<128x512xf32, #tpu.memory_space<vmem>>, %arg6: memref<128x512xf32, #tpu.memory_space<vmem>>, %arg7: memref<1x512xf32, #tpu.memory_space<vmem>>, %arg8: memref<128x16xf32, #tpu.memory_space<vmem>>, %arg9: memref<1x16xf32, #tpu.memory_space<vmem>>, %arg10: memref<2x16xf32, #tpu.memory_space<vmem>>, %arg11: memref<2x2x128xf32, #tpu.memory_space<vmem>>, %arg12: memref<2x2x128xf32, #tpu.memory_space<vmem>>, %arg13: memref<16x512xf32, #tpu.memory_space<vmem>>, %arg14: memref<16x128xf32, #tpu.memory_space<vmem>>) attributes {dimension_semantics = [], scalar_prefetch = 0 : i64, scratch_operands = 2 : i64, tpu.core_type = #tpu.core_type<tc>} {
    %c0 = arith.constant 0 : index
    %0 = memref.load %arg0[%c0] : memref<16xi32, #tpu.memory_space<smem>>
    %1 = arith.index_cast %0 : i32 to index
    %c0_0 = arith.constant 0 : index
    %2 = vector.load %arg3[%1, %c0_0] : memref<128x512xf32, #tpu.memory_space<vmem>>, vector<1x512xf32>
    %c0_1 = arith.constant 0 : index
    %c0_2 = arith.constant 0 : index
    %3 = vector.load %arg13[%c0_1, %c0_2] : memref<16x512xf32, #tpu.memory_space<vmem>>, vector<1x512xf32>
    tpu.vector_store %arg13[%c0_1, %c0_2], %2 {strides = array<i32>} : memref<16x512xf32, #tpu.memory_space<vmem>>, vector<1x512xf32>,
    %c8 = arith.constant 8 : index
    %4 = memref.load %arg0[%c8] : memref<16xi32, #tpu.memory_space<smem>>
    %5 = arith.index_cast %4 : i32 to index
    %c0_3 = arith.constant 0 : index
    %6 = vector.load %arg3[%5, %c0_3] : memref<128x512xf32, #tpu.memory_space<vmem>>, vector<1x512xf32>
    %c1 = arith.constant 1 : index
    %c0_4 = arith.constant 0 : index
    %7 = vector.load %arg13[%c1, %c0_4] : memref<16x512xf32, #tpu.memory_space<vmem>>, vector<1x512xf32>
    tpu.vector_store %arg13[%c1, %c0_4], %6 {strides = array<i32>} : memref<16x512xf32, #tpu.memory_space<vmem>>, vector<1x512xf32>,
    %c1_5 = arith.constant 1 : index
    %8 = memref.load %arg0[%c1_5] : memref<16xi32, #tpu.memory_space<smem>>
    %9 = arith.index_cast %8 : i32 to index
    %c0_6 = arith.constant 0 : index
    %10 = vector.load %arg3[%9, %c0_6] : memref<128x512xf32, #tpu.memory_space<vmem>>, vector<1x512xf32>
    %c2 = arith.constant 2 : index
    %c0_7 = arith.constant 0 : index
    %11 = vector.load %arg13[%c2, %c0_7] : memref<16x512xf32, #tpu.memory_space<vmem>>, vector<1x512xf32>
    tpu.vector_store %arg13[%c2, %c0_7], %10 {strides = array<i32>} : memref<16x512xf32, #tpu.memory_space<vmem>>, vector<1x512xf32>,
    %c9 = arith.constant 9 : index
    %12 = memref.load %arg0[%c9] : memref<16xi32, #tpu.memory_space<smem>>
    %13 = arith.index_cast %12 : i32 to index
    %c0_8 = arith.constant 0 : index
    %14 = vector.load %arg3[%13, %c0_8] : memref<128x512xf32, #tpu.memory_space<vmem>>, vector<1x512xf32>
    %c3 = arith.constant 3 : index
    %c0_9 = arith.constant 0 : index
    %15 = vector.load %arg13[%c3, %c0_9] : memref<16x512xf32, #tpu.memory_space<vmem>>, vector<1x512xf32>
    tpu.vector_store %arg13[%c3, %c0_9], %14 {strides = array<i32>} : memref<16x512xf32, #tpu.memory_space<vmem>>, vector<1x512xf32>,
    %c2_10 = arith.constant 2 : index
    %16 = memref.load %arg0[%c2_10] : memref<16xi32, #tpu.memory_space<smem>>
    %17 = arith.index_cast %16 : i32 to index
    %c0_11 = arith.constant 0 : index
    %18 = vector.load %arg3[%17, %c0_11] : memref<128x512xf32, #tpu.memory_space<vmem>>, vector<1x512xf32>
    %c4 = arith.constant 4 : index
    %c0_12 = arith.constant 0 : index
    %19 = vector.load %arg13[%c4, %c0_12] : memref<16x512xf32, #tpu.memory_space<vmem>>, vector<1x512xf32>
    tpu.vector_store %arg13[%c4, %c0_12], %18 {strides = array<i32>} : memref<16x512xf32, #tpu.memory_space<vmem>>, vector<1x512xf32>,
    %c10 = arith.constant 10 : index
    %20 = memref.load %arg0[%c10] : memref<16xi32, #tpu.memory_space<smem>>
    %21 = arith.index_cast %20 : i32 to index
    %c0_13 = arith.constant 0 : index
    %22 = vector.load %arg3[%21, %c0_13] : memref<128x512xf32, #tpu.memory_space<vmem>>, vector<1x512xf32>
    %c5 = arith.constant 5 : index
    %c0_14 = arith.constant 0 : index
    %23 = vector.load %arg13[%c5, %c0_14] : memref<16x512xf32, #tpu.memory_space<vmem>>, vector<1x512xf32>
    tpu.vector_store %arg13[%c5, %c0_14], %22 {strides = array<i32>} : memref<16x512xf32, #tpu.memory_space<vmem>>, vector<1x512xf32>,
    %c3_15 = arith.constant 3 : index
    %24 = memref.load %arg0[%c3_15] : memref<16xi32, #tpu.memory_space<smem>>
    %25 = arith.index_cast %24 : i32 to index
    %c0_16 = arith.constant 0 : index
    %26 = vector.load %arg3[%25, %c0_16] : memref<128x512xf32, #tpu.memory_space<vmem>>, vector<1x512xf32>
    %c6 = arith.constant 6 : index
    %c0_17 = arith.constant 0 : index
    %27 = vector.load %arg13[%c6, %c0_17] : memref<16x512xf32, #tpu.memory_space<vmem>>, vector<1x512xf32>
    tpu.vector_store %arg13[%c6, %c0_17], %26 {strides = array<i32>} : memref<16x512xf32, #tpu.memory_space<vmem>>, vector<1x512xf32>,
    %c11 = arith.constant 11 : index
    %28 = memref.load %arg0[%c11] : memref<16xi32, #tpu.memory_space<smem>>
    %29 = arith.index_cast %28 : i32 to index
    %c0_18 = arith.constant 0 : index
    %30 = vector.load %arg3[%29, %c0_18] : memref<128x512xf32, #tpu.memory_space<vmem>>, vector<1x512xf32>
    %c7 = arith.constant 7 : index
    %c0_19 = arith.constant 0 : index
    %31 = vector.load %arg13[%c7, %c0_19] : memref<16x512xf32, #tpu.memory_space<vmem>>, vector<1x512xf32>
    tpu.vector_store %arg13[%c7, %c0_19], %30 {strides = array<i32>} : memref<16x512xf32, #tpu.memory_space<vmem>>, vector<1x512xf32>,
    %c4_20 = arith.constant 4 : index
    %32 = memref.load %arg0[%c4_20] : memref<16xi32, #tpu.memory_space<smem>>
    %33 = arith.index_cast %32 : i32 to index
    %c0_21 = arith.constant 0 : index
    %34 = vector.load %arg3[%33, %c0_21] : memref<128x512xf32, #tpu.memory_space<vmem>>, vector<1x512xf32>
    %c8_22 = arith.constant 8 : index
    %c0_23 = arith.constant 0 : index
    %35 = vector.load %arg13[%c8_22, %c0_23] : memref<16x512xf32, #tpu.memory_space<vmem>>, vector<1x512xf32>
    tpu.vector_store %arg13[%c8_22, %c0_23], %34 {strides = array<i32>} : memref<16x512xf32, #tpu.memory_space<vmem>>, vector<1x512xf32>,
    %c12 = arith.constant 12 : index
    %36 = memref.load %arg0[%c12] : memref<16xi32, #tpu.memory_space<smem>>
    %37 = arith.index_cast %36 : i32 to index
    %c0_24 = arith.constant 0 : index
    %38 = vector.load %arg3[%37, %c0_24] : memref<128x512xf32, #tpu.memory_space<vmem>>, vector<1x512xf32>
    %c9_25 = arith.constant 9 : index
    %c0_26 = arith.constant 0 : index
    %39 = vector.load %arg13[%c9_25, %c0_26] : memref<16x512xf32, #tpu.memory_space<vmem>>, vector<1x512xf32>
    tpu.vector_store %arg13[%c9_25, %c0_26], %38 {strides = array<i32>} : memref<16x512xf32, #tpu.memory_space<vmem>>, vector<1x512xf32>,
    %c5_27 = arith.constant 5 : index
    %40 = memref.load %arg0[%c5_27] : memref<16xi32, #tpu.memory_space<smem>>
    %41 = arith.index_cast %40 : i32 to index
    %c0_28 = arith.constant 0 : index
    %42 = vector.load %arg3[%41, %c0_28] : memref<128x512xf32, #tpu.memory_space<vmem>>, vector<1x512xf32>
    %c10_29 = arith.constant 10 : index
    %c0_30 = arith.constant 0 : index
    %43 = vector.load %arg13[%c10_29, %c0_30] : memref<16x512xf32, #tpu.memory_space<vmem>>, vector<1x512xf32>
    tpu.vector_store %arg13[%c10_29, %c0_30], %42 {strides = array<i32>} : memref<16x512xf32, #tpu.memory_space<vmem>>, vector<1x512xf32>,
    %c13 = arith.constant 13 : index
    %44 = memref.load %arg0[%c13] : memref<16xi32, #tpu.memory_space<smem>>
    %45 = arith.index_cast %44 : i32 to index
    %c0_31 = arith.constant 0 : index
    %46 = vector.load %arg3[%45, %c0_31] : memref<128x512xf32, #tpu.memory_space<vmem>>, vector<1x512xf32>
    %c11_32 = arith.constant 11 : index
    %c0_33 = arith.constant 0 : index
    %47 = vector.load %arg13[%c11_32, %c0_33] : memref<16x512xf32, #tpu.memory_space<vmem>>, vector<1x512xf32>
    tpu.vector_store %arg13[%c11_32, %c0_33], %46 {strides = array<i32>} : memref<16x512xf32, #tpu.memory_space<vmem>>, vector<1x512xf32>,
    %c6_34 = arith.constant 6 : index
    %48 = memref.load %arg0[%c6_34] : memref<16xi32, #tpu.memory_space<smem>>
    %49 = arith.index_cast %48 : i32 to index
    %c0_35 = arith.constant 0 : index
    %50 = vector.load %arg3[%49, %c0_35] : memref<128x512xf32, #tpu.memory_space<vmem>>, vector<1x512xf32>
    %c12_36 = arith.constant 12 : index
    %c0_37 = arith.constant 0 : index
    %51 = vector.load %arg13[%c12_36, %c0_37] : memref<16x512xf32, #tpu.memory_space<vmem>>, vector<1x512xf32>
    tpu.vector_store %arg13[%c12_36, %c0_37], %50 {strides = array<i32>} : memref<16x512xf32, #tpu.memory_space<vmem>>, vector<1x512xf32>,
    %c14 = arith.constant 14 : index
    %52 = memref.load %arg0[%c14] : memref<16xi32, #tpu.memory_space<smem>>
    %53 = arith.index_cast %52 : i32 to index
    %c0_38 = arith.constant 0 : index
    %54 = vector.load %arg3[%53, %c0_38] : memref<128x512xf32, #tpu.memory_space<vmem>>, vector<1x512xf32>
    %c13_39 = arith.constant 13 : index
    %c0_40 = arith.constant 0 : index
    %55 = vector.load %arg13[%c13_39, %c0_40] : memref<16x512xf32, #tpu.memory_space<vmem>>, vector<1x512xf32>
    tpu.vector_store %arg13[%c13_39, %c0_40], %54 {strides = array<i32>} : memref<16x512xf32, #tpu.memory_space<vmem>>, vector<1x512xf32>,
    %c7_41 = arith.constant 7 : index
    %56 = memref.load %arg0[%c7_41] : memref<16xi32, #tpu.memory_space<smem>>
    %57 = arith.index_cast %56 : i32 to index
    %c0_42 = arith.constant 0 : index
    %58 = vector.load %arg3[%57, %c0_42] : memref<128x512xf32, #tpu.memory_space<vmem>>, vector<1x512xf32>
    %c14_43 = arith.constant 14 : index
    %c0_44 = arith.constant 0 : index
    %59 = vector.load %arg13[%c14_43, %c0_44] : memref<16x512xf32, #tpu.memory_space<vmem>>, vector<1x512xf32>
    tpu.vector_store %arg13[%c14_43, %c0_44], %58 {strides = array<i32>} : memref<16x512xf32, #tpu.memory_space<vmem>>, vector<1x512xf32>,
    %c15 = arith.constant 15 : index
    %60 = memref.load %arg0[%c15] : memref<16xi32, #tpu.memory_space<smem>>
    %61 = arith.index_cast %60 : i32 to index
    %c0_45 = arith.constant 0 : index
    %62 = vector.load %arg3[%61, %c0_45] : memref<128x512xf32, #tpu.memory_space<vmem>>, vector<1x512xf32>
    %c15_46 = arith.constant 15 : index
    %c0_47 = arith.constant 0 : index
    %63 = vector.load %arg13[%c15_46, %c0_47] : memref<16x512xf32, #tpu.memory_space<vmem>>, vector<1x512xf32>
    tpu.vector_store %arg13[%c15_46, %c0_47], %62 {strides = array<i32>} : memref<16x512xf32, #tpu.memory_space<vmem>>, vector<1x512xf32>,
    %c0_48 = arith.constant 0 : index
    %c0_49 = arith.constant 0 : index
    %c0_50 = arith.constant 0 : index
    %64 = vector.load %arg1[%c0_48, %c0_49, %c0_50] : memref<2x2x128xf32, #tpu.memory_space<vmem>>, vector<1x2x128xf32>
    %65 = vector.shape_cast %64 : vector<1x2x128xf32> to vector<2x128xf32>
    %c0_51 = arith.constant 0 : index
    %c0_52 = arith.constant 0 : index
    %c0_53 = arith.constant 0 : index
    %66 = vector.load %arg2[%c0_51, %c0_52, %c0_53] : memref<2x2x128xf32, #tpu.memory_space<vmem>>, vector<1x2x128xf32>
    %67 = vector.shape_cast %66 : vector<1x2x128xf32> to vector<2x128xf32>
    %c0_54 = arith.constant 0 : index
    %c0_55 = arith.constant 0 : index
    %68 = vector.load %arg13[%c0_54, %c0_55] : memref<16x512xf32, #tpu.memory_space<vmem>>, vector<2x512xf32>
    %c0_56 = arith.constant 0 : index
    %c0_57 = arith.constant 0 : index
    %69 = vector.load %arg4[%c0_56, %c0_57] : memref<128x512xf32, #tpu.memory_space<vmem>>, vector<128x512xf32>
    %cst = arith.constant dense<0.000000e+00> : vector<2x512xf32>
    %70 = tpu.matmul %65, %69, %cst {dimension_numbers = #tpu.dot_dimension_numbers<[1], [0], [0], [1], [0, 0, 1, 1], [], []>} : vector<2x128xf32>, vector<128x512xf32>, vector<2x512xf32> -> vector<2x512xf32>
    %71 = arith.addf %68, %70 : vector<2x512xf32>
    %72 = vector.extract_strided_slice %71 {offsets = [0, 0], sizes = [2, 384], strides = [1, 1]} : vector<2x512xf32> to vector<2x384xf32>
    %73 = arith.negf %72 : vector<2x384xf32>
    %74 = math.exp %73 : vector<2x384xf32>
    %cst_58 = arith.constant 1.000000e+00 : f32
    %75 = vector.broadcast %cst_58 : f32 to vector<2x384xf32>
    %76 = arith.addf %75, %74 : vector<2x384xf32>
    %77 = arith.divf %75, %76 : vector<2x384xf32>
    %78 = vector.extract_strided_slice %77 {offsets = [0, 0], sizes = [2, 128], strides = [1, 1]} : vector<2x384xf32> to vector<2x128xf32>
    %79 = vector.extract_strided_slice %77 {offsets = [0, 128], sizes = [2, 128], strides = [1, 1]} : vector<2x384xf32> to vector<2x128xf32>
    %80 = vector.extract_strided_slice %77 {offsets = [0, 256], sizes = [2, 128], strides = [1, 1]} : vector<2x384xf32> to vector<2x128xf32>
    %81 = vector.extract_strided_slice %71 {offsets = [0, 384], sizes = [2, 128], strides = [1, 1]} : vector<2x512xf32> to vector<2x128xf32>
    %82 = math.tanh %81 : vector<2x128xf32>
    %83 = arith.mulf %79, %67 : vector<2x128xf32>
    %84 = arith.mulf %78, %82 : vector<2x128xf32>
    %85 = arith.addf %83, %84 : vector<2x128xf32>
    %86 = math.tanh %85 : vector<2x128xf32>
    %87 = arith.mulf %80, %86 : vector<2x128xf32>
    %c0_59 = arith.constant 0 : index
    %c0_60 = arith.constant 0 : index
    %88 = vector.load %arg14[%c0_59, %c0_60] : memref<16x128xf32, #tpu.memory_space<vmem>>, vector<2x128xf32>
    tpu.vector_store %arg14[%c0_59, %c0_60], %87 {strides = array<i32>} : memref<16x128xf32, #tpu.memory_space<vmem>>, vector<2x128xf32>,
    %c2_61 = arith.constant 2 : index
    %c0_62 = arith.constant 0 : index
    %89 = vector.load %arg13[%c2_61, %c0_62] : memref<16x512xf32, #tpu.memory_space<vmem>>, vector<2x512xf32>
    %c0_63 = arith.constant 0 : index
    %c0_64 = arith.constant 0 : index
    %90 = vector.load %arg4[%c0_63, %c0_64] : memref<128x512xf32, #tpu.memory_space<vmem>>, vector<128x512xf32>
    %cst_65 = arith.constant dense<0.000000e+00> : vector<2x512xf32>
    %91 = tpu.matmul %87, %90, %cst_65 {dimension_numbers = #tpu.dot_dimension_numbers<[1], [0], [0], [1], [0, 0, 1, 1], [], []>} : vector<2x128xf32>, vector<128x512xf32>, vector<2x512xf32> -> vector<2x512xf32>
    %92 = arith.addf %89, %91 : vector<2x512xf32>
    %93 = vector.extract_strided_slice %92 {offsets = [0, 0], sizes = [2, 384], strides = [1, 1]} : vector<2x512xf32> to vector<2x384xf32>
    %94 = arith.negf %93 : vector<2x384xf32>
    %95 = math.exp %94 : vector<2x384xf32>
    %cst_66 = arith.constant 1.000000e+00 : f32
    %96 = vector.broadcast %cst_66 : f32 to vector<2x384xf32>
    %97 = arith.addf %96, %95 : vector<2x384xf32>
    %98 = arith.divf %96, %97 : vector<2x384xf32>
    %99 = vector.extract_strided_slice %98 {offsets = [0, 0], sizes = [2, 128], strides = [1, 1]} : vector<2x384xf32> to vector<2x128xf32>
    %100 = vector.extract_strided_slice %98 {offsets = [0, 128], sizes = [2, 128], strides = [1, 1]} : vector<2x384xf32> to vector<2x128xf32>
    %101 = vector.extract_strided_slice %98 {offsets = [0, 256], sizes = [2, 128], strides = [1, 1]} : vector<2x384xf32> to vector<2x128xf32>
    %102 = vector.extract_strided_slice %92 {offsets = [0, 384], sizes = [2, 128], strides = [1, 1]} : vector<2x512xf32> to vector<2x128xf32>
    %103 = math.tanh %102 : vector<2x128xf32>
    %104 = arith.mulf %100, %85 : vector<2x128xf32>
    %105 = arith.mulf %99, %103 : vector<2x128xf32>
    %106 = arith.addf %104, %105 : vector<2x128xf32>
    %107 = math.tanh %106 : vector<2x128xf32>
    %108 = arith.mulf %101, %107 : vector<2x128xf32>
    %c2_67 = arith.constant 2 : index
    %c0_68 = arith.constant 0 : index
    %109 = vector.load %arg14[%c2_67, %c0_68] : memref<16x128xf32, #tpu.memory_space<vmem>>, vector<2x128xf32>
    tpu.vector_store %arg14[%c2_67, %c0_68], %108 {strides = array<i32>} : memref<16x128xf32, #tpu.memory_space<vmem>>, vector<2x128xf32>,
    %c4_69 = arith.constant 4 : index
    %c0_70 = arith.constant 0 : index
    %110 = vector.load %arg13[%c4_69, %c0_70] : memref<16x512xf32, #tpu.memory_space<vmem>>, vector<2x512xf32>
    %c0_71 = arith.constant 0 : index
    %c0_72 = arith.constant 0 : index
    %111 = vector.load %arg4[%c0_71, %c0_72] : memref<128x512xf32, #tpu.memory_space<vmem>>, vector<128x512xf32>
    %cst_73 = arith.constant dense<0.000000e+00> : vector<2x512xf32>
    %112 = tpu.matmul %108, %111, %cst_73 {dimension_numbers = #tpu.dot_dimension_numbers<[1], [0], [0], [1], [0, 0, 1, 1], [], []>} : vector<2x128xf32>, vector<128x512xf32>, vector<2x512xf32> -> vector<2x512xf32>
    %113 = arith.addf %110, %112 : vector<2x512xf32>
    %114 = vector.extract_strided_slice %113 {offsets = [0, 0], sizes = [2, 384], strides = [1, 1]} : vector<2x512xf32> to vector<2x384xf32>
    %115 = arith.negf %114 : vector<2x384xf32>
    %116 = math.exp %115 : vector<2x384xf32>
    %cst_74 = arith.constant 1.000000e+00 : f32
    %117 = vector.broadcast %cst_74 : f32 to vector<2x384xf32>
    %118 = arith.addf %117, %116 : vector<2x384xf32>
    %119 = arith.divf %117, %118 : vector<2x384xf32>
    %120 = vector.extract_strided_slice %119 {offsets = [0, 0], sizes = [2, 128], strides = [1, 1]} : vector<2x384xf32> to vector<2x128xf32>
    %121 = vector.extract_strided_slice %119 {offsets = [0, 128], sizes = [2, 128], strides = [1, 1]} : vector<2x384xf32> to vector<2x128xf32>
    %122 = vector.extract_strided_slice %119 {offsets = [0, 256], sizes = [2, 128], strides = [1, 1]} : vector<2x384xf32> to vector<2x128xf32>
    %123 = vector.extract_strided_slice %113 {offsets = [0, 384], sizes = [2, 128], strides = [1, 1]} : vector<2x512xf32> to vector<2x128xf32>
    %124 = math.tanh %123 : vector<2x128xf32>
    %125 = arith.mulf %121, %106 : vector<2x128xf32>
    %126 = arith.mulf %120, %124 : vector<2x128xf32>
    %127 = arith.addf %125, %126 : vector<2x128xf32>
    %128 = math.tanh %127 : vector<2x128xf32>
    %129 = arith.mulf %122, %128 : vector<2x128xf32>
    %c4_75 = arith.constant 4 : index
    %c0_76 = arith.constant 0 : index
    %130 = vector.load %arg14[%c4_75, %c0_76] : memref<16x128xf32, #tpu.memory_space<vmem>>, vector<2x128xf32>
    tpu.vector_store %arg14[%c4_75, %c0_76], %129 {strides = array<i32>} : memref<16x128xf32, #tpu.memory_space<vmem>>, vector<2x128xf32>,
    %c6_77 = arith.constant 6 : index
    %c0_78 = arith.constant 0 : index
    %131 = vector.load %arg13[%c6_77, %c0_78] : memref<16x512xf32, #tpu.memory_space<vmem>>, vector<2x512xf32>
    %c0_79 = arith.constant 0 : index
    %c0_80 = arith.constant 0 : index
    %132 = vector.load %arg4[%c0_79, %c0_80] : memref<128x512xf32, #tpu.memory_space<vmem>>, vector<128x512xf32>
    %cst_81 = arith.constant dense<0.000000e+00> : vector<2x512xf32>
    %133 = tpu.matmul %129, %132, %cst_81 {dimension_numbers = #tpu.dot_dimension_numbers<[1], [0], [0], [1], [0, 0, 1, 1], [], []>} : vector<2x128xf32>, vector<128x512xf32>, vector<2x512xf32> -> vector<2x512xf32>
    %134 = arith.addf %131, %133 : vector<2x512xf32>
    %135 = vector.extract_strided_slice %134 {offsets = [0, 0], sizes = [2, 384], strides = [1, 1]} : vector<2x512xf32> to vector<2x384xf32>
    %136 = arith.negf %135 : vector<2x384xf32>
    %137 = math.exp %136 : vector<2x384xf32>
    %cst_82 = arith.constant 1.000000e+00 : f32
    %138 = vector.broadcast %cst_82 : f32 to vector<2x384xf32>
    %139 = arith.addf %138, %137 : vector<2x384xf32>
    %140 = arith.divf %138, %139 : vector<2x384xf32>
    %141 = vector.extract_strided_slice %140 {offsets = [0, 0], sizes = [2, 128], strides = [1, 1]} : vector<2x384xf32> to vector<2x128xf32>
    %142 = vector.extract_strided_slice %140 {offsets = [0, 128], sizes = [2, 128], strides = [1, 1]} : vector<2x384xf32> to vector<2x128xf32>
    %143 = vector.extract_strided_slice %140 {offsets = [0, 256], sizes = [2, 128], strides = [1, 1]} : vector<2x384xf32> to vector<2x128xf32>
    %144 = vector.extract_strided_slice %134 {offsets = [0, 384], sizes = [2, 128], strides = [1, 1]} : vector<2x512xf32> to vector<2x128xf32>
    %145 = math.tanh %144 : vector<2x128xf32>
    %146 = arith.mulf %142, %127 : vector<2x128xf32>
    %147 = arith.mulf %141, %145 : vector<2x128xf32>
    %148 = arith.addf %146, %147 : vector<2x128xf32>
    %149 = math.tanh %148 : vector<2x128xf32>
    %150 = arith.mulf %143, %149 : vector<2x128xf32>
    %c6_83 = arith.constant 6 : index
    %c0_84 = arith.constant 0 : index
    %151 = vector.load %arg14[%c6_83, %c0_84] : memref<16x128xf32, #tpu.memory_space<vmem>>, vector<2x128xf32>
    tpu.vector_store %arg14[%c6_83, %c0_84], %150 {strides = array<i32>} : memref<16x128xf32, #tpu.memory_space<vmem>>, vector<2x128xf32>,
    %c8_85 = arith.constant 8 : index
    %c0_86 = arith.constant 0 : index
    %152 = vector.load %arg13[%c8_85, %c0_86] : memref<16x512xf32, #tpu.memory_space<vmem>>, vector<2x512xf32>
    %c0_87 = arith.constant 0 : index
    %c0_88 = arith.constant 0 : index
    %153 = vector.load %arg4[%c0_87, %c0_88] : memref<128x512xf32, #tpu.memory_space<vmem>>, vector<128x512xf32>
    %cst_89 = arith.constant dense<0.000000e+00> : vector<2x512xf32>
    %154 = tpu.matmul %150, %153, %cst_89 {dimension_numbers = #tpu.dot_dimension_numbers<[1], [0], [0], [1], [0, 0, 1, 1], [], []>} : vector<2x128xf32>, vector<128x512xf32>, vector<2x512xf32> -> vector<2x512xf32>
    %155 = arith.addf %152, %154 : vector<2x512xf32>
    %156 = vector.extract_strided_slice %155 {offsets = [0, 0], sizes = [2, 384], strides = [1, 1]} : vector<2x512xf32> to vector<2x384xf32>
    %157 = arith.negf %156 : vector<2x384xf32>
    %158 = math.exp %157 : vector<2x384xf32>
    %cst_90 = arith.constant 1.000000e+00 : f32
    %159 = vector.broadcast %cst_90 : f32 to vector<2x384xf32>
    %160 = arith.addf %159, %158 : vector<2x384xf32>
    %161 = arith.divf %159, %160 : vector<2x384xf32>
    %162 = vector.extract_strided_slice %161 {offsets = [0, 0], sizes = [2, 128], strides = [1, 1]} : vector<2x384xf32> to vector<2x128xf32>
    %163 = vector.extract_strided_slice %161 {offsets = [0, 128], sizes = [2, 128], strides = [1, 1]} : vector<2x384xf32> to vector<2x128xf32>
    %164 = vector.extract_strided_slice %161 {offsets = [0, 256], sizes = [2, 128], strides = [1, 1]} : vector<2x384xf32> to vector<2x128xf32>
    %165 = vector.extract_strided_slice %155 {offsets = [0, 384], sizes = [2, 128], strides = [1, 1]} : vector<2x512xf32> to vector<2x128xf32>
    %166 = math.tanh %165 : vector<2x128xf32>
    %167 = arith.mulf %163, %148 : vector<2x128xf32>
    %168 = arith.mulf %162, %166 : vector<2x128xf32>
    %169 = arith.addf %167, %168 : vector<2x128xf32>
    %170 = math.tanh %169 : vector<2x128xf32>
    %171 = arith.mulf %164, %170 : vector<2x128xf32>
    %c8_91 = arith.constant 8 : index
    %c0_92 = arith.constant 0 : index
    %172 = vector.load %arg14[%c8_91, %c0_92] : memref<16x128xf32, #tpu.memory_space<vmem>>, vector<2x128xf32>
    tpu.vector_store %arg14[%c8_91, %c0_92], %171 {strides = array<i32>} : memref<16x128xf32, #tpu.memory_space<vmem>>, vector<2x128xf32>,
    %c10_93 = arith.constant 10 : index
    %c0_94 = arith.constant 0 : index
    %173 = vector.load %arg13[%c10_93, %c0_94] : memref<16x512xf32, #tpu.memory_space<vmem>>, vector<2x512xf32>
    %c0_95 = arith.constant 0 : index
    %c0_96 = arith.constant 0 : index
    %174 = vector.load %arg4[%c0_95, %c0_96] : memref<128x512xf32, #tpu.memory_space<vmem>>, vector<128x512xf32>
    %cst_97 = arith.constant dense<0.000000e+00> : vector<2x512xf32>
    %175 = tpu.matmul %171, %174, %cst_97 {dimension_numbers = #tpu.dot_dimension_numbers<[1], [0], [0], [1], [0, 0, 1, 1], [], []>} : vector<2x128xf32>, vector<128x512xf32>, vector<2x512xf32> -> vector<2x512xf32>
    %176 = arith.addf %173, %175 : vector<2x512xf32>
    %177 = vector.extract_strided_slice %176 {offsets = [0, 0], sizes = [2, 384], strides = [1, 1]} : vector<2x512xf32> to vector<2x384xf32>
    %178 = arith.negf %177 : vector<2x384xf32>
    %179 = math.exp %178 : vector<2x384xf32>
    %cst_98 = arith.constant 1.000000e+00 : f32
    %180 = vector.broadcast %cst_98 : f32 to vector<2x384xf32>
    %181 = arith.addf %180, %179 : vector<2x384xf32>
    %182 = arith.divf %180, %181 : vector<2x384xf32>
    %183 = vector.extract_strided_slice %182 {offsets = [0, 0], sizes = [2, 128], strides = [1, 1]} : vector<2x384xf32> to vector<2x128xf32>
    %184 = vector.extract_strided_slice %182 {offsets = [0, 128], sizes = [2, 128], strides = [1, 1]} : vector<2x384xf32> to vector<2x128xf32>
    %185 = vector.extract_strided_slice %182 {offsets = [0, 256], sizes = [2, 128], strides = [1, 1]} : vector<2x384xf32> to vector<2x128xf32>
    %186 = vector.extract_strided_slice %176 {offsets = [0, 384], sizes = [2, 128], strides = [1, 1]} : vector<2x512xf32> to vector<2x128xf32>
    %187 = math.tanh %186 : vector<2x128xf32>
    %188 = arith.mulf %184, %169 : vector<2x128xf32>
    %189 = arith.mulf %183, %187 : vector<2x128xf32>
    %190 = arith.addf %188, %189 : vector<2x128xf32>
    %191 = math.tanh %190 : vector<2x128xf32>
    %192 = arith.mulf %185, %191 : vector<2x128xf32>
    %c10_99 = arith.constant 10 : index
    %c0_100 = arith.constant 0 : index
    %193 = vector.load %arg14[%c10_99, %c0_100] : memref<16x128xf32, #tpu.memory_space<vmem>>, vector<2x128xf32>
    tpu.vector_store %arg14[%c10_99, %c0_100], %192 {strides = array<i32>} : memref<16x128xf32, #tpu.memory_space<vmem>>, vector<2x128xf32>,
    %c12_101 = arith.constant 12 : index
    %c0_102 = arith.constant 0 : index
    %194 = vector.load %arg13[%c12_101, %c0_102] : memref<16x512xf32, #tpu.memory_space<vmem>>, vector<2x512xf32>
    %c0_103 = arith.constant 0 : index
    %c0_104 = arith.constant 0 : index
    %195 = vector.load %arg4[%c0_103, %c0_104] : memref<128x512xf32, #tpu.memory_space<vmem>>, vector<128x512xf32>
    %cst_105 = arith.constant dense<0.000000e+00> : vector<2x512xf32>
    %196 = tpu.matmul %192, %195, %cst_105 {dimension_numbers = #tpu.dot_dimension_numbers<[1], [0], [0], [1], [0, 0, 1, 1], [], []>} : vector<2x128xf32>, vector<128x512xf32>, vector<2x512xf32> -> vector<2x512xf32>
    %197 = arith.addf %194, %196 : vector<2x512xf32>
    %198 = vector.extract_strided_slice %197 {offsets = [0, 0], sizes = [2, 384], strides = [1, 1]} : vector<2x512xf32> to vector<2x384xf32>
    %199 = arith.negf %198 : vector<2x384xf32>
    %200 = math.exp %199 : vector<2x384xf32>
    %cst_106 = arith.constant 1.000000e+00 : f32
    %201 = vector.broadcast %cst_106 : f32 to vector<2x384xf32>
    %202 = arith.addf %201, %200 : vector<2x384xf32>
    %203 = arith.divf %201, %202 : vector<2x384xf32>
    %204 = vector.extract_strided_slice %203 {offsets = [0, 0], sizes = [2, 128], strides = [1, 1]} : vector<2x384xf32> to vector<2x128xf32>
    %205 = vector.extract_strided_slice %203 {offsets = [0, 128], sizes = [2, 128], strides = [1, 1]} : vector<2x384xf32> to vector<2x128xf32>
    %206 = vector.extract_strided_slice %203 {offsets = [0, 256], sizes = [2, 128], strides = [1, 1]} : vector<2x384xf32> to vector<2x128xf32>
    %207 = vector.extract_strided_slice %197 {offsets = [0, 384], sizes = [2, 128], strides = [1, 1]} : vector<2x512xf32> to vector<2x128xf32>
    %208 = math.tanh %207 : vector<2x128xf32>
    %209 = arith.mulf %205, %190 : vector<2x128xf32>
    %210 = arith.mulf %204, %208 : vector<2x128xf32>
    %211 = arith.addf %209, %210 : vector<2x128xf32>
    %212 = math.tanh %211 : vector<2x128xf32>
    %213 = arith.mulf %206, %212 : vector<2x128xf32>
    %c12_107 = arith.constant 12 : index
    %c0_108 = arith.constant 0 : index
    %214 = vector.load %arg14[%c12_107, %c0_108] : memref<16x128xf32, #tpu.memory_space<vmem>>, vector<2x128xf32>
    tpu.vector_store %arg14[%c12_107, %c0_108], %213 {strides = array<i32>} : memref<16x128xf32, #tpu.memory_space<vmem>>, vector<2x128xf32>,
    %c14_109 = arith.constant 14 : index
    %c0_110 = arith.constant 0 : index
    %215 = vector.load %arg13[%c14_109, %c0_110] : memref<16x512xf32, #tpu.memory_space<vmem>>, vector<2x512xf32>
    %c0_111 = arith.constant 0 : index
    %c0_112 = arith.constant 0 : index
    %216 = vector.load %arg4[%c0_111, %c0_112] : memref<128x512xf32, #tpu.memory_space<vmem>>, vector<128x512xf32>
    %cst_113 = arith.constant dense<0.000000e+00> : vector<2x512xf32>
    %217 = tpu.matmul %213, %216, %cst_113 {dimension_numbers = #tpu.dot_dimension_numbers<[1], [0], [0], [1], [0, 0, 1, 1], [], []>} : vector<2x128xf32>, vector<128x512xf32>, vector<2x512xf32> -> vector<2x512xf32>
    %218 = arith.addf %215, %217 : vector<2x512xf32>
    %219 = vector.extract_strided_slice %218 {offsets = [0, 0], sizes = [2, 384], strides = [1, 1]} : vector<2x512xf32> to vector<2x384xf32>
    %220 = arith.negf %219 : vector<2x384xf32>
    %221 = math.exp %220 : vector<2x384xf32>
    %cst_114 = arith.constant 1.000000e+00 : f32
    %222 = vector.broadcast %cst_114 : f32 to vector<2x384xf32>
    %223 = arith.addf %222, %221 : vector<2x384xf32>
    %224 = arith.divf %222, %223 : vector<2x384xf32>
    %225 = vector.extract_strided_slice %224 {offsets = [0, 0], sizes = [2, 128], strides = [1, 1]} : vector<2x384xf32> to vector<2x128xf32>
    %226 = vector.extract_strided_slice %224 {offsets = [0, 128], sizes = [2, 128], strides = [1, 1]} : vector<2x384xf32> to vector<2x128xf32>
    %227 = vector.extract_strided_slice %224 {offsets = [0, 256], sizes = [2, 128], strides = [1, 1]} : vector<2x384xf32> to vector<2x128xf32>
    %228 = vector.extract_strided_slice %218 {offsets = [0, 384], sizes = [2, 128], strides = [1, 1]} : vector<2x512xf32> to vector<2x128xf32>
    %229 = math.tanh %228 : vector<2x128xf32>
    %230 = arith.mulf %226, %211 : vector<2x128xf32>
    %231 = arith.mulf %225, %229 : vector<2x128xf32>
    %232 = arith.addf %230, %231 : vector<2x128xf32>
    %233 = math.tanh %232 : vector<2x128xf32>
    %234 = arith.mulf %227, %233 : vector<2x128xf32>
    %c14_115 = arith.constant 14 : index
    %c0_116 = arith.constant 0 : index
    %235 = vector.load %arg14[%c14_115, %c0_116] : memref<16x128xf32, #tpu.memory_space<vmem>>, vector<2x128xf32>
    tpu.vector_store %arg14[%c14_115, %c0_116], %234 {strides = array<i32>} : memref<16x128xf32, #tpu.memory_space<vmem>>, vector<2x128xf32>,
    %c0_117 = arith.constant 0 : index
    %c0_118 = arith.constant 0 : index
    %c0_119 = arith.constant 0 : index
    %236 = vector.load %arg11[%c0_117, %c0_118, %c0_119] : memref<2x2x128xf32, #tpu.memory_space<vmem>>, vector<1x2x128xf32>
    %237 = vector.shape_cast %236 : vector<1x2x128xf32> to vector<2x128xf32>
    %238 = vector.shape_cast %234 : vector<2x128xf32> to vector<1x2x128xf32>
    tpu.vector_store %arg11[%c0_117, %c0_118, %c0_119], %238 {strides = array<i32>} : memref<2x2x128xf32, #tpu.memory_space<vmem>>, vector<1x2x128xf32>,
    %c0_120 = arith.constant 0 : index
    %c0_121 = arith.constant 0 : index
    %c0_122 = arith.constant 0 : index
    %239 = vector.load %arg12[%c0_120, %c0_121, %c0_122] : memref<2x2x128xf32, #tpu.memory_space<vmem>>, vector<1x2x128xf32>
    %240 = vector.shape_cast %239 : vector<1x2x128xf32> to vector<2x128xf32>
    %241 = vector.shape_cast %232 : vector<2x128xf32> to vector<1x2x128xf32>
    tpu.vector_store %arg12[%c0_120, %c0_121, %c0_122], %241 {strides = array<i32>} : memref<2x2x128xf32, #tpu.memory_space<vmem>>, vector<1x2x128xf32>,
    %c0_123 = arith.constant 0 : index
    %c0_124 = arith.constant 0 : index
    %242 = vector.load %arg14[%c0_123, %c0_124] : memref<16x128xf32, #tpu.memory_space<vmem>>, vector<16x128xf32>
    %c0_125 = arith.constant 0 : index
    %c0_126 = arith.constant 0 : index
    %243 = vector.load %arg5[%c0_125, %c0_126] : memref<128x512xf32, #tpu.memory_space<vmem>>, vector<128x512xf32>
    %cst_127 = arith.constant dense<0.000000e+00> : vector<16x512xf32>
    %244 = tpu.matmul %242, %243, %cst_127 {dimension_numbers = #tpu.dot_dimension_numbers<[1], [0], [0], [1], [0, 0, 1, 1], [], []>} : vector<16x128xf32>, vector<128x512xf32>, vector<16x512xf32> -> vector<16x512xf32>
    %c0_128 = arith.constant 0 : index
    %c0_129 = arith.constant 0 : index
    %245 = vector.load %arg7[%c0_128, %c0_129] : memref<1x512xf32, #tpu.memory_space<vmem>>, vector<1x512xf32>
    %246 = vector.broadcast %245 : vector<1x512xf32> to vector<16x512xf32>
    %247 = arith.addf %244, %246 : vector<16x512xf32>
    %c0_130 = arith.constant 0 : index
    %c0_131 = arith.constant 0 : index
    %248 = vector.load %arg13[%c0_130, %c0_131] : memref<16x512xf32, #tpu.memory_space<vmem>>, vector<16x512xf32>
    tpu.vector_store %arg13[%c0_130, %c0_131], %247 {strides = array<i32>} : memref<16x512xf32, #tpu.memory_space<vmem>>, vector<16x512xf32>,
    %c1_132 = arith.constant 1 : index
    %c0_133 = arith.constant 0 : index
    %c0_134 = arith.constant 0 : index
    %249 = vector.load %arg1[%c1_132, %c0_133, %c0_134] : memref<2x2x128xf32, #tpu.memory_space<vmem>>, vector<1x2x128xf32>
    %250 = vector.shape_cast %249 : vector<1x2x128xf32> to vector<2x128xf32>
    %c1_135 = arith.constant 1 : index
    %c0_136 = arith.constant 0 : index
    %c0_137 = arith.constant 0 : index
    %251 = vector.load %arg2[%c1_135, %c0_136, %c0_137] : memref<2x2x128xf32, #tpu.memory_space<vmem>>, vector<1x2x128xf32>
    %252 = vector.shape_cast %251 : vector<1x2x128xf32> to vector<2x128xf32>
    %c0_138 = arith.constant 0 : index
    %c0_139 = arith.constant 0 : index
    %253 = vector.load %arg13[%c0_138, %c0_139] : memref<16x512xf32, #tpu.memory_space<vmem>>, vector<2x512xf32>
    %c0_140 = arith.constant 0 : index
    %c0_141 = arith.constant 0 : index
    %254 = vector.load %arg6[%c0_140, %c0_141] : memref<128x512xf32, #tpu.memory_space<vmem>>, vector<128x512xf32>
    %cst_142 = arith.constant dense<0.000000e+00> : vector<2x512xf32>
    %255 = tpu.matmul %250, %254, %cst_142 {dimension_numbers = #tpu.dot_dimension_numbers<[1], [0], [0], [1], [0, 0, 1, 1], [], []>} : vector<2x128xf32>, vector<128x512xf32>, vector<2x512xf32> -> vector<2x512xf32>
    %256 = arith.addf %253, %255 : vector<2x512xf32>
    %257 = vector.extract_strided_slice %256 {offsets = [0, 0], sizes = [2, 384], strides = [1, 1]} : vector<2x512xf32> to vector<2x384xf32>
    %258 = arith.negf %257 : vector<2x384xf32>
    %259 = math.exp %258 : vector<2x384xf32>
    %cst_143 = arith.constant 1.000000e+00 : f32
    %260 = vector.broadcast %cst_143 : f32 to vector<2x384xf32>
    %261 = arith.addf %260, %259 : vector<2x384xf32>
    %262 = arith.divf %260, %261 : vector<2x384xf32>
    %263 = vector.extract_strided_slice %262 {offsets = [0, 0], sizes = [2, 128], strides = [1, 1]} : vector<2x384xf32> to vector<2x128xf32>
    %264 = vector.extract_strided_slice %262 {offsets = [0, 128], sizes = [2, 128], strides = [1, 1]} : vector<2x384xf32> to vector<2x128xf32>
    %265 = vector.extract_strided_slice %262 {offsets = [0, 256], sizes = [2, 128], strides = [1, 1]} : vector<2x384xf32> to vector<2x128xf32>
    %266 = vector.extract_strided_slice %256 {offsets = [0, 384], sizes = [2, 128], strides = [1, 1]} : vector<2x512xf32> to vector<2x128xf32>
    %267 = math.tanh %266 : vector<2x128xf32>
    %268 = arith.mulf %264, %252 : vector<2x128xf32>
    %269 = arith.mulf %263, %267 : vector<2x128xf32>
    %270 = arith.addf %268, %269 : vector<2x128xf32>
    %271 = math.tanh %270 : vector<2x128xf32>
    %272 = arith.mulf %265, %271 : vector<2x128xf32>
    %c2_144 = arith.constant 2 : index
    %c0_145 = arith.constant 0 : index
    %273 = vector.load %arg13[%c2_144, %c0_145] : memref<16x512xf32, #tpu.memory_space<vmem>>, vector<2x512xf32>
    %c0_146 = arith.constant 0 : index
    %c0_147 = arith.constant 0 : index
    %274 = vector.load %arg6[%c0_146, %c0_147] : memref<128x512xf32, #tpu.memory_space<vmem>>, vector<128x512xf32>
    %cst_148 = arith.constant dense<0.000000e+00> : vector<2x512xf32>
    %275 = tpu.matmul %272, %274, %cst_148 {dimension_numbers = #tpu.dot_dimension_numbers<[1], [0], [0], [1], [0, 0, 1, 1], [], []>} : vector<2x128xf32>, vector<128x512xf32>, vector<2x512xf32> -> vector<2x512xf32>
    %276 = arith.addf %273, %275 : vector<2x512xf32>
    %277 = vector.extract_strided_slice %276 {offsets = [0, 0], sizes = [2, 384], strides = [1, 1]} : vector<2x512xf32> to vector<2x384xf32>
    %278 = arith.negf %277 : vector<2x384xf32>
    %279 = math.exp %278 : vector<2x384xf32>
    %cst_149 = arith.constant 1.000000e+00 : f32
    %280 = vector.broadcast %cst_149 : f32 to vector<2x384xf32>
    %281 = arith.addf %280, %279 : vector<2x384xf32>
    %282 = arith.divf %280, %281 : vector<2x384xf32>
    %283 = vector.extract_strided_slice %282 {offsets = [0, 0], sizes = [2, 128], strides = [1, 1]} : vector<2x384xf32> to vector<2x128xf32>
    %284 = vector.extract_strided_slice %282 {offsets = [0, 128], sizes = [2, 128], strides = [1, 1]} : vector<2x384xf32> to vector<2x128xf32>
    %285 = vector.extract_strided_slice %282 {offsets = [0, 256], sizes = [2, 128], strides = [1, 1]} : vector<2x384xf32> to vector<2x128xf32>
    %286 = vector.extract_strided_slice %276 {offsets = [0, 384], sizes = [2, 128], strides = [1, 1]} : vector<2x512xf32> to vector<2x128xf32>
    %287 = math.tanh %286 : vector<2x128xf32>
    %288 = arith.mulf %284, %270 : vector<2x128xf32>
    %289 = arith.mulf %283, %287 : vector<2x128xf32>
    %290 = arith.addf %288, %289 : vector<2x128xf32>
    %291 = math.tanh %290 : vector<2x128xf32>
    %292 = arith.mulf %285, %291 : vector<2x128xf32>
    %c4_150 = arith.constant 4 : index
    %c0_151 = arith.constant 0 : index
    %293 = vector.load %arg13[%c4_150, %c0_151] : memref<16x512xf32, #tpu.memory_space<vmem>>, vector<2x512xf32>
    %c0_152 = arith.constant 0 : index
    %c0_153 = arith.constant 0 : index
    %294 = vector.load %arg6[%c0_152, %c0_153] : memref<128x512xf32, #tpu.memory_space<vmem>>, vector<128x512xf32>
    %cst_154 = arith.constant dense<0.000000e+00> : vector<2x512xf32>
    %295 = tpu.matmul %292, %294, %cst_154 {dimension_numbers = #tpu.dot_dimension_numbers<[1], [0], [0], [1], [0, 0, 1, 1], [], []>} : vector<2x128xf32>, vector<128x512xf32>, vector<2x512xf32> -> vector<2x512xf32>
    %296 = arith.addf %293, %295 : vector<2x512xf32>
    %297 = vector.extract_strided_slice %296 {offsets = [0, 0], sizes = [2, 384], strides = [1, 1]} : vector<2x512xf32> to vector<2x384xf32>
    %298 = arith.negf %297 : vector<2x384xf32>
    %299 = math.exp %298 : vector<2x384xf32>
    %cst_155 = arith.constant 1.000000e+00 : f32
    %300 = vector.broadcast %cst_155 : f32 to vector<2x384xf32>
    %301 = arith.addf %300, %299 : vector<2x384xf32>
    %302 = arith.divf %300, %301 : vector<2x384xf32>
    %303 = vector.extract_strided_slice %302 {offsets = [0, 0], sizes = [2, 128], strides = [1, 1]} : vector<2x384xf32> to vector<2x128xf32>
    %304 = vector.extract_strided_slice %302 {offsets = [0, 128], sizes = [2, 128], strides = [1, 1]} : vector<2x384xf32> to vector<2x128xf32>
    %305 = vector.extract_strided_slice %302 {offsets = [0, 256], sizes = [2, 128], strides = [1, 1]} : vector<2x384xf32> to vector<2x128xf32>
    %306 = vector.extract_strided_slice %296 {offsets = [0, 384], sizes = [2, 128], strides = [1, 1]} : vector<2x512xf32> to vector<2x128xf32>
    %307 = math.tanh %306 : vector<2x128xf32>
    %308 = arith.mulf %304, %290 : vector<2x128xf32>
    %309 = arith.mulf %303, %307 : vector<2x128xf32>
    %310 = arith.addf %308, %309 : vector<2x128xf32>
    %311 = math.tanh %310 : vector<2x128xf32>
    %312 = arith.mulf %305, %311 : vector<2x128xf32>
    %c6_156 = arith.constant 6 : index
    %c0_157 = arith.constant 0 : index
    %313 = vector.load %arg13[%c6_156, %c0_157] : memref<16x512xf32, #tpu.memory_space<vmem>>, vector<2x512xf32>
    %c0_158 = arith.constant 0 : index
    %c0_159 = arith.constant 0 : index
    %314 = vector.load %arg6[%c0_158, %c0_159] : memref<128x512xf32, #tpu.memory_space<vmem>>, vector<128x512xf32>
    %cst_160 = arith.constant dense<0.000000e+00> : vector<2x512xf32>
    %315 = tpu.matmul %312, %314, %cst_160 {dimension_numbers = #tpu.dot_dimension_numbers<[1], [0], [0], [1], [0, 0, 1, 1], [], []>} : vector<2x128xf32>, vector<128x512xf32>, vector<2x512xf32> -> vector<2x512xf32>
    %316 = arith.addf %313, %315 : vector<2x512xf32>
    %317 = vector.extract_strided_slice %316 {offsets = [0, 0], sizes = [2, 384], strides = [1, 1]} : vector<2x512xf32> to vector<2x384xf32>
    %318 = arith.negf %317 : vector<2x384xf32>
    %319 = math.exp %318 : vector<2x384xf32>
    %cst_161 = arith.constant 1.000000e+00 : f32
    %320 = vector.broadcast %cst_161 : f32 to vector<2x384xf32>
    %321 = arith.addf %320, %319 : vector<2x384xf32>
    %322 = arith.divf %320, %321 : vector<2x384xf32>
    %323 = vector.extract_strided_slice %322 {offsets = [0, 0], sizes = [2, 128], strides = [1, 1]} : vector<2x384xf32> to vector<2x128xf32>
    %324 = vector.extract_strided_slice %322 {offsets = [0, 128], sizes = [2, 128], strides = [1, 1]} : vector<2x384xf32> to vector<2x128xf32>
    %325 = vector.extract_strided_slice %322 {offsets = [0, 256], sizes = [2, 128], strides = [1, 1]} : vector<2x384xf32> to vector<2x128xf32>
    %326 = vector.extract_strided_slice %316 {offsets = [0, 384], sizes = [2, 128], strides = [1, 1]} : vector<2x512xf32> to vector<2x128xf32>
    %327 = math.tanh %326 : vector<2x128xf32>
    %328 = arith.mulf %324, %310 : vector<2x128xf32>
    %329 = arith.mulf %323, %327 : vector<2x128xf32>
    %330 = arith.addf %328, %329 : vector<2x128xf32>
    %331 = math.tanh %330 : vector<2x128xf32>
    %332 = arith.mulf %325, %331 : vector<2x128xf32>
    %c8_162 = arith.constant 8 : index
    %c0_163 = arith.constant 0 : index
    %333 = vector.load %arg13[%c8_162, %c0_163] : memref<16x512xf32, #tpu.memory_space<vmem>>, vector<2x512xf32>
    %c0_164 = arith.constant 0 : index
    %c0_165 = arith.constant 0 : index
    %334 = vector.load %arg6[%c0_164, %c0_165] : memref<128x512xf32, #tpu.memory_space<vmem>>, vector<128x512xf32>
    %cst_166 = arith.constant dense<0.000000e+00> : vector<2x512xf32>
    %335 = tpu.matmul %332, %334, %cst_166 {dimension_numbers = #tpu.dot_dimension_numbers<[1], [0], [0], [1], [0, 0, 1, 1], [], []>} : vector<2x128xf32>, vector<128x512xf32>, vector<2x512xf32> -> vector<2x512xf32>
    %336 = arith.addf %333, %335 : vector<2x512xf32>
    %337 = vector.extract_strided_slice %336 {offsets = [0, 0], sizes = [2, 384], strides = [1, 1]} : vector<2x512xf32> to vector<2x384xf32>
    %338 = arith.negf %337 : vector<2x384xf32>
    %339 = math.exp %338 : vector<2x384xf32>
    %cst_167 = arith.constant 1.000000e+00 : f32
    %340 = vector.broadcast %cst_167 : f32 to vector<2x384xf32>
    %341 = arith.addf %340, %339 : vector<2x384xf32>
    %342 = arith.divf %340, %341 : vector<2x384xf32>
    %343 = vector.extract_strided_slice %342 {offsets = [0, 0], sizes = [2, 128], strides = [1, 1]} : vector<2x384xf32> to vector<2x128xf32>
    %344 = vector.extract_strided_slice %342 {offsets = [0, 128], sizes = [2, 128], strides = [1, 1]} : vector<2x384xf32> to vector<2x128xf32>
    %345 = vector.extract_strided_slice %342 {offsets = [0, 256], sizes = [2, 128], strides = [1, 1]} : vector<2x384xf32> to vector<2x128xf32>
    %346 = vector.extract_strided_slice %336 {offsets = [0, 384], sizes = [2, 128], strides = [1, 1]} : vector<2x512xf32> to vector<2x128xf32>
    %347 = math.tanh %346 : vector<2x128xf32>
    %348 = arith.mulf %344, %330 : vector<2x128xf32>
    %349 = arith.mulf %343, %347 : vector<2x128xf32>
    %350 = arith.addf %348, %349 : vector<2x128xf32>
    %351 = math.tanh %350 : vector<2x128xf32>
    %352 = arith.mulf %345, %351 : vector<2x128xf32>
    %c10_168 = arith.constant 10 : index
    %c0_169 = arith.constant 0 : index
    %353 = vector.load %arg13[%c10_168, %c0_169] : memref<16x512xf32, #tpu.memory_space<vmem>>, vector<2x512xf32>
    %c0_170 = arith.constant 0 : index
    %c0_171 = arith.constant 0 : index
    %354 = vector.load %arg6[%c0_170, %c0_171] : memref<128x512xf32, #tpu.memory_space<vmem>>, vector<128x512xf32>
    %cst_172 = arith.constant dense<0.000000e+00> : vector<2x512xf32>
    %355 = tpu.matmul %352, %354, %cst_172 {dimension_numbers = #tpu.dot_dimension_numbers<[1], [0], [0], [1], [0, 0, 1, 1], [], []>} : vector<2x128xf32>, vector<128x512xf32>, vector<2x512xf32> -> vector<2x512xf32>
    %356 = arith.addf %353, %355 : vector<2x512xf32>
    %357 = vector.extract_strided_slice %356 {offsets = [0, 0], sizes = [2, 384], strides = [1, 1]} : vector<2x512xf32> to vector<2x384xf32>
    %358 = arith.negf %357 : vector<2x384xf32>
    %359 = math.exp %358 : vector<2x384xf32>
    %cst_173 = arith.constant 1.000000e+00 : f32
    %360 = vector.broadcast %cst_173 : f32 to vector<2x384xf32>
    %361 = arith.addf %360, %359 : vector<2x384xf32>
    %362 = arith.divf %360, %361 : vector<2x384xf32>
    %363 = vector.extract_strided_slice %362 {offsets = [0, 0], sizes = [2, 128], strides = [1, 1]} : vector<2x384xf32> to vector<2x128xf32>
    %364 = vector.extract_strided_slice %362 {offsets = [0, 128], sizes = [2, 128], strides = [1, 1]} : vector<2x384xf32> to vector<2x128xf32>
    %365 = vector.extract_strided_slice %362 {offsets = [0, 256], sizes = [2, 128], strides = [1, 1]} : vector<2x384xf32> to vector<2x128xf32>
    %366 = vector.extract_strided_slice %356 {offsets = [0, 384], sizes = [2, 128], strides = [1, 1]} : vector<2x512xf32> to vector<2x128xf32>
    %367 = math.tanh %366 : vector<2x128xf32>
    %368 = arith.mulf %364, %350 : vector<2x128xf32>
    %369 = arith.mulf %363, %367 : vector<2x128xf32>
    %370 = arith.addf %368, %369 : vector<2x128xf32>
    %371 = math.tanh %370 : vector<2x128xf32>
    %372 = arith.mulf %365, %371 : vector<2x128xf32>
    %c12_174 = arith.constant 12 : index
    %c0_175 = arith.constant 0 : index
    %373 = vector.load %arg13[%c12_174, %c0_175] : memref<16x512xf32, #tpu.memory_space<vmem>>, vector<2x512xf32>
    %c0_176 = arith.constant 0 : index
    %c0_177 = arith.constant 0 : index
    %374 = vector.load %arg6[%c0_176, %c0_177] : memref<128x512xf32, #tpu.memory_space<vmem>>, vector<128x512xf32>
    %cst_178 = arith.constant dense<0.000000e+00> : vector<2x512xf32>
    %375 = tpu.matmul %372, %374, %cst_178 {dimension_numbers = #tpu.dot_dimension_numbers<[1], [0], [0], [1], [0, 0, 1, 1], [], []>} : vector<2x128xf32>, vector<128x512xf32>, vector<2x512xf32> -> vector<2x512xf32>
    %376 = arith.addf %373, %375 : vector<2x512xf32>
    %377 = vector.extract_strided_slice %376 {offsets = [0, 0], sizes = [2, 384], strides = [1, 1]} : vector<2x512xf32> to vector<2x384xf32>
    %378 = arith.negf %377 : vector<2x384xf32>
    %379 = math.exp %378 : vector<2x384xf32>
    %cst_179 = arith.constant 1.000000e+00 : f32
    %380 = vector.broadcast %cst_179 : f32 to vector<2x384xf32>
    %381 = arith.addf %380, %379 : vector<2x384xf32>
    %382 = arith.divf %380, %381 : vector<2x384xf32>
    %383 = vector.extract_strided_slice %382 {offsets = [0, 0], sizes = [2, 128], strides = [1, 1]} : vector<2x384xf32> to vector<2x128xf32>
    %384 = vector.extract_strided_slice %382 {offsets = [0, 128], sizes = [2, 128], strides = [1, 1]} : vector<2x384xf32> to vector<2x128xf32>
    %385 = vector.extract_strided_slice %382 {offsets = [0, 256], sizes = [2, 128], strides = [1, 1]} : vector<2x384xf32> to vector<2x128xf32>
    %386 = vector.extract_strided_slice %376 {offsets = [0, 384], sizes = [2, 128], strides = [1, 1]} : vector<2x512xf32> to vector<2x128xf32>
    %387 = math.tanh %386 : vector<2x128xf32>
    %388 = arith.mulf %384, %370 : vector<2x128xf32>
    %389 = arith.mulf %383, %387 : vector<2x128xf32>
    %390 = arith.addf %388, %389 : vector<2x128xf32>
    %391 = math.tanh %390 : vector<2x128xf32>
    %392 = arith.mulf %385, %391 : vector<2x128xf32>
    %c14_180 = arith.constant 14 : index
    %c0_181 = arith.constant 0 : index
    %393 = vector.load %arg13[%c14_180, %c0_181] : memref<16x512xf32, #tpu.memory_space<vmem>>, vector<2x512xf32>
    %c0_182 = arith.constant 0 : index
    %c0_183 = arith.constant 0 : index
    %394 = vector.load %arg6[%c0_182, %c0_183] : memref<128x512xf32, #tpu.memory_space<vmem>>, vector<128x512xf32>
    %cst_184 = arith.constant dense<0.000000e+00> : vector<2x512xf32>
    %395 = tpu.matmul %392, %394, %cst_184 {dimension_numbers = #tpu.dot_dimension_numbers<[1], [0], [0], [1], [0, 0, 1, 1], [], []>} : vector<2x128xf32>, vector<128x512xf32>, vector<2x512xf32> -> vector<2x512xf32>
    %396 = arith.addf %393, %395 : vector<2x512xf32>
    %397 = vector.extract_strided_slice %396 {offsets = [0, 0], sizes = [2, 384], strides = [1, 1]} : vector<2x512xf32> to vector<2x384xf32>
    %398 = arith.negf %397 : vector<2x384xf32>
    %399 = math.exp %398 : vector<2x384xf32>
    %cst_185 = arith.constant 1.000000e+00 : f32
    %400 = vector.broadcast %cst_185 : f32 to vector<2x384xf32>
    %401 = arith.addf %400, %399 : vector<2x384xf32>
    %402 = arith.divf %400, %401 : vector<2x384xf32>
    %403 = vector.extract_strided_slice %402 {offsets = [0, 0], sizes = [2, 128], strides = [1, 1]} : vector<2x384xf32> to vector<2x128xf32>
    %404 = vector.extract_strided_slice %402 {offsets = [0, 128], sizes = [2, 128], strides = [1, 1]} : vector<2x384xf32> to vector<2x128xf32>
    %405 = vector.extract_strided_slice %402 {offsets = [0, 256], sizes = [2, 128], strides = [1, 1]} : vector<2x384xf32> to vector<2x128xf32>
    %406 = vector.extract_strided_slice %396 {offsets = [0, 384], sizes = [2, 128], strides = [1, 1]} : vector<2x512xf32> to vector<2x128xf32>
    %407 = math.tanh %406 : vector<2x128xf32>
    %408 = arith.mulf %404, %390 : vector<2x128xf32>
    %409 = arith.mulf %403, %407 : vector<2x128xf32>
    %410 = arith.addf %408, %409 : vector<2x128xf32>
    %411 = math.tanh %410 : vector<2x128xf32>
    %412 = arith.mulf %405, %411 : vector<2x128xf32>
    %c1_186 = arith.constant 1 : index
    %c0_187 = arith.constant 0 : index
    %c0_188 = arith.constant 0 : index
    %413 = vector.load %arg11[%c1_186, %c0_187, %c0_188] : memref<2x2x128xf32, #tpu.memory_space<vmem>>, vector<1x2x128xf32>
    %414 = vector.shape_cast %413 : vector<1x2x128xf32> to vector<2x128xf32>
    %415 = vector.shape_cast %412 : vector<2x128xf32> to vector<1x2x128xf32>
    tpu.vector_store %arg11[%c1_186, %c0_187, %c0_188], %415 {strides = array<i32>} : memref<2x2x128xf32, #tpu.memory_space<vmem>>, vector<1x2x128xf32>,
    %c1_189 = arith.constant 1 : index
    %c0_190 = arith.constant 0 : index
    %c0_191 = arith.constant 0 : index
    %416 = vector.load %arg12[%c1_189, %c0_190, %c0_191] : memref<2x2x128xf32, #tpu.memory_space<vmem>>, vector<1x2x128xf32>
    %417 = vector.shape_cast %416 : vector<1x2x128xf32> to vector<2x128xf32>
    %418 = vector.shape_cast %410 : vector<2x128xf32> to vector<1x2x128xf32>
    tpu.vector_store %arg12[%c1_189, %c0_190, %c0_191], %418 {strides = array<i32>} : memref<2x2x128xf32, #tpu.memory_space<vmem>>, vector<1x2x128xf32>,
    %c0_192 = arith.constant 0 : index
    %c0_193 = arith.constant 0 : index
    %419 = vector.load %arg8[%c0_192, %c0_193] : memref<128x16xf32, #tpu.memory_space<vmem>>, vector<128x16xf32>
    %cst_194 = arith.constant dense<0.000000e+00> : vector<2x16xf32>
    %420 = tpu.matmul %412, %419, %cst_194 {dimension_numbers = #tpu.dot_dimension_numbers<[1], [0], [0], [1], [0, 0, 1, 1], [], []>} : vector<2x128xf32>, vector<128x16xf32>, vector<2x16xf32> -> vector<2x16xf32>
    %c0_195 = arith.constant 0 : index
    %c0_196 = arith.constant 0 : index
    %421 = vector.load %arg9[%c0_195, %c0_196] : memref<1x16xf32, #tpu.memory_space<vmem>>, vector<1x16xf32>
    %422 = vector.broadcast %421 : vector<1x16xf32> to vector<2x16xf32>
    %423 = arith.addf %420, %422 : vector<2x16xf32>
    %c0_197 = arith.constant 0 : index
    %c0_198 = arith.constant 0 : index
    %424 = vector.load %arg10[%c0_197, %c0_198] : memref<2x16xf32, #tpu.memory_space<vmem>>, vector<2x16xf32>
    tpu.vector_store %arg10[%c0_197, %c0_198], %423 {strides = array<i32>} : memref<2x16xf32, #tpu.memory_space<vmem>>, vector<2x16xf32>,
    return
  }
}

</mosaic_0001>

<bundles_post_ra>
// kernel: _rnn_forward_impl.1
= control target key start
LH: loop header
LB: loop body
LE: loop exit
PB: predicated region body
PF: predicated region fallthrough
CT: control target
= control target key end

     0   :  { %18 = vsyncpa [#allocation7], 0  ;;  %s6654_s0 = inlined_call_operand.vmem [shape: s32[16], index: 0, kind: input, shape index: {}]   ;;  %s6655_s1 = inlined_call_operand.vmem [shape: f32[2,2,128], index: 1, kind: input, shape index: {}]   ;;  %s6656_s2 = inlined_call_operand.vmem [shape: f32[2,2,128], index: 2, kind: input, shape index: {}]   ;;  %s6657_s3 = inlined_call_operand.hbm [shape: f32[128,512], index: 3, kind: input, shape index: {}]   ;;  %s6658_s4 = inlined_call_operand.hbm [shape: f32[128,512], index: 4, kind: input, shape index: {}]   ;;  %s6659_s5 = inlined_call_operand.hbm [shape: f32[128,512], index: 5, kind: input, shape index: {}]   ;;  %s6660_s6 = inlined_call_operand.hbm [shape: f32[128,512], index: 6, kind: input, shape index: {}]   ;;  %s6661_s7 = inlined_call_operand.vmem [shape: f32[1,512], index: 7, kind: input, shape index: {}]   ;;  %s6662_s8 = inlined_call_operand.vmem [shape: f32[128,16], index: 8, kind: input, shape index: {}]   ;;  %s6663_s9 = inlined_call_operand.vmem [shape: f32[1,16], index: 9, kind: input, shape index: {}]   ;;  %s6664_s10 = inlined_call_operand.hbm [shape: f32[2,16], index: 10, kind: output, shape index: {0}]   ;;  %s6665_s11 = inlined_call_operand.hbm [shape: f32[2,2,128], index: 11, kind: output, shape index: {1}]   ;;  %s6666_s12 = inlined_call_operand.hbm [shape: f32[2,2,128], index: 12, kind: output, shape index: {2}]  }
   0x1   :  { %19 = vsyncpa [#allocation5], 0 }
   0x2   :  { %20 = vsyncpa [#allocation10], 0 }
   0x3   :  { %21 = vsyncpa [#allocation13], 0 }
   0x4   :  { %22 = vsyncpa [#allocation6], 0 }
   0x5   :  { %23 = vsyncpa [#allocation16], 0  ;;  %s54_s23 = sshll.u32 %s6658_s4, 4  ;;  %s4516_s24 = smov [#allocation9]   ;;  %s55_s23 = int_to_ptr.hbm [resolvable:$true] %s54_s23 }
   0x6   :  { %s56_s25 = sshll.u32 %s4516_s24, 4  ;;  %s29_s28 = sshll.u32 %s6654_s0, 4  ;;  %s57_s25 = int_to_ptr.vmem [resolvable:$true] %s56_s25  ;;  %s30_s28 = int_to_ptr.vmem [resolvable:$true] %s29_s28 }
   0x7   :  { %s4517_s29 = smov 512   ;;  %s4518_s30 = smov 32  }
   0x8   :  { %62 = dma.hbm_to_vmem [thread:$0]  %s55_s23, 8192, %s57_s25, [#allocation10], %s4517_s29, %s4517_s29, %s4518_s30  }
   0x9   :  { %s4519_s13 = smov [#allocation4]   ;;  %s41_s16 = sshll.u32 %s6657_s3, 4  ;;  %s42_s16 = int_to_ptr.hbm [resolvable:$true] %s41_s16 }
   0xa   :  { %32 = dma.vmem_to_smem %s30_s28, 16, %s4519_s13, [#allocation7]  }
   0xb   :  { %s4520_s4 = smov [#allocation8]   ;;  %s67_s20 = sshll.u32 %s6659_s5, 4  ;;  %s68_s20 = int_to_ptr.hbm [resolvable:$true] %s67_s20 }
   0xc   :  { %s43_s17 = sshll.u32 %s4520_s4, 4  ;;  %s4521_s0 = smov [#allocation11]   ;;  %s44_s17 = int_to_ptr.vmem [resolvable:$true] %s43_s17 }
   0xd   :  { %49 = dma.hbm_to_vmem [thread:$0]  %s42_s16, 8192, %s44_s17, [#allocation5], %s4517_s29, %s4517_s29, %s4518_s30  }
   0xe   :  { %s69_s21 = sshll.u32 %s4521_s0, 4  ;;  %s80_s24 = sshll.u32 %s6660_s6, 4  ;;  %s70_s21 = int_to_ptr.vmem [resolvable:$true] %s69_s21  ;;  %s81_s24 = int_to_ptr.hbm [resolvable:$true] %s80_s24 }
   0xf   :  { %75 = dma.hbm_to_vmem [thread:$0]  %s68_s20, 8192, %s70_s21, [#allocation10], %s4517_s29, %s4517_s29, %s4518_s30  }
  0x10   :  { %s4522_s3 = smov [#allocation12]  }
  0x11   :  { %s82_s25 = sshll.u32 %s4522_s3, 4  ;;  %s83_s25 = int_to_ptr.vmem [resolvable:$true] %s82_s25 }
  0x12   :  { %88 = dma.hbm_to_vmem [thread:$0]  %s81_s24, 8192, %s83_s25, [#allocation13], %s4517_s29, %s4517_s29, %s4518_s30  }
  0x13   :  { %4504 = dma.done.wait [#allocation7], 16  }
  0x14   :  { %4505 = vsyncadd [#allocation7], 4294967280 }
  0x15   :  { %4506 = dma.done.wait [#allocation5], 8192  }
  0x16   :  { %4507 = vsyncadd [#allocation5], 4294959104 }
  0x17   :  { %4508 = dma.done.wait [#allocation10], 16384  }
  0x18   :  { %4509 = vsyncadd [#allocation10], 4294950912 }
  0x19   :  { %4510 = dma.done.wait [#allocation13], 8192  }
  0x1a   :  { %4511 = vsyncadd [#allocation13], 4294959104 }
  0x1b   :  { %115 = sfence }
  0x1c   :  { %v4611_v0 = vld [vmem:[#allocation9 + $0x1e0] sm:$0xff]  ;;  %v4613_v1 = vld [vmem:[#allocation9 + $0x1e8] sm:$0xff]  ;;  %v4615_v2 = vld [vmem:[#allocation9 + $0x1f0] sm:$0xff]  ;;  %s4625_s5 = sld [smem:[#allocation4]]  ;;  %v126_v32 = vlaneseq  ;;  %v6841_v43 = vmov 0 }
  0x1d   :  { %6840 = vst [vmem:[#allocation24_spill] sm:$0xff] %v4611_v0  ;;  %397 = vmatpush.msra.mxu0 %v4611_v0  ;;  %417 = vmatpush.msra.mxu1 %v4613_v1  ;;  %v4619_v3 = vld [vmem:[#allocation9 + $0x1c0] sm:$0xff]  ;;  %v4621_v4 = vld [vmem:[#allocation9 + $0x1c8] sm:$0xff]  ;;  %v4623_v5 = vld [vmem:[#allocation9 + $0x1d0] sm:$0xff]  ;;  %s4632_s6 = sld [smem:[#allocation4 + $0x8]] }
  0x1e   :  { %437 = vmatpush.msra.mxu2 %v4615_v2  ;;  %v4628_v6 = vld [vmem:[#allocation9 + $0x1a0] sm:$0xff]  ;;  %v4630_v7 = vld [vmem:[#allocation9 + $0x1a8] sm:$0xff]  ;;  %v4636_v8 = vld [vmem:[#allocation9 + $0x1b0] sm:$0xff]  ;;  %vm4741_vm0 = vcmp.lt.s32.totalorder %v126_v32, 512  ;;  %s3884_s20 = sld [smem:[#allocation4 + $0x1]] }
  0x1f   :  { %398 = vmatpush.msra.mxu0 %v4619_v3  ;;  %418 = vmatpush.msra.mxu1 %v4621_v4  ;;  %v4639_v9 = vld [vmem:[#allocation9 + $0x180] sm:$0xff]  ;;  %v4641_v10 = vld [vmem:[#allocation9 + $0x188] sm:$0xff]  ;;  %v4645_v11 = vld [vmem:[#allocation9 + $0x190] sm:$0xff]  ;;  %v6842_v43 = vsel %vm4741_vm0, 4294967295, %v6841_v43  ;;  %s3887_s0 = sld [smem:[#allocation4 + $0x9]] }
  0x20   :  { %438 = vmatpush.msra.mxu2 %v4623_v5  ;;  %v4648_v12 = vld [vmem:[#allocation9 + $0x160] sm:$0xff]  ;;  %v4650_v13 = vld [vmem:[#allocation9 + $0x168] sm:$0xff]  ;;  %v4654_v14 = vld [vmem:[#allocation9 + $0x170] sm:$0xff]  ;;  %6843 = vst [vmem:[#allocation25_spill] sm:$0xff] %v6842_v43 }
  0x21   :  { %399 = vmatpush.msra.mxu0 %v4628_v6  ;;  %419 = vmatpush.msra.mxu1 %v4630_v7  ;;  %v4657_v15 = vld [vmem:[#allocation9 + $0x140] sm:$0xff]  ;;  %v4659_v16 = vld [vmem:[#allocation9 + $0x148] sm:$0xff]  ;;  %v4661_v17 = vld [vmem:[#allocation9 + $0x1f8] sm:$0xff] }
  0x22   :  { %439 = vmatpush.msra.mxu2 %v4636_v8  ;;  %v4665_v18 = vld [vmem:[#allocation9 + $0x150] sm:$0xff]  ;;  %v4667_v19 = vld [vmem:[#allocation9 + $0x1d8] sm:$0xff]  ;;  %s117_s26 = sshra.s32 %s4625_s5, 3  ;;  %v4671_v20 = vld [vmem:[#allocation9 + $0x120] sm:$0xff]  ;;  %457 = vmatpush.msra.mxu3 %v4661_v17  ;;  %s120_s28 = sand.u32 7, %s4625_s5 }
  0x23   :  { %400 = vmatpush.msra.mxu0 %v4639_v9  ;;  %420 = vmatpush.msra.mxu1 %v4641_v10  ;;  %v4673_v21 = vld [vmem:[#allocation9 + $0x128] sm:$0xff]  ;;  %s133_s27 = sshra.s32 %s4632_s6, 3  ;;  %v4679_v22 = vld [vmem:[#allocation9 + $0x130] sm:$0xff]  ;;  %v4681_v23 = vld [vmem:[#allocation9 + $0x1b8] sm:$0xff]  ;;  %s3976_s29 = sshll.u32 %s117_s26, 5 }
  0x24   :  { %440 = vmatpush.msra.mxu2 %v4645_v11  ;;  %v4684_v24 = vld [vmem:[#allocation9 + $0x100] sm:$0xff]  ;;  %v4686_v25 = vld [vmem:[#allocation9 + $0x108] sm:$0xff]  ;;  %458 = vmatpush.msra.mxu3 %v4667_v19  ;;  %v4692_v26 = vld [vmem:[#allocation9 + $0x110] sm:$0xff]  ;;  %s136_s13 = sand.u32 7, %s4632_s6  ;;  %s3977_s14 = sshll.u32 %s133_s27, 5 }
  0x25   :  { %401 = vmatpush.msra.mxu0 %v4648_v12  ;;  %421 = vmatpush.msra.mxu1 %v4650_v13  ;;  %v4694_v27 = vld [vmem:[#allocation9 + $0x198] sm:$0xff]  ;;  %v4698_v28 = vld [vmem:[#allocation9 + $0xe0] sm:$0xff]  ;;  %v4700_v29 = vld [vmem:[#allocation9 + $0xe8] sm:$0xff]  ;;  %s4709_s15 = sadd.s32 %s3976_s29, %s120_s28  ;;  %s4717_s16 = sadd.s32 %s3977_s14, %s136_s13 }
  0x26   :  { %441 = vmatpush.msra.mxu2 %v4654_v14  ;;  %459 = vmatpush.msra.mxu3 %v4681_v23  ;;  %v4705_v30 = vld [vmem:[#allocation9 + $0xf0] sm:$0xff]  ;;  %v4707_v31 = vld [vmem:[#allocation9 + $0x178] sm:$0xff]  ;;  %v4712_v33 = vld [vmem:[#allocation9 + $0xc0] sm:$0xff]  ;;  %s124_s4 = scalar_lea.vmem [#allocation8], %s4709_s15  ;;  %s140_s17 = scalar_lea.vmem [#allocation8], %s4717_s16 }
  0x27   :  { %402 = vmatpush.msra.mxu0 %v4657_v15  ;;  %422 = vmatpush.msra.mxu1 %v4659_v16  ;;  %v4714_v34 = vld [vmem:[#allocation9 + $0xc8] sm:$0xff]  ;;  %v4721_v35 = vld [vmem:[#allocation9 + $0xd0] sm:$0xff]  ;;  %v4723_v36 = vld [vmem:[#allocation9 + $0x158] sm:$0xff]  ;;  %s146_s21 = sshra.s32 %s3884_s20, 3  ;;  %s159_s22 = sshra.s32 %s3887_s0, 3 }
  0x28   :  { %442 = vmatpush.msra.mxu2 %v4665_v18  ;;  %460 = vmatpush.msra.mxu3 %v4694_v27  ;;  %v4726_v37 = vld [vmem:[#allocation9 + $0xa0] sm:$0xff]  ;;  %v4728_v38 = vld [vmem:[#allocation9 + $0xa8] sm:$0xff]  ;;  %v4730_v39 = vld [vmem:[#allocation9 + $0xb0] sm:$0xff]  ;;  %s149_s23 = sand.u32 7, %s3884_s20  ;;  %s3978_s24 = sshll.u32 %s146_s21, 5 }
  0x29   :  { %403 = vmatpush.msra.mxu0 %v4671_v20  ;;  %423 = vmatpush.msra.mxu1 %v4673_v21  ;;  %v4735_v40 = vld [vmem:[#allocation9 + $0x80] sm:$0xff]  ;;  %v4737_v41 = vld [vmem:[#allocation9 + $0x88] sm:$0xff]  ;;  %v4739_v42 = vld [vmem:[#allocation9 + $0x138] sm:$0xff]  ;;  %s162_s3 = sand.u32 7, %s3887_s0  ;;  %s3979_s25 = sshll.u32 %s159_s22, 5 }
  0x2a   :  { %443 = vmatpush.msra.mxu2 %v4679_v22  ;;  %461 = vmatpush.msra.mxu3 %v4707_v31  ;;  %v4746_v44 = vld [vmem:[#allocation9 + $0x90] sm:$0xff]  ;;  %v4748_v45 = vld [vmem:[#allocation9 + $0x60] sm:$0xff]  ;;  %v4750_v46 = vld [vmem:[#allocation9 + $0x68] sm:$0xff]  ;;  %s152_s5 = sadd.s32 %s3978_s24, %s149_s23  ;;  %s165_s6 = sadd.s32 %s3979_s25, %s162_s3 }
  0x2b   :  { %404 = vmatpush.msra.mxu0 %v4684_v24  ;;  %424 = vmatpush.msra.mxu1 %v4686_v25  ;;  %v4755_v47 = vld [vmem:[#allocation9 + $0x70] sm:$0xff]  ;;  %v4757_v48 = vld [vmem:[#allocation9 + $0x118] sm:$0xff]  ;;  %v4772_v52 = vld [vmem:[#allocation9 + $0x40] sm:$0xff]  ;;  %s153_s26 = scalar_lea.vmem [#allocation8], %s152_s5  ;;  %s166_s27 = scalar_lea.vmem [#allocation8], %s165_s6 }
  0x2c   :  { %444 = vmatpush.msra.mxu2 %v4692_v26  ;;  %462 = vmatpush.msra.mxu3 %v4723_v36  ;;  %v125_v49 = vld [vmem:[%s124_s4] ss:$8 sm:$0xf]  ;;  %s3890_s13 = sld [smem:[#allocation4 + $0x2]] }
  0x2d   :  { %405 = vmatpush.msra.mxu0 %v4698_v28  ;;  %425 = vmatpush.msra.mxu1 %v4700_v29  ;;  %130 = vst.msk [vmem:[#allocation2] ss:$8 sm:$0xf] %vm4741_vm0, %v125_v49  ;;  %v141_v50 = vld [vmem:[%s140_s17] ss:$8 sm:$0xf] }
  0x2e   :  { %445 = vmatpush.msra.mxu2 %v4705_v30  ;;  %463 = vmatpush.msra.mxu3 %v4739_v42  ;;  %v4767_v51 = vld [vmem:[#allocation9 + $0xf8] sm:$0xff]  ;;  %143 = vst.msk [vmem:[#allocation2 + $0x1] ss:$8 sm:$0xf] %vm4741_vm0, %v141_v50  ;;  %v4774_v53 = vld [vmem:[#allocation9 + $0x48] sm:$0xff]  ;;  %v4779_v54 = vld [vmem:[#allocation9 + $0x50] sm:$0xff] }
  0x2f   :  { %406 = vmatpush.msra.mxu0 %v4712_v33  ;;  %426 = vmatpush.msra.mxu1 %v4714_v34  ;;  %v4781_v55 = vld [vmem:[#allocation9 + $0xd8] sm:$0xff]  ;;  %v4784_v56 = vld [vmem:[#allocation9 + $0x20] sm:$0xff]  ;;  %v4786_v57 = vld [vmem:[#allocation9 + $0x28] sm:$0xff]  ;;  %s3893_s14 = sld [smem:[#allocation4 + $0xa]] }
  0x30   :  { %446 = vmatpush.msra.mxu2 %v4721_v35  ;;  %464 = vmatpush.msra.mxu3 %v4757_v48  ;;  %v4791_v58 = vld [vmem:[#allocation9 + $0x30] sm:$0xff]  ;;  %v4793_v59 = vld [vmem:[#allocation9 + $0xb8] sm:$0xff]  ;;  %v4796_v60 = vld [vmem:[#allocation9] sm:$0xff]  ;;  %s5056_s23 = sld [smem:[#allocation4 + $0x3]] }
  0x31   :  { %407 = vmatpush.msra.mxu0 %v4726_v37  ;;  %427 = vmatpush.msra.mxu1 %v4728_v38  ;;  %v4798_v61 = vld [vmem:[#allocation9 + $0x8] sm:$0xff]  ;;  %v4803_v62 = vld [vmem:[#allocation9 + $0x10] sm:$0xff]  ;;  %v4812_v32 = vld [vmem:[#allocation9 + $0x98] sm:$0xff]  ;;  %s5070_s24 = sld [smem:[#allocation4 + $0xb]] }
  0x32   :  { %447 = vmatpush.msra.mxu2 %v4730_v39  ;;  %465 = vmatpush.msra.mxu3 %v4767_v51  ;;  %v327_v63 = vld [vmem:[%s6655_s1] sm:$0x3]  ;;  %v4815_v49 = vld [vmem:[#allocation9 + $0x78] sm:$0xff]  ;;  %s172_s15 = sshra.s32 %s3890_s13, 3  ;;  %s175_s4 = sand.u32 7, %s3890_s13 }
  0x33   :  { %408 = vmatpush.msra.mxu0 %v4735_v40  ;;  %428 = vmatpush.msra.mxu1 %v4737_v41  ;;  %v4819_v50 = vld [vmem:[#allocation9 + $0x58] sm:$0xff]  ;;  %s3980_s17 = sshll.u32 %s172_s15, 5  ;;  %s3902_s15 = sld [smem:[#allocation4 + $0x4]] }
  0x34   :  { %448 = vmatpush.msra.mxu2 %v4746_v44  ;;  %466 = vmatpush.msra.mxu3 %v4781_v55  ;;  %v4825_v43 = vld [vmem:[#allocation9 + $0x38] sm:$0xff]  ;;  %s178_s20 = sadd.s32 %s3980_s17, %s175_s4 }
  0x35   :  { %409 = vmatpush.msra.mxu0 %v4748_v45  ;;  %429 = vmatpush.msra.mxu1 %v4750_v46  ;;  %s185_s16 = sshra.s32 %s3893_s14, 3  ;;  %s188_s18 = sand.u32 7, %s3893_s14 }
  0x36   :  { %449 = vmatpush.msra.mxu2 %v4755_v47  ;;  %467 = vmatpush.msra.mxu3 %v4793_v59  ;;  %s3981_s19 = sshll.u32 %s185_s16, 5  ;;  %s179_s21 = scalar_lea.vmem [#allocation8], %s178_s20 }
  0x37   :  { %410 = vmatpush.msra.mxu0 %v4772_v52  ;;  %430 = vmatpush.msra.mxu1 %v4774_v53  ;;  %s191_s0 = sadd.s32 %s3981_s19, %s188_s18  ;;  %s198_s3 = sshra.s32 %s5056_s23, 3 }
  0x38   :  { %450 = vmatpush.msra.mxu2 %v4779_v54  ;;  %468 = vmatpush.msra.mxu3 %v4812_v32  ;;  %s192_s22 = scalar_lea.vmem [#allocation8], %s191_s0  ;;  %s211_s25 = sshra.s32 %s5070_s24, 3 }
  0x39   :  { %411 = vmatpush.msra.mxu0 %v4784_v56  ;;  %431 = vmatpush.msra.mxu1 %v4786_v57  ;;  %s201_s5 = sand.u32 7, %s5056_s23  ;;  %s3982_s6 = sshll.u32 %s198_s3, 5 }
  0x3a   :  { %451 = vmatpush.msra.mxu2 %v4791_v58  ;;  %469 = vmatpush.msra.mxu3 %v4815_v49  ;;  %s204_s28 = sadd.s32 %s3982_s6, %s201_s5  ;;  %s3905_s16 = sld [smem:[#allocation4 + $0xc]] }
  0x3b   :  { %412 = vmatpush.msra.mxu0 %v4796_v60  ;;  %432 = vmatpush.msra.mxu1 %v4798_v61  ;;  %s205_s13 = scalar_lea.vmem [#allocation8], %s204_s28  ;;  %s224_s4 = sshra.s32 %s3902_s15, 3 }
  0x3c   :  { %452 = vmatpush.msra.mxu2 %v4803_v62  ;;  %413 = vmatmul.f32.vlgmr.msra.gmra.mxu0 %v327_v63  ;;  %s227_s18 = sand.u32 7, %s3902_s15  ;;  %s3984_s19 = sshll.u32 %s224_s4, 5 }
  0x3d   :  { %433 = vmatmul.f32.vlgmr.msra.gmra.mxu1 %v327_v63  ;;  %453 = vmatmul.f32.vlgmr.msra.gmra.mxu2 %v327_v63  ;;  %s3908_s3 = sld [smem:[#allocation4 + $0x5]] }
  0x3e   :  { %613 = vmatpush.msrb.mxu0 %v4611_v0  ;;  %633 = vmatpush.msrb.mxu1 %v4613_v1  ;;  %v4831_v0 = vld [vmem:[#allocation9 + $0x18] sm:$0xff]  ;;  %s5438_s4 = sld [smem:[#allocation4 + $0x6]] }
  0x3f   :  { %653 = vmatpush.msrb.mxu2 %v4615_v2  ;;  %470 = vmatpush.msra.mxu3 %v4819_v50 }
  0x40   :  { %614 = vmatpush.msrb.mxu0 %v4619_v3  ;;  %634 = vmatpush.msrb.mxu1 %v4621_v4  ;;  %s237_s17 = sshra.s32 %s3905_s16, 3  ;;  %s240_s20 = sand.u32 7, %s3905_s16 }
  0x41   :  { %654 = vmatpush.msrb.mxu2 %v4623_v5  ;;  %471 = vmatpush.msra.mxu3 %v4825_v43  ;;  %s3985_s0 = sshll.u32 %s237_s17, 5  ;;  %s5452_s17 = sld [smem:[#allocation4 + $0xe]] }
  0x42   :  { %615 = vmatpush.msrb.mxu0 %v4628_v6  ;;  %635 = vmatpush.msrb.mxu1 %v4630_v7 }
  0x43   :  { %655 = vmatpush.msrb.mxu2 %v4636_v8  ;;  %472 = vmatpush.msra.mxu3 %v4831_v0  ;;  %s250_s5 = sshra.s32 %s3908_s3, 3 }
  0x44   :  { %616 = vmatpush.msrb.mxu0 %v4639_v9  ;;  %636 = vmatpush.msrb.mxu1 %v4641_v10 }
  0x45   :  { %656 = vmatpush.msrb.mxu2 %v4645_v11  ;;  %473 = vmatmul.f32.vlgmr.msra.gmra.mxu3 %v327_v63  ;;  %v6844_v63 = vld [vmem:[#allocation24_spill] sm:$0xff] }
  0x46   :  { %617 = vmatpush.msrb.mxu0 %v4648_v12  ;;  %637 = vmatpush.msrb.mxu1 %v4650_v13 }
  0x47   :  { %673 = vmatpush.msrb.mxu3 %v4661_v17  ;;  %657 = vmatpush.msrb.mxu2 %v4654_v14 }
  0x48   :  { %618 = vmatpush.msrb.mxu0 %v4657_v15  ;;  %638 = vmatpush.msrb.mxu1 %v4659_v16 }
  0x49   :  { %674 = vmatpush.msrb.mxu3 %v4667_v19  ;;  %658 = vmatpush.msrb.mxu2 %v4665_v18 }
  0x4a   :  { %619 = vmatpush.msrb.mxu0 %v4671_v20  ;;  %639 = vmatpush.msrb.mxu1 %v4673_v21 }
  0x4b   :  { %675 = vmatpush.msrb.mxu3 %v4681_v23  ;;  %659 = vmatpush.msrb.mxu2 %v4679_v22 }
  0x4c   :  { %620 = vmatpush.msrb.mxu0 %v4684_v24  ;;  %640 = vmatpush.msrb.mxu1 %v4686_v25 }
  0x4d   :  { %676 = vmatpush.msrb.mxu3 %v4694_v27  ;;  %660 = vmatpush.msrb.mxu2 %v4692_v26 }
  0x4e   :  { %621 = vmatpush.msrb.mxu0 %v4698_v28  ;;  %641 = vmatpush.msrb.mxu1 %v4700_v29 }
  0x4f   :  { %677 = vmatpush.msrb.mxu3 %v4707_v31  ;;  %661 = vmatpush.msrb.mxu2 %v4705_v30 }
  0x50   :  { %622 = vmatpush.msrb.mxu0 %v4712_v33  ;;  %642 = vmatpush.msrb.mxu1 %v4714_v34 }
  0x51   :  { %678 = vmatpush.msrb.mxu3 %v4723_v36  ;;  %662 = vmatpush.msrb.mxu2 %v4721_v35 }
  0x52   :  { %623 = vmatpush.msrb.mxu0 %v4726_v37  ;;  %643 = vmatpush.msrb.mxu1 %v4728_v38 }
  0x53   :  { %679 = vmatpush.msrb.mxu3 %v4739_v42  ;;  %663 = vmatpush.msrb.mxu2 %v4730_v39 }
  0x54   :  { %624 = vmatpush.msrb.mxu0 %v4735_v40  ;;  %644 = vmatpush.msrb.mxu1 %v4737_v41 }
  0x55   :  { %680 = vmatpush.msrb.mxu3 %v4757_v48  ;;  %664 = vmatpush.msrb.mxu2 %v4746_v44 }
  0x56   :  { %625 = vmatpush.msrb.mxu0 %v4748_v45  ;;  %645 = vmatpush.msrb.mxu1 %v4750_v46 }
  0x57   :  { %681 = vmatpush.msrb.mxu3 %v4767_v51  ;;  %665 = vmatpush.msrb.mxu2 %v4755_v47 }
  0x58   :  { %626 = vmatpush.msrb.mxu0 %v4772_v52  ;;  %646 = vmatpush.msrb.mxu1 %v4774_v53 }
  0x59   :  { %682 = vmatpush.msrb.mxu3 %v4781_v55  ;;  %666 = vmatpush.msrb.mxu2 %v4779_v54 }
  0x5a   :  { %627 = vmatpush.msrb.mxu0 %v4784_v56  ;;  %647 = vmatpush.msrb.mxu1 %v4786_v57 }
  0x5b   :  { %683 = vmatpush.msrb.mxu3 %v4793_v59  ;;  %667 = vmatpush.msrb.mxu2 %v4791_v58 }
  0x5c   :  { %628 = vmatpush.msrb.mxu0 %v4796_v60  ;;  %648 = vmatpush.msrb.mxu1 %v4798_v61 }
  0x5d   :  { %684 = vmatpush.msrb.mxu3 %v4812_v32  ;;  %668 = vmatpush.msrb.mxu2 %v4803_v62 }
  0x5e   :  { %847 = vmatpush.msra.mxu0 %v6844_v63  ;;  %867 = vmatpush.msra.mxu1 %v4613_v1  ;;  %v329_v1 = vld [vmem:[#allocation2] sm:$0x3] }
  0x5f   :  { %685 = vmatpush.msrb.mxu3 %v4815_v49  ;;  %887 = vmatpush.msra.mxu2 %v4615_v2  ;;  %v330_v2 = vld [vmem:[#allocation2 + $0x8] sm:$0x3] }
  0x60   :  { %848 = vmatpush.msra.mxu0 %v4619_v3  ;;  %868 = vmatpush.msra.mxu1 %v4621_v4 }
  0x61   :  { %686 = vmatpush.msrb.mxu3 %v4819_v50  ;;  %888 = vmatpush.msra.mxu2 %v4623_v5 }
  0x62   :  { %849 = vmatpush.msra.mxu0 %v4628_v6  ;;  %869 = vmatpush.msra.mxu1 %v4630_v7 }
  0x63   :  { %687 = vmatpush.msrb.mxu3 %v4825_v43  ;;  %889 = vmatpush.msra.mxu2 %v4636_v8 }
  0x64   :  { %850 = vmatpush.msra.mxu0 %v4639_v9  ;;  %870 = vmatpush.msra.mxu1 %v4641_v10  ;;  %v331_v9 = vld [vmem:[#allocation2 + $0x10] sm:$0x3] }
  0x65   :  { %688 = vmatpush.msrb.mxu3 %v4831_v0  ;;  %890 = vmatpush.msra.mxu2 %v4645_v11 }
  0x66   :  { %851 = vmatpush.msra.mxu0 %v4648_v12  ;;  %871 = vmatpush.msra.mxu1 %v4650_v13 }
  0x67   :  { %907 = vmatpush.msra.mxu3 %v4661_v17  ;;  %891 = vmatpush.msra.mxu2 %v4654_v14  ;;  %v332_v17 = vld [vmem:[#allocation2 + $0x18] sm:$0x3] }
  0x68   :  { %852 = vmatpush.msra.mxu0 %v4657_v15  ;;  %872 = vmatpush.msra.mxu1 %v4659_v16  ;;  %v154_v16 = vld [vmem:[%s153_s26] ss:$8 sm:$0xf]  ;;  %s214_s26 = sand.u32 7, %s5070_s24 }
  0x69   :  { %908 = vmatpush.msra.mxu3 %v4667_v19  ;;  %892 = vmatpush.msra.mxu2 %v4665_v18  ;;  %156 = vst.msk [vmem:[#allocation2 + $0x2] ss:$8 sm:$0xf] %vm4741_vm0, %v154_v16  ;;  %v167_v19 = vld [vmem:[%s166_s27] ss:$8 sm:$0xf] }
  0x6a   :  { %853 = vmatpush.msra.mxu0 %v4671_v20  ;;  %873 = vmatpush.msra.mxu1 %v4673_v21  ;;  %169 = vst.msk [vmem:[#allocation2 + $0x3] ss:$8 sm:$0xf] %vm4741_vm0, %v167_v19  ;;  %v180_v19 = vld [vmem:[%s179_s21] ss:$8 sm:$0xf]  ;;  %s230_s21 = sadd.s32 %s3984_s19, %s227_s18 }
  0x6b   :  { %909 = vmatpush.msra.mxu3 %v4681_v23  ;;  %893 = vmatpush.msra.mxu2 %v4679_v22  ;;  %182 = vst.msk [vmem:[#allocation2 + $0x4] ss:$8 sm:$0xf] %vm4741_vm0, %v180_v19  ;;  %v5030_v19 = vld [vmem:[#allocation9 + $0x178] sm:$0xff]  ;;  %s3983_s27 = sshll.u32 %s211_s25, 5  ;;  %s231_s23 = scalar_lea.vmem [#allocation8], %s230_s21 }
  0x6c   :  { %854 = vmatpush.msra.mxu0 %v4684_v24  ;;  %874 = vmatpush.msra.mxu1 %v4686_v25  ;;  %s217_s29 = sadd.s32 %s3983_s27, %s214_s26  ;;  %s3911_s25 = sld [smem:[#allocation4 + $0xd]] }
  0x6d   :  { %910 = vmatpush.msra.mxu3 %v4694_v27  ;;  %894 = vmatpush.msra.mxu2 %v4692_v26  ;;  %s218_s14 = scalar_lea.vmem [#allocation8], %s217_s29  ;;  %s253_s26 = sand.u32 7, %s3908_s3 }
  0x6e   :  { %855 = vmatpush.msra.mxu0 %v4698_v28  ;;  %875 = vmatpush.msra.mxu1 %v4700_v29  ;;  %s3986_s27 = sshll.u32 %s250_s5, 5  ;;  %s276_s18 = sshra.s32 %s5438_s4, 3 }
  0x6f   :  { %911 = vmatpush.msra.mxu3 %v4707_v31  ;;  %895 = vmatpush.msra.mxu2 %v4705_v30  ;;  %s289_s19 = sshra.s32 %s5452_s17, 3  ;;  %s292_s21 = sand.u32 7, %s5452_s17 }
  0x70   :  { %856 = vmatpush.msra.mxu0 %v4712_v33  ;;  %876 = vmatpush.msra.mxu1 %v4714_v34  ;;  %s5658_s5 = sld [smem:[#allocation4 + $0x7]] }
  0x71   :  { %912 = vmatpush.msra.mxu3 %v4723_v36  ;;  %896 = vmatpush.msra.mxu2 %v4721_v35  ;;  %v546_v63 = vld [vmem:[#allocation2 + $0x8] sm:$0xc] }
  0x72   :  { %857 = vmatpush.msra.mxu0 %v4726_v37  ;;  %877 = vmatpush.msra.mxu1 %v4728_v38  ;;  %s263_s6 = sshra.s32 %s3911_s25, 3  ;;  %s266_s28 = sand.u32 7, %s3911_s25 }
  0x73   :  { %913 = vmatpush.msra.mxu3 %v4739_v42  ;;  %897 = vmatpush.msra.mxu2 %v4730_v39  ;;  %s3987_s29 = sshll.u32 %s263_s6, 5  ;;  %s5660_s6 = sld [smem:[#allocation4 + $0xf]] }
  0x74   :  { %858 = vmatpush.msra.mxu0 %v4735_v40  ;;  %878 = vmatpush.msra.mxu1 %v4737_v41 }
  0x75   :  { %914 = vmatpush.msra.mxu3 %v4757_v48  ;;  %898 = vmatpush.msra.mxu2 %v4746_v44  ;;  %v328_v44 = vld [vmem:[%s6656_s2] sm:$0x3] }
  0x76   :  { %859 = vmatpush.msra.mxu0 %v4748_v45  ;;  %879 = vmatpush.msra.mxu1 %v4750_v46 }
  0x77   :  { %915 = vmatpush.msra.mxu3 %v4767_v51  ;;  %899 = vmatpush.msra.mxu2 %v4755_v47 }
  0x78   :  { %860 = vmatpush.msra.mxu0 %v4772_v52  ;;  %880 = vmatpush.msra.mxu1 %v4774_v53 }
  0x79   :  { %916 = vmatpush.msra.mxu3 %v4781_v55  ;;  %900 = vmatpush.msra.mxu2 %v4779_v54 }
  0x7a   :  { %861 = vmatpush.msra.mxu0 %v4784_v56  ;;  %881 = vmatpush.msra.mxu1 %v4786_v57 }
  0x7b   :  { %917 = vmatpush.msra.mxu3 %v4793_v59  ;;  %901 = vmatpush.msra.mxu2 %v4791_v58 }
  0x7c   :  { %862 = vmatpush.msra.mxu0 %v4796_v60  ;;  %882 = vmatpush.msra.mxu1 %v4798_v61 }
  0x7d   :  { %918 = vmatpush.msra.mxu3 %v4812_v32  ;;  %902 = vmatpush.msra.mxu2 %v4803_v62 }
  0x7f   :  { %919 = vmatpush.msra.mxu3 %v4815_v49  ;;  %v545_v49 = vld [vmem:[#allocation2] sm:$0xc] }
  0x81   :  { %920 = vmatpush.msra.mxu3 %v4819_v50 }
  0x83   :  { %921 = vmatpush.msra.mxu3 %v4825_v43 }
  0x85   :  { %922 = vmatpush.msra.mxu3 %v4831_v0 }
  0xb9   :  { %v414_v3 = vpop.f32.mrf.mxu0 }
  0xba   :  { %v477_v4 = vadd.f32 %v414_v3, %v329_v1  ;;  %v434_v5 = vpop.f32.mrf.mxu1 }
  0xbb   :  { %v478_v6 = vadd.f32 %v434_v5, %v330_v2 }
  0xbc   :  { %v3926_v7 = vmul.f32 -1.442695, %v477_v4 }
  0xbd   :  { %v3927_v8 = vmul.f32 -1.442695, %v478_v6 }
  0xbe   :  { %4004 = vpow2.f32 %v3926_v7 }
  0xbf   :  { %4006 = vpow2.f32 %v3927_v8  ;;  %v547_v8 = vld [vmem:[#allocation2 + $0x10] sm:$0xc] }
  0xc0   :  { %v454_v10 = vpop.f32.mrf.mxu2 }
  0xc1   :  { %v479_v0 = vadd.f32 %v454_v10, %v331_v9 }
  0xc3   :  { %v3928_v11 = vmul.f32 -1.442695, %v479_v0 }
  0xc4   :  { %v4005_v12 = vpop.eup %4004 }
  0xc5   :  { %v4007_v13 = vpop.eup %4006  ;;  %v490_v14 = vadd.f32 1.0, %v4005_v12  ;;  %4008 = vpow2.f32 %v3928_v11 }
  0xc6   :  { %v491_v15 = vadd.f32 1.0, %v4007_v13 }
  0xc7   :  { %4010 = vrcp.f32 %v490_v14  ;;  %v504_v30 = vand.u32 2147483648, %v490_v14  ;;  %v502_v34 = vand.u32 2147483647, %v490_v14  ;;  %vm498_vm3 = vweird.f32 %v490_v14 }
  0xc8   :  { %4012 = vrcp.f32 %v491_v15  ;;  %v474_v20 = vpop.f32.mrf.mxu3  ;;  %v519_v31 = vand.u32 2147483648, %v491_v15  ;;  %v517_v36 = vand.u32 2147483647, %v491_v15  ;;  %vm513_vm4 = vweird.f32 %v491_v15 }
  0xc9   :  { %v480_v22 = vadd.f32 %v474_v20, %v332_v17  ;;  %v505_v41 = vor.u32 1.1754944e-38, %v504_v30  ;;  %vm503_vm7 = vcmp.eq.f32.partialorder %v502_v34, 8.507059e+37  ;;  %v548_v20 = vld [vmem:[#allocation2 + $0x18] sm:$0xc] }
  0xca   :  { %v520_v43 = vor.u32 1.1754944e-38, %v519_v31  ;;  %vm518_vm8 = vcmp.eq.f32.partialorder %v517_v36, 8.507059e+37 }
  0xcb   :  { %v4009_v21 = vpop.eup %4008 }
  0xcc   :  { %v492_v23 = vadd.f32 1.0, %v4009_v21 }
  0xcd   :  { %v4011_v24 = vpop.eup %4010 }
  0xce   :  { %v4013_v25 = vpop.eup %4012  ;;  %v494_v26 = vmul.f32 %v4011_v24, %v490_v14  ;;  %4014 = vrcp.f32 %v492_v23  ;;  %vm499_vm1 = vweird.f32 %v4011_v24  ;;  %v534_v57 = vand.u32 2147483648, %v492_v23 }
  0xcf   :  { %v509_v27 = vmul.f32 %v4013_v25, %v491_v15  ;;  %4016 = vtanh.f32 %v480_v22  ;;  %vm514_vm2 = vweird.f32 %v4013_v25  ;;  %vm500_vm5 = vmor %vm498_vm3, %vm499_vm1  ;;  %vm528_vm10 = vweird.f32 %v492_v23  ;;  %v193_v22 = vld [vmem:[%s192_s22] ss:$8 sm:$0xf]  ;;  %s243_s22 = sadd.s32 %s3985_s0, %s240_s20  ;;  %s279_s20 = sand.u32 7, %s5438_s4 }
  0xd0   :  { %v495_v28 = vsub.f32 1.0, %v494_v26  ;;  %vm515_vm6 = vmor %vm513_vm4, %vm514_vm2  ;;  %v532_v58 = vand.u32 2147483647, %v492_v23  ;;  %v535_v60 = vor.u32 1.1754944e-38, %v534_v57  ;;  %s244_s24 = scalar_lea.vmem [#allocation8], %s243_s22  ;;  %s3988_s0 = sshll.u32 %s276_s18, 5 }
  0xd1   :  { %v510_v29 = vsub.f32 1.0, %v509_v27  ;;  %195 = vst.msk [vmem:[#allocation2 + $0x5] ss:$8 sm:$0xf] %vm4741_vm0, %v193_v22  ;;  %v5038_v22 = vld [vmem:[#allocation9 + $0x150] sm:$0xff]  ;;  %s3989_s22 = sshll.u32 %s289_s19, 5 }
  0xd2   :  { %v496_v33 = vmul.f32 %v4011_v24, %v495_v28  ;;  %vm533_vm12 = vcmp.eq.f32.partialorder %v532_v58, 8.507059e+37  ;;  %6854 = vst [vmem:[#allocation33_spill] sm:$0xff] %v5038_v22 }
  0xd3   :  { %v511_v35 = vmul.f32 %v4013_v25, %v510_v29 }
  0xd4   :  { %v4015_v37 = vpop.eup %4014  ;;  %v497_v38 = vadd.f32 %v4011_v24, %v496_v33 }
  0xd5   :  { %v4017_v39 = vpop.eup %4016  ;;  %v524_v40 = vmul.f32 %v4015_v37, %v492_v23  ;;  %v512_v42 = vadd.f32 %v4013_v25, %v511_v35  ;;  %vm529_vm9 = vweird.f32 %v4015_v37 }
  0xd6   :  { %v501_v45 = vsel %vm500_vm5, %v4011_v24, %v497_v38  ;;  %vm530_vm11 = vmor %vm528_vm10, %vm529_vm9 }
  0xd7   :  { %v525_v46 = vsub.f32 1.0, %v524_v40  ;;  %v506_v47 = vsel %vm503_vm7, %v505_v41, %v501_v45  ;;  %v516_v48 = vsel %vm515_vm6, %v4013_v25, %v512_v42 }
  0xd8   :  { %v521_v51 = vsel %vm518_vm8, %v520_v43, %v516_v48  ;;  %v540_v52 = vmul.f32 %v4017_v39, %v506_v47 }
  0xd9   :  { %v526_v53 = vmul.f32 %v4015_v37, %v525_v46  ;;  %v539_v54 = vmul.f32 %v521_v51, %v328_v44 }
  0xdb   :  { %v4963_v55 = vadd.f32 %v540_v52, %v539_v54  ;;  %v527_v56 = vadd.f32 %v4015_v37, %v526_v53 }
  0xdd   :  { %4018 = vtanh.f32 %v4963_v55  ;;  %v531_v59 = vsel %vm530_vm11, %v4015_v37, %v527_v56  ;;  %v768_v43 = vrot.slane %v4963_v55, 6 }
  0xde   :  { %v536_v62 = vsel %vm533_vm12, %v535_v60, %v531_v59 }
  0xe3   :  { %v4019_v61 = vpop.eup %4018 }
  0xe4   :  { %v543_v32 = vmul.f32 %v4019_v61, %v536_v62 }
  0xe6   :  { %544 = vst [vmem:[#allocation3] sm:$0x3] %v543_v32  ;;  %629 = vmatmul.f32.vlgmr.msrb.gmra.mxu0 %v543_v32  ;;  %649 = vmatmul.f32.vlgmr.msrb.gmra.mxu1 %v543_v32 }
  0xe7   :  { %669 = vmatmul.f32.vlgmr.msrb.gmra.mxu2 %v543_v32  ;;  %689 = vmatmul.f32.vlgmr.msrb.gmra.mxu3 %v543_v32 }
 0x163   :  { %v630_v50 = vpop.f32.mrf.mxu0  ;;  %v650_v1 = vpop.f32.mrf.mxu1 }
 0x164   :  { %v697_v2 = vrot.slane %v630_v50, 6  ;;  %v698_v3 = vrot.slane %v650_v1, 6  ;;  %v4976_v1 = vld [vmem:[#allocation9 + $0x1e8] sm:$0xff] }
 0x165   :  { %1101 = vmatpush.msrb.mxu1 %v4976_v1 }
 0x166   :  { %v705_v4 = vadd.f32 %v697_v2, %v545_v49  ;;  %v706_v5 = vadd.f32 %v698_v3, %v546_v63  ;;  %v4974_v63 = vld [vmem:[#allocation9 + $0x1e0] sm:$0xff]  ;;  %v4978_v2 = vld [vmem:[#allocation9 + $0x1f0] sm:$0xff]  ;;  %v4982_v3 = vld [vmem:[#allocation9 + $0x1f8] sm:$0xff] }
 0x167   :  { %6846 = vst [vmem:[#allocation24_spill] sm:$0xff] %v4978_v2  ;;  %1081 = vmatpush.msrb.mxu0 %v4974_v63  ;;  %1121 = vmatpush.msrb.mxu2 %v4978_v2 }
 0x168   :  { %v3929_v6 = vmul.f32 -1.442695, %v705_v4  ;;  %v3930_v7 = vmul.f32 -1.442695, %v706_v5  ;;  %6847 = vst [vmem:[#allocation26_spill] sm:$0xff] %v4982_v3  ;;  %1141 = vmatpush.msrb.mxu3 %v4982_v3  ;;  %v4986_v4 = vld [vmem:[#allocation9 + $0x1c0] sm:$0xff] }
 0x169   :  { %6848 = vst [vmem:[#allocation27_spill] sm:$0xff] %v4986_v4  ;;  %v4988_v5 = vld [vmem:[#allocation9 + $0x1c8] sm:$0xff]  ;;  %1082 = vmatpush.msrb.mxu0 %v4986_v4 }
 0x16a   :  { %4020 = vpow2.f32 %v3929_v6  ;;  %v670_v9 = vpop.f32.mrf.mxu2  ;;  %v690_v16 = vpop.f32.mrf.mxu3  ;;  %v4990_v6 = vld [vmem:[#allocation9 + $0x1d0] sm:$0xff]  ;;  %1102 = vmatpush.msrb.mxu1 %v4988_v5 }
 0x16b   :  { %4022 = vpow2.f32 %v3930_v7  ;;  %v699_v10 = vrot.slane %v670_v9, 6  ;;  %v700_v17 = vrot.slane %v690_v16, 6  ;;  %v4994_v7 = vld [vmem:[#allocation9 + $0x1d8] sm:$0xff]  ;;  %1122 = vmatpush.msrb.mxu2 %v4990_v6  ;;  %v5000_v9 = vld [vmem:[#allocation9 + $0x1a8] sm:$0xff] }
 0x16c   :  { %1142 = vmatpush.msrb.mxu3 %v4994_v7  ;;  %1103 = vmatpush.msrb.mxu1 %v5000_v9  ;;  %v5024_v16 = vld [vmem:[#allocation9 + $0x168] sm:$0xff] }
 0x16d   :  { %v707_v0 = vadd.f32 %v699_v10, %v547_v8  ;;  %v708_v25 = vadd.f32 %v700_v17, %v548_v20  ;;  %v4998_v8 = vld [vmem:[#allocation9 + $0x1a0] sm:$0xff]  ;;  %v5002_v10 = vld [vmem:[#allocation9 + $0x1b0] sm:$0xff]  ;;  %6851 = vst [vmem:[#allocation30_spill] sm:$0xff] %v5024_v16 }
 0x16e   :  { %1083 = vmatpush.msrb.mxu0 %v4998_v8  ;;  %1123 = vmatpush.msrb.mxu2 %v5002_v10  ;;  %v5026_v17 = vld [vmem:[#allocation9 + $0x170] sm:$0xff]  ;;  %v5034_v20 = vld [vmem:[#allocation9 + $0x140] sm:$0xff] }
 0x16f   :  { %v3931_v11 = vmul.f32 -1.442695, %v707_v0  ;;  %v5006_v0 = vld [vmem:[#allocation9 + $0x1b8] sm:$0xff]  ;;  %6852 = vst [vmem:[#allocation31_spill] sm:$0xff] %v5034_v20 }
 0x170   :  { %v4021_v12 = vpop.eup %4020  ;;  %6849 = vst [vmem:[#allocation28_spill] sm:$0xff] %v5006_v0  ;;  %1143 = vmatpush.msrb.mxu3 %v5006_v0 }
 0x171   :  { %v4023_v13 = vpop.eup %4022  ;;  %v718_v14 = vadd.f32 1.0, %v4021_v12  ;;  %4024 = vpow2.f32 %v3931_v11  ;;  %v5010_v11 = vld [vmem:[#allocation9 + $0x180] sm:$0xff]  ;;  %v5012_v12 = vld [vmem:[#allocation9 + $0x188] sm:$0xff] }
 0x172   :  { %v719_v15 = vadd.f32 1.0, %v4023_v13  ;;  %6850 = vst [vmem:[#allocation29_spill] sm:$0xff] %v5010_v11  ;;  %v5014_v13 = vld [vmem:[#allocation9 + $0x190] sm:$0xff]  ;;  %1084 = vmatpush.msrb.mxu0 %v5010_v11  ;;  %1104 = vmatpush.msrb.mxu1 %v5012_v12 }
 0x173   :  { %4026 = vrcp.f32 %v718_v14  ;;  %v732_v31 = vand.u32 2147483648, %v718_v14  ;;  %v730_v35 = vand.u32 2147483647, %v718_v14  ;;  %vm726_vm15 = vweird.f32 %v718_v14  ;;  %1124 = vmatpush.msrb.mxu2 %v5014_v13 }
 0x174   :  { %4028 = vrcp.f32 %v719_v15  ;;  %v747_v33 = vand.u32 2147483648, %v719_v15  ;;  %v745_v37 = vand.u32 2147483647, %v719_v15  ;;  %vm741_vm1 = vweird.f32 %v719_v15  ;;  %1105 = vmatpush.msrb.mxu1 %v5024_v16 }
 0x175   :  { %v733_v41 = vor.u32 1.1754944e-38, %v732_v31  ;;  %vm731_vm4 = vcmp.eq.f32.partialorder %v730_v35, 8.507059e+37  ;;  %1125 = vmatpush.msrb.mxu2 %v5026_v17  ;;  %v5064_v31 = vld [vmem:[#allocation9 + $0x110] sm:$0xff] }
 0x176   :  { %v748_v44 = vor.u32 1.1754944e-38, %v747_v33  ;;  %vm746_vm5 = vcmp.eq.f32.partialorder %v745_v37, 8.507059e+37 }
 0x177   :  { %v4025_v21 = vpop.eup %4024  ;;  %1126 = vmatpush.msrb.mxu2 %v5038_v22 }
 0x178   :  { %v720_v23 = vadd.f32 1.0, %v4025_v21  ;;  %v5036_v21 = vld [vmem:[#allocation9 + $0x148] sm:$0xff] }
 0x179   :  { %v4027_v24 = vpop.eup %4026  ;;  %6853 = vst [vmem:[#allocation32_spill] sm:$0xff] %v5036_v21  ;;  %1106 = vmatpush.msrb.mxu1 %v5036_v21 }
 0x17a   :  { %v4029_v26 = vpop.eup %4028  ;;  %v722_v27 = vmul.f32 %v4027_v24, %v718_v14  ;;  %4030 = vrcp.f32 %v720_v23  ;;  %vm727_vm13 = vweird.f32 %v4027_v24  ;;  %v762_v55 = vand.u32 2147483648, %v720_v23  ;;  %v5018_v14 = vld [vmem:[#allocation9 + $0x198] sm:$0xff] }
 0x17b   :  { %v737_v28 = vmul.f32 %v4029_v26, %v719_v15  ;;  %4032 = vtanh.f32 %v708_v25  ;;  %vm742_vm14 = vweird.f32 %v4029_v26  ;;  %vm728_vm2 = vmor %vm726_vm15, %vm727_vm13  ;;  %vm756_vm7 = vweird.f32 %v720_v23  ;;  %1144 = vmatpush.msrb.mxu3 %v5018_v14  ;;  %v5022_v15 = vld [vmem:[#allocation9 + $0x160] sm:$0xff]  ;;  %v5048_v25 = vld [vmem:[#allocation9 + $0x128] sm:$0xff] }
 0x17c   :  { %v723_v29 = vsub.f32 1.0, %v722_v27  ;;  %vm743_vm3 = vmor %vm741_vm1, %vm742_vm14  ;;  %v760_v59 = vand.u32 2147483647, %v720_v23  ;;  %v763_v61 = vor.u32 1.1754944e-38, %v762_v55  ;;  %1085 = vmatpush.msrb.mxu0 %v5022_v15  ;;  %v776_v27 = vld [vmem:[#allocation2] sm:$0x30]  ;;  %1107 = vmatpush.msrb.mxu1 %v5048_v25 }
 0x17d   :  { %v738_v30 = vsub.f32 1.0, %v737_v28  ;;  %1145 = vmatpush.msrb.mxu3 %v5030_v19  ;;  %v5054_v28 = vld [vmem:[#allocation9 + $0x138] sm:$0xff] }
 0x17e   :  { %v724_v34 = vmul.f32 %v4027_v24, %v723_v29  ;;  %vm761_vm9 = vcmp.eq.f32.partialorder %v760_v59, 8.507059e+37  ;;  %1086 = vmatpush.msrb.mxu0 %v5034_v20  ;;  %v5060_v29 = vld [vmem:[#allocation9 + $0x100] sm:$0xff]  ;;  %v5106_v55 = vld [vmem:[#allocation9 + $0xb8] sm:$0xff] }
 0x17f   :  { %v739_v36 = vmul.f32 %v4029_v26, %v738_v30  ;;  %v5062_v30 = vld [vmem:[#allocation9 + $0x108] sm:$0xff]  ;;  %v5108_v59 = vld [vmem:[#allocation9 + $0x80] sm:$0xff] }
 0x180   :  { %v4031_v38 = vpop.eup %4030  ;;  %v725_v39 = vadd.f32 %v4027_v24, %v724_v34  ;;  %v777_v34 = vld [vmem:[#allocation2 + $0x8] sm:$0x30]  ;;  %1108 = vmatpush.msrb.mxu1 %v5062_v30 }
 0x181   :  { %v752_v40 = vmul.f32 %v4031_v38, %v720_v23  ;;  %v740_v42 = vadd.f32 %v4029_v26, %v739_v36  ;;  %v4033_v46 = vpop.eup %4032  ;;  %vm757_vm6 = vweird.f32 %v4031_v38  ;;  %v5042_v23 = vld [vmem:[#allocation9 + $0x158] sm:$0xff] }
 0x182   :  { %v729_v45 = vsel %vm728_vm2, %v4027_v24, %v725_v39  ;;  %vm758_vm8 = vmor %vm756_vm7, %vm757_vm6  ;;  %6855 = vst [vmem:[#allocation34_spill] sm:$0xff] %v5042_v23  ;;  %1146 = vmatpush.msrb.mxu3 %v5042_v23  ;;  %v5046_v24 = vld [vmem:[#allocation9 + $0x120] sm:$0xff]  ;;  %v5068_v36 = vld [vmem:[#allocation9 + $0x118] sm:$0xff] }
 0x183   :  { %v753_v47 = vsub.f32 1.0, %v752_v40  ;;  %v734_v48 = vsel %vm731_vm4, %v733_v41, %v729_v45  ;;  %v744_v51 = vsel %vm743_vm3, %v4029_v26, %v740_v42  ;;  %v5050_v26 = vld [vmem:[#allocation9 + $0x130] sm:$0xff]  ;;  %1087 = vmatpush.msrb.mxu0 %v5046_v24  ;;  %v5074_v39 = vld [vmem:[#allocation9 + $0xe0] sm:$0xff]  ;;  %v5076_v40 = vld [vmem:[#allocation9 + $0xe8] sm:$0xff] }
 0x184   :  { %v749_v52 = vsel %vm746_vm5, %v748_v44, %v744_v51  ;;  %v771_v53 = vmul.f32 %v4033_v46, %v734_v48  ;;  %1127 = vmatpush.msrb.mxu2 %v5050_v26  ;;  %1147 = vmatpush.msrb.mxu3 %v5054_v28  ;;  %v5078_v41 = vld [vmem:[#allocation9 + $0xf0] sm:$0xff]  ;;  %v5082_v42 = vld [vmem:[#allocation9 + $0xf8] sm:$0xff]  ;;  %v5086_v45 = vld [vmem:[#allocation9 + $0xc0] sm:$0xff] }
 0x185   :  { %v770_v54 = vmul.f32 %v768_v43, %v749_v52  ;;  %v754_v56 = vmul.f32 %v4031_v38, %v753_v47  ;;  %1088 = vmatpush.msrb.mxu0 %v5060_v29  ;;  %1109 = vmatpush.msrb.mxu1 %v5076_v40  ;;  %v5088_v46 = vld [vmem:[#allocation9 + $0xc8] sm:$0xff]  ;;  %v5090_v47 = vld [vmem:[#allocation9 + $0xd0] sm:$0xff]  ;;  %v5094_v48 = vld [vmem:[#allocation9 + $0xd8] sm:$0xff] }
 0x186   :  { %1128 = vmatpush.msrb.mxu2 %v5064_v31  ;;  %1148 = vmatpush.msrb.mxu3 %v5068_v36 }
 0x187   :  { %v4971_v57 = vadd.f32 %v771_v53, %v770_v54  ;;  %v755_v58 = vadd.f32 %v4031_v38, %v754_v56  ;;  %1089 = vmatpush.msrb.mxu0 %v5074_v39  ;;  %1110 = vmatpush.msrb.mxu1 %v5088_v46  ;;  %v778_v53 = vld [vmem:[#allocation2 + $0x10] sm:$0x30]  ;;  %v5100_v56 = vld [vmem:[#allocation9 + $0xa8] sm:$0xff] }
 0x188   :  { %1129 = vmatpush.msrb.mxu2 %v5078_v41  ;;  %1149 = vmatpush.msrb.mxu3 %v5082_v42  ;;  %v5098_v54 = vld [vmem:[#allocation9 + $0xa0] sm:$0xff] }
 0x189   :  { %4034 = vtanh.f32 %v4971_v57  ;;  %v759_v60 = vsel %vm758_vm8, %v4031_v38, %v755_v58  ;;  %1090 = vmatpush.msrb.mxu0 %v5086_v45  ;;  %1111 = vmatpush.msrb.mxu1 %v5100_v56  ;;  %v5104_v58 = vld [vmem:[#allocation9 + $0xb0] sm:$0xff] }
 0x18a   :  { %v764_v32 = vsel %vm761_vm9, %v763_v61, %v759_v60  ;;  %1130 = vmatpush.msrb.mxu2 %v5090_v47  ;;  %1150 = vmatpush.msrb.mxu3 %v5094_v48  ;;  %v5113_v61 = vld [vmem:[#allocation9 + $0x88] sm:$0xff] }
 0x18b   :  { %1091 = vmatpush.msrb.mxu0 %v5098_v54  ;;  %1112 = vmatpush.msrb.mxu1 %v5113_v61 }
 0x18c   :  { %1131 = vmatpush.msrb.mxu2 %v5104_v58  ;;  %1151 = vmatpush.msrb.mxu3 %v5106_v55 }
 0x18d   :  { %1092 = vmatpush.msrb.mxu0 %v5108_v59 }
 0x18f   :  { %v4035_v62 = vpop.eup %4034 }
 0x190   :  { %v774_v49 = vmul.f32 %v4035_v62, %v764_v32  ;;  %v5115_v62 = vld [vmem:[#allocation9 + $0x90] sm:$0xff]  ;;  %v5117_v32 = vld [vmem:[#allocation9 + $0x98] sm:$0xff] }
 0x191   :  { %1132 = vmatpush.msrb.mxu2 %v5115_v62  ;;  %1152 = vmatpush.msrb.mxu3 %v5117_v32 }
 0x192   :  { %775 = vst [vmem:[#allocation3] sm:$0xc] %v774_v49  ;;  %v845_v50 = vrot.slane %v774_v49, 2 }
 0x194   :  { %863 = vmatmul.f32.vlgmr.msra.gmra.mxu0 %v845_v50  ;;  %883 = vmatmul.f32.vlgmr.msra.gmra.mxu1 %v845_v50 }
 0x195   :  { %903 = vmatmul.f32.vlgmr.msra.gmra.mxu2 %v845_v50  ;;  %923 = vmatmul.f32.vlgmr.msra.gmra.mxu3 %v845_v50  ;;  %v5121_v50 = vld [vmem:[#allocation9 + $0x60] sm:$0xff] }
 0x196   :  { %6856 = vst [vmem:[#allocation35_spill] sm:$0xff] %v5121_v50  ;;  %1093 = vmatpush.msrb.mxu0 %v5121_v50 }
 0x211   :  { %v864_v33 = vpop.f32.mrf.mxu0  ;;  %v884_v35 = vpop.f32.mrf.mxu1 }
 0x212   :  { %v931_v37 = vrot.slane %v864_v33, 4  ;;  %v932_v38 = vrot.slane %v884_v35, 4  ;;  %v5125_v33 = vld [vmem:[#allocation9 + $0x70] sm:$0xff]  ;;  %v5132_v35 = vld [vmem:[#allocation9 + $0x40] sm:$0xff] }
 0x213   :  { %6858 = vst [vmem:[#allocation37_spill] sm:$0xff] %v5125_v33  ;;  %1133 = vmatpush.msrb.mxu2 %v5125_v33  ;;  %1094 = vmatpush.msrb.mxu0 %v5132_v35  ;;  %v5160_v33 = vld [vmem:[#allocation9 + $0x8] sm:$0xff] }
 0x214   :  { %v939_v43 = vadd.f32 %v931_v37, %v776_v27  ;;  %v940_v44 = vadd.f32 %v932_v38, %v777_v34  ;;  %v5123_v27 = vld [vmem:[#allocation9 + $0x68] sm:$0xff]  ;;  %v5130_v34 = vld [vmem:[#allocation9 + $0x78] sm:$0xff]  ;;  %6860 = vst [vmem:[#allocation39_spill] sm:$0xff] %v5132_v35 }
 0x215   :  { %6857 = vst [vmem:[#allocation36_spill] sm:$0xff] %v5123_v27  ;;  %v5134_v37 = vld [vmem:[#allocation9 + $0x48] sm:$0xff]  ;;  %1113 = vmatpush.msrb.mxu1 %v5123_v27  ;;  %1153 = vmatpush.msrb.mxu3 %v5130_v34  ;;  %v5168_v35 = vld [vmem:[#allocation9 + $0x18] sm:$0xff] }
 0x216   :  { %v3932_v51 = vmul.f32 -1.442695, %v939_v43  ;;  %v3933_v52 = vmul.f32 -1.442695, %v940_v44  ;;  %6859 = vst [vmem:[#allocation38_spill] sm:$0xff] %v5130_v34  ;;  %v5139_v43 = vld [vmem:[#allocation9 + $0x50] sm:$0xff] }
 0x217   :  { %6861 = vst [vmem:[#allocation40_spill] sm:$0xff] %v5134_v37  ;;  %v5141_v44 = vld [vmem:[#allocation9 + $0x58] sm:$0xff]  ;;  %1114 = vmatpush.msrb.mxu1 %v5134_v37  ;;  %1134 = vmatpush.msrb.mxu2 %v5139_v43  ;;  %v5158_v34 = vld [vmem:[#allocation9] sm:$0xff]  ;;  %v5166_v37 = vld [vmem:[#allocation9 + $0x10] sm:$0xff] }
 0x218   :  { %4036 = vpow2.f32 %v3932_v51  ;;  %v904_v60 = vpop.f32.mrf.mxu2  ;;  %6862 = vst [vmem:[#allocation41_spill] sm:$0xff] %v5139_v43  ;;  %v5145_v51 = vld [vmem:[#allocation9 + $0x20] sm:$0xff]  ;;  %1154 = vmatpush.msrb.mxu3 %v5141_v44 }
 0x219   :  { %4038 = vpow2.f32 %v3933_v52  ;;  %v933_v49 = vrot.slane %v904_v60, 4  ;;  %6863 = vst [vmem:[#allocation42_spill] sm:$0xff] %v5141_v44  ;;  %v5147_v52 = vld [vmem:[#allocation9 + $0x28] sm:$0xff]  ;;  %1095 = vmatpush.msrb.mxu0 %v5145_v51  ;;  %v924_v44 = vpop.f32.mrf.mxu3 }
 0x21a   :  { %6864 = vst [vmem:[#allocation43_spill] sm:$0xff] %v5160_v33  ;;  %1115 = vmatpush.msrb.mxu1 %v5147_v52 }
 0x21b   :  { %v941_v38 = vadd.f32 %v933_v49, %v778_v53  ;;  %v5152_v53 = vld [vmem:[#allocation9 + $0x30] sm:$0xff]  ;;  %v5154_v49 = vld [vmem:[#allocation9 + $0x38] sm:$0xff]  ;;  %6865 = vst [vmem:[#allocation44_spill] sm:$0xff] %v5166_v37  ;;  %1096 = vmatpush.msrb.mxu0 %v5158_v34 }
 0x21c   :  { %1135 = vmatpush.msrb.mxu2 %v5152_v53  ;;  %1155 = vmatpush.msrb.mxu3 %v5154_v49 }
 0x21d   :  { %v3934_v60 = vmul.f32 -1.442695, %v941_v38  ;;  %1116 = vmatpush.msrb.mxu1 %v5160_v33  ;;  %1315 = vmatpush.msra.mxu0 %v4974_v63 }
 0x21e   :  { %v4037_v27 = vpop.eup %4036  ;;  %1136 = vmatpush.msrb.mxu2 %v5166_v37  ;;  %1156 = vmatpush.msrb.mxu3 %v5168_v35  ;;  %v219_v37 = vld [vmem:[%s218_s14] ss:$8 sm:$0xf]  ;;  %s269_s14 = sadd.s32 %s3987_s29, %s266_s28  ;;  %s305_s28 = sand.u32 7, %s5658_s5 }
 0x21f   :  { %v4039_v50 = vpop.eup %4038  ;;  %v5162_v38 = vadd.f32 1.0, %v4037_v27  ;;  %4040 = vpow2.f32 %v3934_v60  ;;  %v934_v27 = vrot.slane %v924_v44, 4  ;;  %1335 = vmatpush.msra.mxu1 %v4976_v1  ;;  %v779_v60 = vld [vmem:[#allocation2 + $0x18] sm:$0x30]  ;;  %1316 = vmatpush.msra.mxu0 %v4986_v4  ;;  %s270_s16 = scalar_lea.vmem [#allocation8], %s269_s14 }
 0x220   :  { %v5170_v43 = vadd.f32 1.0, %v4039_v50  ;;  %v206_v50 = vld [vmem:[%s205_s13] ss:$8 sm:$0xf]  ;;  %1355 = vmatpush.msra.mxu2 %v4978_v2  ;;  %1375 = vmatpush.msra.mxu3 %v4982_v3  ;;  %s256_s13 = sadd.s32 %s3986_s27, %s253_s26  ;;  %s302_s26 = sshra.s32 %s5658_s5, 3 }
 0x221   :  { %4042 = vrcp.f32 %v5162_v38  ;;  %208 = vst.msk [vmem:[#allocation2 + $0x6] ss:$8 sm:$0xf] %vm4741_vm0, %v206_v50  ;;  %1336 = vmatpush.msra.mxu1 %v4988_v5  ;;  %v942_v2 = vadd.f32 %v934_v27, %v779_v60  ;;  %1317 = vmatpush.msra.mxu0 %v4998_v8  ;;  %v966_v60 = vand.u32 2147483648, %v5162_v38  ;;  %vm960_vm12 = vweird.f32 %v5162_v38  ;;  %s257_s15 = scalar_lea.vmem [#allocation8], %s256_s13  ;;  %s315_s27 = sshra.s32 %s5660_s6, 3 }
 0x222   :  { %4044 = vrcp.f32 %v5170_v43  ;;  %221 = vst.msk [vmem:[#allocation2 + $0x7] ss:$8 sm:$0xf] %vm4741_vm0, %v219_v37  ;;  %1356 = vmatpush.msra.mxu2 %v4990_v6  ;;  %1376 = vmatpush.msra.mxu3 %v4994_v7  ;;  %v981_v18 = vand.u32 2147483648, %v5170_v43  ;;  %vm975_vm13 = vweird.f32 %v5170_v43  ;;  %s3990_s29 = sshll.u32 %s302_s26, 5  ;;  %s318_s13 = sand.u32 7, %s5660_s6 }
 0x223   :  { %1337 = vmatpush.msra.mxu1 %v5000_v9  ;;  %1318 = vmatpush.msra.mxu0 %v5010_v11  ;;  %v964_v11 = vand.u32 2147483647, %v5162_v38  ;;  %s3991_s14 = sshll.u32 %s315_s27, 5  ;;  %s3793_s6 = sshll.u32 %s6665_s11, 4  ;;  %s3794_s6 = int_to_ptr.hbm [resolvable:$true] %s3793_s6 }
 0x224   :  { %1357 = vmatpush.msra.mxu2 %v5002_v10  ;;  %1377 = vmatpush.msra.mxu3 %v5006_v0  ;;  %s4523_s26 = smov [#allocation15]  }
 0x225   :  { %v4041_v33 = vpop.eup %4040  ;;  %1338 = vmatpush.msra.mxu1 %v5012_v12  ;;  %1319 = vmatpush.msra.mxu0 %v5022_v15  ;;  %vm965_vm1 = vcmp.eq.f32.partialorder %v964_v11, 8.507059e+37  ;;  %s3791_s27 = sshll.u32 %s4523_s26, 4  ;;  %s3792_s27 = int_to_ptr.vmem [resolvable:$true] %s3791_s27 }
 0x226   :  { %v5188_v44 = vadd.f32 1.0, %v4041_v33  ;;  %1358 = vmatpush.msra.mxu2 %v5014_v13  ;;  %1378 = vmatpush.msra.mxu3 %v5018_v14 }
 0x227   :  { %v4043_v50 = vpop.eup %4042  ;;  %1339 = vmatpush.msra.mxu1 %v5024_v16  ;;  %1320 = vmatpush.msra.mxu0 %v5034_v20 }
 0x228   :  { %v4045_v3 = vpop.eup %4044  ;;  %v956_v4 = vmul.f32 %v4043_v50, %v5162_v38  ;;  %4046 = vrcp.f32 %v5188_v44  ;;  %vm961_vm10 = vweird.f32 %v4043_v50  ;;  %1359 = vmatpush.msra.mxu2 %v5026_v17  ;;  %1379 = vmatpush.msra.mxu3 %v5030_v19  ;;  %v982_v38 = vor.u32 1.1754944e-38, %v981_v18 }
 0x229   :  { %v971_v33 = vmul.f32 %v4045_v3, %v5170_v43  ;;  %4048 = vtanh.f32 %v942_v2  ;;  %vm976_vm11 = vweird.f32 %v4045_v3  ;;  %1340 = vmatpush.msra.mxu1 %v5036_v21  ;;  %vm962_vm14 = vmor %vm960_vm12, %vm961_vm10  ;;  %1321 = vmatpush.msra.mxu0 %v5046_v24  ;;  %vm990_vm4 = vweird.f32 %v5188_v44 }
 0x22a   :  { %v957_v37 = vsub.f32 1.0, %v956_v4  ;;  %1360 = vmatpush.msra.mxu2 %v5038_v22  ;;  %1380 = vmatpush.msra.mxu3 %v5042_v23  ;;  %vm977_vm15 = vmor %vm975_vm13, %vm976_vm11 }
 0x22b   :  { %v972_v27 = vsub.f32 1.0, %v971_v33  ;;  %v979_v33 = vand.u32 2147483647, %v5170_v43  ;;  %1341 = vmatpush.msra.mxu1 %v5048_v25  ;;  %1322 = vmatpush.msra.mxu0 %v5060_v29 }
 0x22c   :  { %v958_v0 = vmul.f32 %v4043_v50, %v957_v37  ;;  %1361 = vmatpush.msra.mxu2 %v5050_v26  ;;  %1381 = vmatpush.msra.mxu3 %v5054_v28 }
 0x22d   :  { %v973_v4 = vmul.f32 %v4045_v3, %v972_v27  ;;  %v967_v27 = vor.u32 1.1754944e-38, %v966_v60  ;;  %vm980_vm2 = vcmp.eq.f32.partialorder %v979_v33, 8.507059e+37  ;;  %1342 = vmatpush.msra.mxu1 %v5062_v30  ;;  %1323 = vmatpush.msra.mxu0 %v5074_v39  ;;  %v6867_v33 = vld [vmem:[#allocation36_spill] sm:$0xff] }
 0x22e   :  { %v5215_v2 = vpop.eup %4046  ;;  %v959_v16 = vadd.f32 %v4043_v50, %v958_v0  ;;  %v1002_v0 = vrot.slane %v4971_v57, 6  ;;  %1362 = vmatpush.msra.mxu2 %v5064_v31  ;;  %1382 = vmatpush.msra.mxu3 %v5068_v36 }
 0x22f   :  { %v986_v37 = vmul.f32 %v5215_v2, %v5188_v44  ;;  %v974_v20 = vadd.f32 %v4045_v3, %v973_v4  ;;  %v4049_v43 = vpop.eup %4048  ;;  %1343 = vmatpush.msra.mxu1 %v5076_v40  ;;  %1324 = vmatpush.msra.mxu0 %v5086_v45  ;;  %vm991_vm3 = vweird.f32 %v5215_v2 }
 0x230   :  { %v963_v22 = vsel %vm962_vm14, %v4043_v50, %v959_v16  ;;  %1363 = vmatpush.msra.mxu2 %v5078_v41  ;;  %1383 = vmatpush.msra.mxu3 %v5082_v42  ;;  %vm992_vm5 = vmor %vm990_vm4, %vm991_vm3  ;;  %v6866_v50 = vld [vmem:[#allocation35_spill] sm:$0xff] }
 0x231   :  { %v987_v23 = vsub.f32 1.0, %v986_v37  ;;  %v968_v21 = vsel %vm965_vm1, %v967_v27, %v963_v22  ;;  %v978_v60 = vsel %vm977_vm15, %v4045_v3, %v974_v20  ;;  %1344 = vmatpush.msra.mxu1 %v5088_v46  ;;  %v996_v20 = vand.u32 2147483648, %v5188_v44  ;;  %1325 = vmatpush.msra.mxu0 %v5098_v54  ;;  %v6869_v37 = vld [vmem:[#allocation38_spill] sm:$0xff] }
 0x232   :  { %v983_v4 = vsel %vm980_vm2, %v982_v38, %v978_v60  ;;  %v1005_v57 = vmul.f32 %v4049_v43, %v968_v21  ;;  %1364 = vmatpush.msra.mxu2 %v5090_v47  ;;  %1384 = vmatpush.msra.mxu3 %v5094_v48  ;;  %v994_v21 = vand.u32 2147483647, %v5188_v44  ;;  %v6868_v44 = vld [vmem:[#allocation37_spill] sm:$0xff]  ;;  %v6870_v38 = vld [vmem:[#allocation39_spill] sm:$0xff]  ;;  %v6871_v43 = vld [vmem:[#allocation40_spill] sm:$0xff] }
 0x233   :  { %v1004_v18 = vmul.f32 %v1002_v0, %v983_v4  ;;  %v988_v11 = vmul.f32 %v5215_v2, %v987_v23  ;;  %1345 = vmatpush.msra.mxu1 %v5100_v56  ;;  %1326 = vmatpush.msra.mxu0 %v5108_v59  ;;  %v997_v23 = vor.u32 1.1754944e-38, %v996_v20  ;;  %v6872_v60 = vld [vmem:[#allocation41_spill] sm:$0xff]  ;;  %v6873_v4 = vld [vmem:[#allocation42_spill] sm:$0xff] }
 0x234   :  { %1365 = vmatpush.msra.mxu2 %v5104_v58  ;;  %1385 = vmatpush.msra.mxu3 %v5106_v55  ;;  %vm995_vm6 = vcmp.eq.f32.partialorder %v994_v21, 8.507059e+37  ;;  %v6877_v20 = vld [vmem:[#allocation26_spill] sm:$0xff]  ;;  %v6878_v21 = vld [vmem:[#allocation27_spill] sm:$0xff] }
 0x235   :  { %v5239_v3 = vadd.f32 %v1005_v57, %v1004_v18  ;;  %v989_v16 = vadd.f32 %v5215_v2, %v988_v11  ;;  %1346 = vmatpush.msra.mxu1 %v5113_v61  ;;  %1327 = vmatpush.msra.mxu0 %v6866_v50  ;;  %v6874_v18 = vld [vmem:[#allocation43_spill] sm:$0xff]  ;;  %v6875_v11 = vld [vmem:[#allocation44_spill] sm:$0xff] }
 0x236   :  { %1366 = vmatpush.msra.mxu2 %v5115_v62  ;;  %1386 = vmatpush.msra.mxu3 %v5117_v32 }
 0x237   :  { %4050 = vtanh.f32 %v5239_v3  ;;  %v993_v22 = vsel %vm992_vm5, %v5215_v2, %v989_v16  ;;  %1347 = vmatpush.msra.mxu1 %v6867_v33  ;;  %1328 = vmatpush.msra.mxu0 %v6870_v38  ;;  %v6876_v16 = vld [vmem:[#allocation24_spill] sm:$0xff] }
 0x238   :  { %1367 = vmatpush.msra.mxu2 %v6868_v44  ;;  %1387 = vmatpush.msra.mxu3 %v6869_v37  ;;  %v998_v0 = vsel %vm995_vm6, %v997_v23, %v993_v22 }
 0x239   :  { %1348 = vmatpush.msra.mxu1 %v6871_v43  ;;  %1329 = vmatpush.msra.mxu0 %v5145_v51 }
 0x23a   :  { %1368 = vmatpush.msra.mxu2 %v6872_v60  ;;  %1388 = vmatpush.msra.mxu3 %v6873_v4 }
 0x23b   :  { %1349 = vmatpush.msra.mxu1 %v5147_v52  ;;  %1330 = vmatpush.msra.mxu0 %v5158_v34 }
 0x23c   :  { %1369 = vmatpush.msra.mxu2 %v5152_v53  ;;  %1389 = vmatpush.msra.mxu3 %v5154_v49 }
 0x23d   :  { %v4051_v27 = vpop.eup %4050  ;;  %1350 = vmatpush.msra.mxu1 %v6874_v18 }
 0x23e   :  { %v1008_v2 = vmul.f32 %v4051_v27, %v998_v0  ;;  %1370 = vmatpush.msra.mxu2 %v6875_v11  ;;  %1390 = vmatpush.msra.mxu3 %v5168_v35 }
 0x240   :  { %1009 = vst [vmem:[#allocation3] sm:$0x30] %v1008_v2  ;;  %v1079_v57 = vrot.slane %v1008_v2, 4 }
 0x242   :  { %1097 = vmatmul.f32.vlgmr.msrb.gmra.mxu0 %v1079_v57  ;;  %1117 = vmatmul.f32.vlgmr.msrb.gmra.mxu1 %v1079_v57 }
 0x243   :  { %1137 = vmatmul.f32.vlgmr.msrb.gmra.mxu2 %v1079_v57  ;;  %1157 = vmatmul.f32.vlgmr.msrb.gmra.mxu3 %v1079_v57 }
 0x244   :  { %1534 = vmatpush.msrb.mxu0 %v4974_v63  ;;  %1554 = vmatpush.msrb.mxu1 %v4976_v1  ;;  %v6879_v63 = vld [vmem:[#allocation28_spill] sm:$0xff]  ;;  %v6880_v1 = vld [vmem:[#allocation29_spill] sm:$0xff] }
 0x245   :  { %1574 = vmatpush.msrb.mxu2 %v6876_v16  ;;  %1594 = vmatpush.msrb.mxu3 %v6877_v20 }
 0x246   :  { %1535 = vmatpush.msrb.mxu0 %v6878_v21  ;;  %1555 = vmatpush.msrb.mxu1 %v4988_v5  ;;  %v6881_v5 = vld [vmem:[#allocation30_spill] sm:$0xff] }
 0x247   :  { %1575 = vmatpush.msrb.mxu2 %v4990_v6  ;;  %1595 = vmatpush.msrb.mxu3 %v4994_v7  ;;  %v6882_v6 = vld [vmem:[#allocation31_spill] sm:$0xff]  ;;  %v6883_v7 = vld [vmem:[#allocation32_spill] sm:$0xff] }
 0x248   :  { %1536 = vmatpush.msrb.mxu0 %v4998_v8  ;;  %1556 = vmatpush.msrb.mxu1 %v5000_v9  ;;  %v6884_v8 = vld [vmem:[#allocation33_spill] sm:$0xff]  ;;  %v6885_v9 = vld [vmem:[#allocation34_spill] sm:$0xff] }
 0x249   :  { %1576 = vmatpush.msrb.mxu2 %v5002_v10  ;;  %1596 = vmatpush.msrb.mxu3 %v6879_v63  ;;  %v1010_v10 = vld [vmem:[#allocation2] sm:$0xc0] }
 0x24a   :  { %1537 = vmatpush.msrb.mxu0 %v6880_v1  ;;  %1557 = vmatpush.msrb.mxu1 %v5012_v12 }
 0x24b   :  { %1577 = vmatpush.msrb.mxu2 %v5014_v13  ;;  %1597 = vmatpush.msrb.mxu3 %v5018_v14  ;;  %v1011_v13 = vld [vmem:[#allocation2 + $0x8] sm:$0xc0] }
 0x24c   :  { %1538 = vmatpush.msrb.mxu0 %v5022_v15  ;;  %1558 = vmatpush.msrb.mxu1 %v6881_v5 }
 0x24d   :  { %1578 = vmatpush.msrb.mxu2 %v5026_v17  ;;  %1598 = vmatpush.msrb.mxu3 %v5030_v19 }
 0x24e   :  { %1539 = vmatpush.msrb.mxu0 %v6882_v6  ;;  %1559 = vmatpush.msrb.mxu1 %v6883_v7 }
 0x24f   :  { %1579 = vmatpush.msrb.mxu2 %v6884_v8  ;;  %1599 = vmatpush.msrb.mxu3 %v6885_v9 }
 0x250   :  { %1540 = vmatpush.msrb.mxu0 %v5046_v24  ;;  %1560 = vmatpush.msrb.mxu1 %v5048_v25 }
 0x251   :  { %1580 = vmatpush.msrb.mxu2 %v5050_v26  ;;  %1600 = vmatpush.msrb.mxu3 %v5054_v28  ;;  %v1012_v28 = vld [vmem:[#allocation2 + $0x10] sm:$0xc0] }
 0x252   :  { %1541 = vmatpush.msrb.mxu0 %v5060_v29  ;;  %1561 = vmatpush.msrb.mxu1 %v5062_v30 }
 0x253   :  { %1581 = vmatpush.msrb.mxu2 %v5064_v31  ;;  %1601 = vmatpush.msrb.mxu3 %v5068_v36 }
 0x254   :  { %1542 = vmatpush.msrb.mxu0 %v5074_v39  ;;  %1562 = vmatpush.msrb.mxu1 %v5076_v40 }
 0x255   :  { %1582 = vmatpush.msrb.mxu2 %v5078_v41  ;;  %1602 = vmatpush.msrb.mxu3 %v5082_v42 }
 0x256   :  { %1543 = vmatpush.msrb.mxu0 %v5086_v45  ;;  %1563 = vmatpush.msrb.mxu1 %v5088_v46 }
 0x257   :  { %1583 = vmatpush.msrb.mxu2 %v5090_v47  ;;  %1603 = vmatpush.msrb.mxu3 %v5094_v48  ;;  %v232_v47 = vld [vmem:[%s231_s23] ss:$8 sm:$0xf]  ;;  %v1013_v48 = vld [vmem:[#allocation2 + $0x18] sm:$0xc0]  ;;  %s282_s23 = sadd.s32 %s3988_s0, %s279_s20  ;;  %s3783_s20 = sshll.u32 %s6664_s10, 4  ;;  %s3784_s20 = int_to_ptr.hbm [resolvable:$true] %s3783_s20 }
 0x258   :  { %1544 = vmatpush.msrb.mxu0 %v5098_v54  ;;  %1564 = vmatpush.msrb.mxu1 %v5100_v56  ;;  %234 = vst.msk [vmem:[#allocation2 + $0x20] ss:$8 sm:$0xf] %vm4741_vm0, %v232_v47  ;;  %s283_s3 = scalar_lea.vmem [#allocation8], %s282_s23 }
 0x259   :  { %1584 = vmatpush.msrb.mxu2 %v5104_v58  ;;  %1604 = vmatpush.msrb.mxu3 %v5106_v55  ;;  %v245_v58 = vld [vmem:[%s244_s24] ss:$8 sm:$0xf]  ;;  %s295_s24 = sadd.s32 %s3989_s22, %s292_s21 }
 0x25a   :  { %1545 = vmatpush.msrb.mxu0 %v5108_v59  ;;  %1565 = vmatpush.msrb.mxu1 %v5113_v61  ;;  %247 = vst.msk [vmem:[#allocation2 + $0x21] ss:$8 sm:$0xf] %vm4741_vm0, %v245_v58  ;;  %s296_s25 = scalar_lea.vmem [#allocation8], %s295_s24 }
 0x25b   :  { %1585 = vmatpush.msrb.mxu2 %v5115_v62  ;;  %1605 = vmatpush.msrb.mxu3 %v5117_v32 }
 0x25c   :  { %1546 = vmatpush.msrb.mxu0 %v6866_v50  ;;  %1566 = vmatpush.msrb.mxu1 %v6867_v33 }
 0x25d   :  { %1586 = vmatpush.msrb.mxu2 %v6868_v44  ;;  %1606 = vmatpush.msrb.mxu3 %v6869_v37 }
 0x25e   :  { %1547 = vmatpush.msrb.mxu0 %v6870_v38  ;;  %1567 = vmatpush.msrb.mxu1 %v6871_v43  ;;  %v1236_v38 = vrot.slane %v5239_v3, 6 }
 0x25f   :  { %1587 = vmatpush.msrb.mxu2 %v6872_v60  ;;  %1607 = vmatpush.msrb.mxu3 %v6873_v4 }
 0x260   :  { %1548 = vmatpush.msrb.mxu0 %v5145_v51  ;;  %1568 = vmatpush.msrb.mxu1 %v5147_v52 }
 0x261   :  { %1588 = vmatpush.msrb.mxu2 %v5152_v53  ;;  %1608 = vmatpush.msrb.mxu3 %v5154_v49 }
 0x262   :  { %1549 = vmatpush.msrb.mxu0 %v5158_v34  ;;  %1569 = vmatpush.msrb.mxu1 %v6874_v18 }
 0x263   :  { %1589 = vmatpush.msrb.mxu2 %v6875_v11  ;;  %1609 = vmatpush.msrb.mxu3 %v5168_v35 }
 0x2bf   :  { %v1098_v12 = vpop.f32.mrf.mxu0  ;;  %v1118_v14 = vpop.f32.mrf.mxu1 }
 0x2c0   :  { %v1165_v15 = vrot.slane %v1098_v12, 2  ;;  %v1166_v17 = vrot.slane %v1118_v14, 2  ;;  %v1245_v14 = vld [vmem:[#allocation2 + $0x28] sm:$0x3] }
 0x2c2   :  { %v1173_v19 = vadd.f32 %v1165_v15, %v1010_v10  ;;  %v1174_v24 = vadd.f32 %v1166_v17, %v1011_v13  ;;  %v1244_v13 = vld [vmem:[#allocation2 + $0x20] sm:$0x3] }
 0x2c4   :  { %v3935_v25 = vmul.f32 -1.442695, %v1173_v19  ;;  %v3936_v26 = vmul.f32 -1.442695, %v1174_v24 }
 0x2c6   :  { %4052 = vpow2.f32 %v3935_v25  ;;  %v1138_v29 = vpop.f32.mrf.mxu2  ;;  %v1158_v45 = vpop.f32.mrf.mxu3 }
 0x2c7   :  { %4054 = vpow2.f32 %v3936_v26  ;;  %v1167_v30 = vrot.slane %v1138_v29, 2  ;;  %v1168_v46 = vrot.slane %v1158_v45, 2  ;;  %v271_v45 = vld [vmem:[%s270_s16] ss:$8 sm:$0xf]  ;;  %s5676_s16 = sadd.s32 %s3991_s14, %s318_s13 }
 0x2c8   :  { %273 = vst.msk [vmem:[#allocation2 + $0x23] ss:$8 sm:$0xf] %vm4741_vm0, %v271_v45  ;;  %v5416_v45 = vld [vmem:[#allocation9 + $0x140] sm:$0xff]  ;;  %s322_s17 = scalar_lea.vmem [#allocation8], %s5676_s16  ;;  %s3806_s16 = sshll.u32 %s6666_s12, 4  ;;  %s3807_s16 = int_to_ptr.hbm [resolvable:$true] %s3806_s16 }
 0x2c9   :  { %v1175_v31 = vadd.f32 %v1167_v30, %v1012_v28  ;;  %v1176_v61 = vadd.f32 %v1168_v46, %v1013_v48  ;;  %v1246_v28 = vld [vmem:[#allocation2 + $0x30] sm:$0x3]  ;;  %v1247_v46 = vld [vmem:[#allocation2 + $0x38] sm:$0x3] }
 0x2cb   :  { %v3937_v36 = vmul.f32 -1.442695, %v1175_v31 }
 0x2cc   :  { %v4053_v39 = vpop.eup %4052 }
 0x2cd   :  { %v4055_v40 = vpop.eup %4054  ;;  %v1186_v41 = vadd.f32 1.0, %v4053_v39  ;;  %4056 = vpow2.f32 %v3937_v36 }
 0x2ce   :  { %v1187_v42 = vadd.f32 1.0, %v4055_v40 }
 0x2cf   :  { %4058 = vrcp.f32 %v1186_v41  ;;  %v1200_v52 = vand.u32 2147483648, %v1186_v41  ;;  %v1198_v22 = vand.u32 2147483647, %v1186_v41  ;;  %vm1194_vm9 = vweird.f32 %v1186_v41 }
 0x2d0   :  { %4060 = vrcp.f32 %v1187_v42  ;;  %v1215_v53 = vand.u32 2147483648, %v1187_v42  ;;  %v1213_v50 = vand.u32 2147483647, %v1187_v42  ;;  %vm1209_vm10 = vweird.f32 %v1187_v42 }
 0x2d1   :  { %v1201_v27 = vor.u32 1.1754944e-38, %v1200_v52  ;;  %vm1199_vm13 = vcmp.eq.f32.partialorder %v1198_v22, 8.507059e+37 }
 0x2d2   :  { %v1216_v43 = vor.u32 1.1754944e-38, %v1215_v53  ;;  %vm1214_vm14 = vcmp.eq.f32.partialorder %v1213_v50, 8.507059e+37 }
 0x2d3   :  { %v4057_v56 = vpop.eup %4056 }
 0x2d4   :  { %v1188_v55 = vadd.f32 1.0, %v4057_v56 }
 0x2d5   :  { %v4059_v59 = vpop.eup %4058 }
 0x2d6   :  { %v4061_v62 = vpop.eup %4060  ;;  %v1190_v32 = vmul.f32 %v4059_v59, %v1186_v41  ;;  %4062 = vrcp.f32 %v1188_v55  ;;  %vm1195_vm7 = vweird.f32 %v4059_v59  ;;  %v1230_v3 = vand.u32 2147483648, %v1188_v55 }
 0x2d7   :  { %v1205_v34 = vmul.f32 %v4061_v62, %v1187_v42  ;;  %4064 = vtanh.f32 %v1176_v61  ;;  %vm1210_vm8 = vweird.f32 %v4061_v62  ;;  %vm1196_vm11 = vmor %vm1194_vm9, %vm1195_vm7  ;;  %vm1224_vm1 = vweird.f32 %v1188_v55  ;;  %v258_v42 = vld [vmem:[%s257_s15] ss:$8 sm:$0xf]  ;;  %s5672_s15 = sadd.s32 %s3990_s29, %s305_s28  ;;  %s4524_s28 = smov 2  }
 0x2d8   :  { %v1191_v35 = vsub.f32 1.0, %v1190_v32  ;;  %vm1211_vm12 = vmor %vm1209_vm10, %vm1210_vm8  ;;  %v1228_v5 = vand.u32 2147483647, %v1188_v55  ;;  %v1231_v7 = vor.u32 1.1754944e-38, %v1230_v3  ;;  %s309_s4 = scalar_lea.vmem [#allocation8], %s5672_s15  ;;  %s4525_s29 = smov [#allocation17]  }
 0x2d9   :  { %v1206_v51 = vsub.f32 1.0, %v1205_v34  ;;  %260 = vst.msk [vmem:[#allocation2 + $0x22] ss:$8 sm:$0xf] %vm4741_vm0, %v258_v42  ;;  %v5412_v42 = vld [vmem:[#allocation9 + $0x178] sm:$0xff]  ;;  %s3804_s13 = sshll.u32 %s4525_s29, 4  ;;  %s3805_s13 = int_to_ptr.vmem [resolvable:$true] %s3804_s13 }
 0x2da   :  { %v1192_v49 = vmul.f32 %v4059_v59, %v1191_v35  ;;  %vm1229_vm3 = vcmp.eq.f32.partialorder %v1228_v5, 8.507059e+37 }
 0x2db   :  { %v1207_v23 = vmul.f32 %v4061_v62, %v1206_v51 }
 0x2dc   :  { %v4063_v33 = vpop.eup %4062  ;;  %v1193_v44 = vadd.f32 %v4059_v59, %v1192_v49 }
 0x2dd   :  { %v1220_v37 = vmul.f32 %v4063_v33, %v1188_v55  ;;  %v1208_v0 = vadd.f32 %v4061_v62, %v1207_v23  ;;  %v4065_v60 = vpop.eup %4064  ;;  %vm1225_vm15 = vweird.f32 %v4063_v33 }
 0x2de   :  { %v1197_v2 = vsel %vm1196_vm11, %v4059_v59, %v1193_v44  ;;  %vm1226_vm2 = vmor %vm1224_vm1, %vm1225_vm15 }
 0x2df   :  { %v1221_v4 = vsub.f32 1.0, %v1220_v37  ;;  %v1202_v57 = vsel %vm1199_vm13, %v1201_v27, %v1197_v2  ;;  %v1212_v18 = vsel %vm1211_vm12, %v4061_v62, %v1208_v0 }
 0x2e0   :  { %v1217_v11 = vsel %vm1214_vm14, %v1216_v43, %v1212_v18  ;;  %v1239_v16 = vmul.f32 %v4065_v60, %v1202_v57 }
 0x2e1   :  { %v1238_v20 = vmul.f32 %v1236_v38, %v1217_v11  ;;  %v1222_v21 = vmul.f32 %v4063_v33, %v1221_v4 }
 0x2e3   :  { %v5345_v63 = vadd.f32 %v1239_v16, %v1238_v20  ;;  %v1223_v1 = vadd.f32 %v4063_v33, %v1222_v21 }
 0x2e5   :  { %4066 = vtanh.f32 %v5345_v63  ;;  %v1227_v6 = vsel %vm1226_vm2, %v4063_v33, %v1223_v1  ;;  %v1458_v38 = vrot.slane %v5345_v63, 6 }
 0x2e6   :  { %v1232_v9 = vsel %vm1229_vm3, %v1231_v7, %v1227_v6 }
 0x2eb   :  { %v4067_v8 = vpop.eup %4066 }
 0x2ec   :  { %v1242_v10 = vmul.f32 %v4067_v8, %v1232_v9  ;;  %v5356_v9 = vld [vmem:[#allocation9 + $0x1e0] sm:$0xff] }
 0x2ee   :  { %1243 = vst [vmem:[#allocation3] sm:$0xc0] %v1242_v10  ;;  %v1313_v12 = vrot.slane %v1242_v10, 6  ;;  %v5358_v10 = vld [vmem:[#allocation9 + $0x1e8] sm:$0xff] }
 0x2f0   :  { %1331 = vmatmul.f32.vlgmr.msra.gmra.mxu0 %v1313_v12  ;;  %1351 = vmatmul.f32.vlgmr.msra.gmra.mxu1 %v1313_v12 }
 0x2f1   :  { %1371 = vmatmul.f32.vlgmr.msra.gmra.mxu2 %v1313_v12  ;;  %1391 = vmatmul.f32.vlgmr.msra.gmra.mxu3 %v1313_v12  ;;  %v5360_v12 = vld [vmem:[#allocation9 + $0x1f0] sm:$0xff] }
 0x2f2   :  { %1768 = vmatpush.msra.mxu0 %v5356_v9  ;;  %1788 = vmatpush.msra.mxu1 %v5358_v10 }
 0x2f3   :  { %1808 = vmatpush.msra.mxu2 %v5360_v12 }
 0x36d   :  { %v1332_v15 = vpop.f32.mrf.mxu0  ;;  %v1352_v17 = vpop.f32.mrf.mxu1 }
 0x36e   :  { %v1395_v19 = vadd.f32 %v1332_v15, %v1244_v13  ;;  %v1396_v24 = vadd.f32 %v1352_v17, %v1245_v14  ;;  %v5364_v13 = vld [vmem:[#allocation9 + $0x1f8] sm:$0xff]  ;;  %v5368_v14 = vld [vmem:[#allocation9 + $0x1c0] sm:$0xff]  ;;  %v5370_v15 = vld [vmem:[#allocation9 + $0x1c8] sm:$0xff] }
 0x36f   :  { %1828 = vmatpush.msra.mxu3 %v5364_v13  ;;  %v5372_v17 = vld [vmem:[#allocation9 + $0x1d0] sm:$0xff]  ;;  %1769 = vmatpush.msra.mxu0 %v5368_v14 }
 0x370   :  { %v3938_v25 = vmul.f32 -1.442695, %v1395_v19  ;;  %v3939_v26 = vmul.f32 -1.442695, %v1396_v24  ;;  %1789 = vmatpush.msra.mxu1 %v5370_v15  ;;  %v5376_v19 = vld [vmem:[#allocation9 + $0x1d8] sm:$0xff]  ;;  %1809 = vmatpush.msra.mxu2 %v5372_v17  ;;  %v5380_v24 = vld [vmem:[#allocation9 + $0x1a0] sm:$0xff] }
 0x371   :  { %1829 = vmatpush.msra.mxu3 %v5376_v19  ;;  %1770 = vmatpush.msra.mxu0 %v5380_v24 }
 0x372   :  { %4068 = vpow2.f32 %v3938_v25  ;;  %v5382_v25 = vld [vmem:[#allocation9 + $0x1a8] sm:$0xff] }
 0x373   :  { %4070 = vpow2.f32 %v3939_v26  ;;  %v5384_v26 = vld [vmem:[#allocation9 + $0x1b0] sm:$0xff]  ;;  %1790 = vmatpush.msra.mxu1 %v5382_v25 }
 0x374   :  { %v1372_v29 = vpop.f32.mrf.mxu2  ;;  %v1392_v47 = vpop.f32.mrf.mxu3  ;;  %1810 = vmatpush.msra.mxu2 %v5384_v26 }
 0x375   :  { %v1397_v30 = vadd.f32 %v1372_v29, %v1246_v28  ;;  %v1398_v55 = vadd.f32 %v1392_v47, %v1247_v46  ;;  %v5388_v28 = vld [vmem:[#allocation9 + $0x1b8] sm:$0xff]  ;;  %v5392_v29 = vld [vmem:[#allocation9 + $0x180] sm:$0xff]  ;;  %v5418_v46 = vld [vmem:[#allocation9 + $0x148] sm:$0xff] }
 0x376   :  { %1830 = vmatpush.msra.mxu3 %v5388_v28  ;;  %1771 = vmatpush.msra.mxu0 %v5392_v29  ;;  %v5420_v47 = vld [vmem:[#allocation9 + $0x150] sm:$0xff] }
 0x377   :  { %v3940_v31 = vmul.f32 -1.442695, %v1397_v30  ;;  %v5394_v30 = vld [vmem:[#allocation9 + $0x188] sm:$0xff] }
 0x378   :  { %v4069_v36 = vpop.eup %4068  ;;  %1791 = vmatpush.msra.mxu1 %v5394_v30 }
 0x379   :  { %v4071_v39 = vpop.eup %4070  ;;  %v1408_v40 = vadd.f32 1.0, %v4069_v36  ;;  %4072 = vpow2.f32 %v3940_v31  ;;  %v5396_v31 = vld [vmem:[#allocation9 + $0x190] sm:$0xff]  ;;  %v5400_v36 = vld [vmem:[#allocation9 + $0x198] sm:$0xff] }
 0x37a   :  { %v1409_v41 = vadd.f32 1.0, %v4071_v39  ;;  %1811 = vmatpush.msra.mxu2 %v5396_v31  ;;  %1831 = vmatpush.msra.mxu3 %v5400_v36  ;;  %v5404_v39 = vld [vmem:[#allocation9 + $0x160] sm:$0xff] }
 0x37b   :  { %4074 = vrcp.f32 %v1408_v40  ;;  %v1422_v35 = vand.u32 2147483648, %v1408_v40  ;;  %v1420_v53 = vand.u32 2147483647, %v1408_v40  ;;  %vm1416_vm6 = vweird.f32 %v1408_v40  ;;  %1772 = vmatpush.msra.mxu0 %v5404_v39 }
 0x37c   :  { %4076 = vrcp.f32 %v1409_v41  ;;  %v1437_v51 = vand.u32 2147483648, %v1409_v41  ;;  %v1435_v22 = vand.u32 2147483647, %v1409_v41  ;;  %vm1431_vm7 = vweird.f32 %v1409_v41  ;;  %1832 = vmatpush.msra.mxu3 %v5412_v42 }
 0x37d   :  { %v1423_v44 = vor.u32 1.1754944e-38, %v1422_v35  ;;  %vm1421_vm10 = vcmp.eq.f32.partialorder %v1420_v53, 8.507059e+37  ;;  %1773 = vmatpush.msra.mxu0 %v5416_v45  ;;  %v5450_v53 = vld [vmem:[#allocation9 + $0x118] sm:$0xff] }
 0x37e   :  { %v1438_v27 = vor.u32 1.1754944e-38, %v1437_v51  ;;  %vm1436_vm11 = vcmp.eq.f32.partialorder %v1435_v22, 8.507059e+37  ;;  %v1467_v51 = vld [vmem:[#allocation2 + $0x28] sm:$0xc] }
 0x37f   :  { %v4073_v48 = vpop.eup %4072 }
 0x380   :  { %v1410_v56 = vadd.f32 1.0, %v4073_v48  ;;  %v5424_v48 = vld [vmem:[#allocation9 + $0x158] sm:$0xff] }
 0x381   :  { %v4075_v58 = vpop.eup %4074  ;;  %1833 = vmatpush.msra.mxu3 %v5424_v48 }
 0x382   :  { %v4077_v59 = vpop.eup %4076  ;;  %v1412_v61 = vmul.f32 %v4075_v58, %v1408_v40  ;;  %4078 = vrcp.f32 %v1410_v56  ;;  %vm1417_vm4 = vweird.f32 %v4075_v58  ;;  %v1452_v1 = vand.u32 2147483648, %v1410_v56  ;;  %v5406_v40 = vld [vmem:[#allocation9 + $0x168] sm:$0xff] }
 0x383   :  { %v1427_v62 = vmul.f32 %v4077_v59, %v1409_v41  ;;  %4080 = vtanh.f32 %v1398_v55  ;;  %vm1432_vm5 = vweird.f32 %v4077_v59  ;;  %vm1418_vm8 = vmor %vm1416_vm6, %vm1417_vm4  ;;  %vm1446_vm13 = vweird.f32 %v1410_v56  ;;  %v5408_v41 = vld [vmem:[#allocation9 + $0x170] sm:$0xff]  ;;  %1792 = vmatpush.msra.mxu1 %v5406_v40 }
 0x384   :  { %v1413_v32 = vsub.f32 1.0, %v1412_v61  ;;  %vm1433_vm9 = vmor %vm1431_vm7, %vm1432_vm5  ;;  %v1450_v3 = vand.u32 2147483647, %v1410_v56  ;;  %v1453_v5 = vor.u32 1.1754944e-38, %v1452_v1  ;;  %1812 = vmatpush.msra.mxu2 %v5408_v41  ;;  %v5432_v55 = vld [vmem:[#allocation9 + $0x130] sm:$0xff]  ;;  %v5436_v61 = vld [vmem:[#allocation9 + $0x138] sm:$0xff] }
 0x385   :  { %v1428_v34 = vsub.f32 1.0, %v1427_v62  ;;  %1793 = vmatpush.msra.mxu1 %v5418_v46  ;;  %1834 = vmatpush.msra.mxu3 %v5436_v61  ;;  %v5442_v62 = vld [vmem:[#allocation9 + $0x100] sm:$0xff] }
 0x386   :  { %v1414_v52 = vmul.f32 %v4075_v58, %v1413_v32  ;;  %vm1451_vm15 = vcmp.eq.f32.partialorder %v1450_v3, 8.507059e+37  ;;  %1813 = vmatpush.msra.mxu2 %v5420_v47  ;;  %v5444_v32 = vld [vmem:[#allocation9 + $0x108] sm:$0xff]  ;;  %v5490_v1 = vld [vmem:[#allocation9 + $0x80] sm:$0xff] }
 0x387   :  { %v1429_v49 = vmul.f32 %v4077_v59, %v1428_v34  ;;  %v5446_v34 = vld [vmem:[#allocation9 + $0x110] sm:$0xff]  ;;  %1835 = vmatpush.msra.mxu3 %v5450_v53 }
 0x388   :  { %v4079_v23 = vpop.eup %4078  ;;  %v1415_v50 = vadd.f32 %v4075_v58, %v1414_v52  ;;  %1814 = vmatpush.msra.mxu2 %v5432_v55 }
 0x389   :  { %v1442_v33 = vmul.f32 %v4079_v23, %v1410_v56  ;;  %v1430_v37 = vadd.f32 %v4077_v59, %v1429_v49  ;;  %v4081_v43 = vpop.eup %4080  ;;  %vm1447_vm12 = vweird.f32 %v4079_v23  ;;  %v5428_v56 = vld [vmem:[#allocation9 + $0x120] sm:$0xff] }
 0x38a   :  { %v1419_v0 = vsel %vm1418_vm8, %v4075_v58, %v1415_v50  ;;  %vm1448_vm14 = vmor %vm1446_vm13, %vm1447_vm12  ;;  %v5430_v58 = vld [vmem:[#allocation9 + $0x128] sm:$0xff]  ;;  %1774 = vmatpush.msra.mxu0 %v5428_v56  ;;  %1815 = vmatpush.msra.mxu2 %v5446_v34 }
 0x38b   :  { %v1443_v2 = vsub.f32 1.0, %v1442_v33  ;;  %v1424_v60 = vsel %vm1421_vm10, %v1423_v44, %v1419_v0  ;;  %v1434_v4 = vsel %vm1433_vm9, %v4077_v59, %v1430_v37  ;;  %v1466_v59 = vld [vmem:[#allocation2 + $0x20] sm:$0xc]  ;;  %1794 = vmatpush.msra.mxu1 %v5430_v58  ;;  %v5458_v50 = vld [vmem:[#allocation9 + $0xe8] sm:$0xff]  ;;  %v5464_v44 = vld [vmem:[#allocation9 + $0xf8] sm:$0xff] }
 0x38c   :  { %v1439_v57 = vsel %vm1436_vm11, %v1438_v27, %v1434_v4  ;;  %v1461_v18 = vmul.f32 %v4081_v43, %v1424_v60  ;;  %1775 = vmatpush.msra.mxu0 %v5442_v62  ;;  %v5460_v33 = vld [vmem:[#allocation9 + $0xf0] sm:$0xff]  ;;  %1836 = vmatpush.msra.mxu3 %v5464_v44  ;;  %v5468_v0 = vld [vmem:[#allocation9 + $0xc0] sm:$0xff] }
 0x38d   :  { %v1444_v11 = vmul.f32 %v4079_v23, %v1443_v2  ;;  %v1460_v16 = vmul.f32 %v1458_v38, %v1439_v57  ;;  %1795 = vmatpush.msra.mxu1 %v5444_v32  ;;  %1816 = vmatpush.msra.mxu2 %v5460_v33  ;;  %v5470_v38 = vld [vmem:[#allocation9 + $0xc8] sm:$0xff]  ;;  %v5472_v43 = vld [vmem:[#allocation9 + $0xd0] sm:$0xff]  ;;  %v5476_v2 = vld [vmem:[#allocation9 + $0xd8] sm:$0xff] }
 0x38e   :  { %v1468_v57 = vld [vmem:[#allocation2 + $0x30] sm:$0xc]  ;;  %1837 = vmatpush.msra.mxu3 %v5476_v2 }
 0x38f   :  { %v5353_v20 = vadd.f32 %v1461_v18, %v1460_v16  ;;  %v1445_v21 = vadd.f32 %v4079_v23, %v1444_v11  ;;  %1796 = vmatpush.msra.mxu1 %v5458_v50  ;;  %1817 = vmatpush.msra.mxu2 %v5472_v43  ;;  %v5480_v18 = vld [vmem:[#allocation9 + $0xa0] sm:$0xff]  ;;  %v5482_v11 = vld [vmem:[#allocation9 + $0xa8] sm:$0xff]  ;;  %v5486_v16 = vld [vmem:[#allocation9 + $0xb0] sm:$0xff] }
 0x391   :  { %4082 = vtanh.f32 %v5353_v20  ;;  %v1449_v63 = vsel %vm1448_vm14, %v4079_v23, %v1445_v21  ;;  %v5456_v23 = vld [vmem:[#allocation9 + $0xe0] sm:$0xff]  ;;  %1797 = vmatpush.msra.mxu1 %v5470_v38  ;;  %v5488_v21 = vld [vmem:[#allocation9 + $0xb8] sm:$0xff]  ;;  %1818 = vmatpush.msra.mxu2 %v5486_v16 }
 0x392   :  { %v1454_v7 = vsel %vm1451_vm15, %v1453_v5, %v1449_v63  ;;  %1776 = vmatpush.msra.mxu0 %v5456_v23  ;;  %1838 = vmatpush.msra.mxu3 %v5488_v21  ;;  %v5495_v63 = vld [vmem:[#allocation9 + $0x88] sm:$0xff]  ;;  %v5497_v5 = vld [vmem:[#allocation9 + $0x90] sm:$0xff] }
 0x393   :  { %1798 = vmatpush.msra.mxu1 %v5482_v11  ;;  %1819 = vmatpush.msra.mxu2 %v5497_v5 }
 0x394   :  { %1777 = vmatpush.msra.mxu0 %v5468_v0 }
 0x395   :  { %1799 = vmatpush.msra.mxu1 %v5495_v63 }
 0x396   :  { %1778 = vmatpush.msra.mxu0 %v5480_v18 }
 0x397   :  { %v4083_v6 = vpop.eup %4082 }
 0x398   :  { %v1464_v8 = vmul.f32 %v4083_v6, %v1454_v7  ;;  %v5499_v6 = vld [vmem:[#allocation9 + $0x98] sm:$0xff]  ;;  %1779 = vmatpush.msra.mxu0 %v5490_v1 }
 0x399   :  { %1839 = vmatpush.msra.mxu3 %v5499_v6 }
 0x39a   :  { %1465 = vst [vmem:[#allocation3 + $0x8] sm:$0x3] %v1464_v8  ;;  %1550 = vmatmul.f32.vlgmr.msrb.gmra.mxu0 %v1464_v8  ;;  %1570 = vmatmul.f32.vlgmr.msrb.gmra.mxu1 %v1464_v8 }
 0x39b   :  { %1590 = vmatmul.f32.vlgmr.msrb.gmra.mxu2 %v1464_v8  ;;  %1610 = vmatmul.f32.vlgmr.msrb.gmra.mxu3 %v1464_v8  ;;  %v5503_v8 = vld [vmem:[#allocation9 + $0x60] sm:$0xff] }
 0x39c   :  { %6887 = vst [vmem:[#allocation35_spill] sm:$0xff] %v5503_v8  ;;  %1780 = vmatpush.msra.mxu0 %v5503_v8 }
 0x417   :  { %v1551_v35 = vpop.f32.mrf.mxu0  ;;  %v1571_v52 = vpop.f32.mrf.mxu1 }
 0x418   :  { %v1618_v49 = vrot.slane %v1551_v35, 6  ;;  %v1619_v22 = vrot.slane %v1571_v52, 6  ;;  %v5507_v35 = vld [vmem:[#allocation9 + $0x70] sm:$0xff]  ;;  %v5514_v52 = vld [vmem:[#allocation9 + $0x40] sm:$0xff] }
 0x419   :  { %6889 = vst [vmem:[#allocation37_spill] sm:$0xff] %v5507_v35  ;;  %1820 = vmatpush.msra.mxu2 %v5507_v35  ;;  %1781 = vmatpush.msra.mxu0 %v5514_v52  ;;  %v5542_v35 = vld [vmem:[#allocation9 + $0x8] sm:$0xff] }
 0x41a   :  { %v1626_v37 = vadd.f32 %v1618_v49, %v1466_v59  ;;  %v1627_v27 = vadd.f32 %v1619_v22, %v1467_v51  ;;  %v5505_v59 = vld [vmem:[#allocation9 + $0x68] sm:$0xff]  ;;  %v5512_v51 = vld [vmem:[#allocation9 + $0x78] sm:$0xff]  ;;  %6891 = vst [vmem:[#allocation39_spill] sm:$0xff] %v5514_v52 }
 0x41b   :  { %6888 = vst [vmem:[#allocation36_spill] sm:$0xff] %v5505_v59  ;;  %v5516_v49 = vld [vmem:[#allocation9 + $0x48] sm:$0xff]  ;;  %1800 = vmatpush.msra.mxu1 %v5505_v59  ;;  %1840 = vmatpush.msra.mxu3 %v5512_v51  ;;  %v5550_v52 = vld [vmem:[#allocation9 + $0x18] sm:$0xff] }
 0x41c   :  { %v3941_v60 = vmul.f32 -1.442695, %v1626_v37  ;;  %v3942_v4 = vmul.f32 -1.442695, %v1627_v27  ;;  %6890 = vst [vmem:[#allocation38_spill] sm:$0xff] %v5512_v51  ;;  %v5521_v37 = vld [vmem:[#allocation9 + $0x50] sm:$0xff] }
 0x41d   :  { %6892 = vst [vmem:[#allocation40_spill] sm:$0xff] %v5516_v49  ;;  %v5523_v27 = vld [vmem:[#allocation9 + $0x58] sm:$0xff]  ;;  %1801 = vmatpush.msra.mxu1 %v5516_v49  ;;  %1821 = vmatpush.msra.mxu2 %v5521_v37  ;;  %v5540_v51 = vld [vmem:[#allocation9] sm:$0xff]  ;;  %v5548_v49 = vld [vmem:[#allocation9 + $0x10] sm:$0xff] }
 0x41e   :  { %4084 = vpow2.f32 %v3941_v60  ;;  %v1591_v3 = vpop.f32.mrf.mxu2  ;;  %6893 = vst [vmem:[#allocation41_spill] sm:$0xff] %v5521_v37  ;;  %v5527_v60 = vld [vmem:[#allocation9 + $0x20] sm:$0xff]  ;;  %1841 = vmatpush.msra.mxu3 %v5523_v27 }
 0x41f   :  { %4086 = vpow2.f32 %v3942_v4  ;;  %v1620_v7 = vrot.slane %v1591_v3, 6  ;;  %6894 = vst [vmem:[#allocation42_spill] sm:$0xff] %v5523_v27  ;;  %v5529_v4 = vld [vmem:[#allocation9 + $0x28] sm:$0xff]  ;;  %1782 = vmatpush.msra.mxu0 %v5527_v60  ;;  %v1611_v27 = vpop.f32.mrf.mxu3 }
 0x420   :  { %6895 = vst [vmem:[#allocation43_spill] sm:$0xff] %v5542_v35  ;;  %1802 = vmatpush.msra.mxu1 %v5529_v4 }
 0x421   :  { %v1628_v22 = vadd.f32 %v1620_v7, %v1468_v57  ;;  %v5534_v57 = vld [vmem:[#allocation9 + $0x30] sm:$0xff]  ;;  %v5536_v7 = vld [vmem:[#allocation9 + $0x38] sm:$0xff]  ;;  %1783 = vmatpush.msra.mxu0 %v5540_v51 }
 0x422   :  { %1822 = vmatpush.msra.mxu2 %v5534_v57  ;;  %1842 = vmatpush.msra.mxu3 %v5536_v7 }
 0x423   :  { %v3943_v3 = vmul.f32 -1.442695, %v1628_v22  ;;  %1803 = vmatpush.msra.mxu1 %v5542_v35  ;;  %2002 = vmatpush.msrb.mxu0 %v5356_v9 }
 0x424   :  { %v4085_v59 = vpop.eup %4084  ;;  %1823 = vmatpush.msra.mxu2 %v5548_v49  ;;  %1843 = vmatpush.msra.mxu3 %v5550_v52 }
 0x425   :  { %v4087_v8 = vpop.eup %4086  ;;  %v5544_v22 = vadd.f32 1.0, %v4085_v59  ;;  %4088 = vpow2.f32 %v3943_v3  ;;  %v1621_v59 = vrot.slane %v1611_v27, 6  ;;  %2022 = vmatpush.msrb.mxu1 %v5358_v10  ;;  %v1469_v3 = vld [vmem:[#allocation2 + $0x38] sm:$0xc]  ;;  %2003 = vmatpush.msrb.mxu0 %v5368_v14 }
 0x426   :  { %v5552_v37 = vadd.f32 1.0, %v4087_v8  ;;  %v284_v8 = vld [vmem:[%s283_s3] ss:$8 sm:$0xf]  ;;  %2042 = vmatpush.msrb.mxu2 %v5360_v12  ;;  %2062 = vmatpush.msrb.mxu3 %v5364_v13 }
 0x427   :  { %4090 = vrcp.f32 %v5544_v22  ;;  %286 = vst.msk [vmem:[#allocation2 + $0x24] ss:$8 sm:$0xf] %vm4741_vm0, %v284_v8  ;;  %2023 = vmatpush.msrb.mxu1 %v5370_v15  ;;  %v297_v27 = vld [vmem:[%s296_s25] ss:$8 sm:$0xf]  ;;  %v1629_v12 = vadd.f32 %v1621_v59, %v1469_v3  ;;  %2004 = vmatpush.msrb.mxu0 %v5380_v24  ;;  %vm1647_vm3 = vweird.f32 %v5544_v22 }
 0x428   :  { %4092 = vrcp.f32 %v5552_v37  ;;  %2043 = vmatpush.msrb.mxu2 %v5372_v17  ;;  %2063 = vmatpush.msrb.mxu3 %v5376_v19  ;;  %299 = vst.msk [vmem:[#allocation2 + $0x25] ss:$8 sm:$0xf] %vm4741_vm0, %v297_v27  ;;  %v1653_v24 = vand.u32 2147483648, %v5544_v22  ;;  %vm1662_vm4 = vweird.f32 %v5552_v37  ;;  %v2221_v59 = vld [vmem:[#allocation11 + $0x1a0] sm:$0xff]  ;;  %v2223_v8 = vld [vmem:[#allocation11 + $0x1b0] sm:$0xff] }
 0x429   :  { %2024 = vmatpush.msrb.mxu1 %v5382_v25  ;;  %2005 = vmatpush.msrb.mxu0 %v5392_v29  ;;  %v1668_v25 = vand.u32 2147483648, %v5552_v37  ;;  %v2217_v3 = vld [vmem:[#allocation11 + $0x180] sm:$0xff]  ;;  %v2218_v27 = vld [vmem:[#allocation11 + $0x188] sm:$0xff] }
 0x42a   :  { %2044 = vmatpush.msrb.mxu2 %v5384_v26  ;;  %2064 = vmatpush.msrb.mxu3 %v5388_v28  ;;  %v1651_v28 = vand.u32 2147483647, %v5544_v22 }
 0x42b   :  { %v4089_v35 = vpop.eup %4088  ;;  %2025 = vmatpush.msrb.mxu1 %v5394_v30  ;;  %2006 = vmatpush.msrb.mxu0 %v5404_v39  ;;  %v1666_v30 = vand.u32 2147483647, %v5552_v37 }
 0x42c   :  { %v5570_v9 = vadd.f32 1.0, %v4089_v35  ;;  %2045 = vmatpush.msrb.mxu2 %v5396_v31  ;;  %2065 = vmatpush.msrb.mxu3 %v5400_v36  ;;  %vm1652_vm7 = vcmp.eq.f32.partialorder %v1651_v28, 8.507059e+37  ;;  %v2216_v28 = vld [vmem:[#allocation11 + $0x178] sm:$0xff] }
 0x42d   :  { %v4091_v10 = vpop.eup %4090  ;;  %2026 = vmatpush.msrb.mxu1 %v5406_v40  ;;  %2007 = vmatpush.msrb.mxu0 %v5416_v45  ;;  %v1654_v40 = vor.u32 1.1754944e-38, %v1653_v24  ;;  %v1669_v45 = vor.u32 1.1754944e-38, %v1668_v25  ;;  %vm1667_vm8 = vcmp.eq.f32.partialorder %v1666_v30, 8.507059e+37  ;;  %v2213_v24 = vld [vmem:[#allocation11 + $0x160] sm:$0xff]  ;;  %v2214_v25 = vld [vmem:[#allocation11 + $0x168] sm:$0xff] }
 0x42e   :  { %v4093_v13 = vpop.eup %4092  ;;  %v1643_v14 = vmul.f32 %v4091_v10, %v5544_v22  ;;  %4094 = vrcp.f32 %v5570_v9  ;;  %vm1648_vm1 = vweird.f32 %v4091_v10  ;;  %2046 = vmatpush.msrb.mxu2 %v5408_v41  ;;  %2066 = vmatpush.msrb.mxu3 %v5412_v42  ;;  %v1689_v42 = vrot.slane %v5353_v20, 6  ;;  %v2228_v22 = vld [vmem:[#allocation11 + $0x1d8] sm:$0xff] }
 0x42f   :  { %v1658_v15 = vmul.f32 %v4093_v13, %v5552_v37  ;;  %4096 = vtanh.f32 %v1629_v12  ;;  %vm1663_vm2 = vweird.f32 %v4093_v13  ;;  %2027 = vmatpush.msrb.mxu1 %v5418_v46  ;;  %vm1649_vm5 = vmor %vm1647_vm3, %vm1648_vm1  ;;  %2008 = vmatpush.msrb.mxu0 %v5428_v56  ;;  %vm1677_vm10 = vweird.f32 %v5570_v9 }
 0x430   :  { %v1644_v17 = vsub.f32 1.0, %v1643_v14  ;;  %2047 = vmatpush.msrb.mxu2 %v5420_v47  ;;  %2067 = vmatpush.msrb.mxu3 %v5424_v48  ;;  %vm1664_vm6 = vmor %vm1662_vm4, %vm1663_vm2 }
 0x431   :  { %v1659_v19 = vsub.f32 1.0, %v1658_v15  ;;  %2028 = vmatpush.msrb.mxu1 %v5430_v58  ;;  %2009 = vmatpush.msrb.mxu0 %v5442_v62  ;;  %v2220_v15 = vld [vmem:[#allocation11 + $0x198] sm:$0xff] }
 0x432   :  { %v1645_v26 = vmul.f32 %v4091_v10, %v1644_v17  ;;  %2048 = vmatpush.msrb.mxu2 %v5432_v55  ;;  %2068 = vmatpush.msrb.mxu3 %v5436_v61 }
 0x433   :  { %v1660_v29 = vmul.f32 %v4093_v13, %v1659_v19  ;;  %2029 = vmatpush.msrb.mxu1 %v5444_v32  ;;  %2010 = vmatpush.msrb.mxu0 %v5456_v23  ;;  %v1683_v32 = vand.u32 2147483648, %v5570_v9 }
 0x434   :  { %v5597_v31 = vpop.eup %4094  ;;  %v1646_v36 = vadd.f32 %v4091_v10, %v1645_v26  ;;  %2049 = vmatpush.msrb.mxu2 %v5446_v34  ;;  %2069 = vmatpush.msrb.mxu3 %v5450_v53  ;;  %v1681_v34 = vand.u32 2147483647, %v5570_v9  ;;  %v2215_v26 = vld [vmem:[#allocation11 + $0x170] sm:$0xff] }
 0x435   :  { %v1673_v39 = vmul.f32 %v5597_v31, %v5570_v9  ;;  %v1661_v41 = vadd.f32 %v4093_v13, %v1660_v29  ;;  %v4097_v47 = vpop.eup %4096  ;;  %2030 = vmatpush.msrb.mxu1 %v5458_v50  ;;  %2011 = vmatpush.msrb.mxu0 %v5468_v0  ;;  %vm1678_vm9 = vweird.f32 %v5597_v31  ;;  %v1684_v23 = vor.u32 1.1754944e-38, %v1683_v32  ;;  %v6896_v50 = vld [vmem:[#allocation35_spill] sm:$0xff]  ;;  %v6899_v0 = vld [vmem:[#allocation38_spill] sm:$0xff]  ;;  %v2219_v9 = vld [vmem:[#allocation11 + $0x190] sm:$0xff] }
 0x436   :  { %v1650_v46 = vsel %vm1649_vm5, %v4091_v10, %v1646_v36  ;;  %2050 = vmatpush.msrb.mxu2 %v5460_v33  ;;  %2070 = vmatpush.msrb.mxu3 %v5464_v44  ;;  %vm1679_vm11 = vmor %vm1677_vm10, %vm1678_vm9  ;;  %v6897_v33 = vld [vmem:[#allocation36_spill] sm:$0xff]  ;;  %vm1682_vm12 = vcmp.eq.f32.partialorder %v1681_v34, 8.507059e+37  ;;  %v6898_v44 = vld [vmem:[#allocation37_spill] sm:$0xff] }
 0x437   :  { %v1674_v48 = vsub.f32 1.0, %v1673_v39  ;;  %v1655_v35 = vsel %vm1652_vm7, %v1654_v40, %v1650_v46  ;;  %v1665_v37 = vsel %vm1664_vm6, %v4093_v13, %v1661_v41  ;;  %2031 = vmatpush.msrb.mxu1 %v5470_v38  ;;  %2012 = vmatpush.msrb.mxu0 %v5480_v18  ;;  %v6901_v18 = vld [vmem:[#allocation40_spill] sm:$0xff]  ;;  %v1697_v10 = vld [vmem:[#allocation2 + $0x20] sm:$0x30]  ;;  %v1698_v13 = vld [vmem:[#allocation2 + $0x28] sm:$0x30] }
 0x438   :  { %v1670_v56 = vsel %vm1667_vm8, %v1669_v45, %v1665_v37  ;;  %v1692_v20 = vmul.f32 %v4097_v47, %v1655_v35  ;;  %2051 = vmatpush.msrb.mxu2 %v5472_v43  ;;  %2071 = vmatpush.msrb.mxu3 %v5476_v2  ;;  %v6900_v2 = vld [vmem:[#allocation39_spill] sm:$0xff]  ;;  %v2211_v39 = vld [vmem:[#allocation11 + $0x150] sm:$0xff]  ;;  %v2212_v40 = vld [vmem:[#allocation11 + $0x158] sm:$0xff] }
 0x439   :  { %v1691_v58 = vmul.f32 %v1689_v42, %v1670_v56  ;;  %v1675_v55 = vmul.f32 %v5597_v31, %v1674_v48  ;;  %2032 = vmatpush.msrb.mxu1 %v5482_v11  ;;  %2013 = vmatpush.msrb.mxu0 %v5490_v1  ;;  %v2210_v36 = vld [vmem:[#allocation11 + $0x148] sm:$0xff]  ;;  %v1699_v45 = vld [vmem:[#allocation2 + $0x30] sm:$0x30]  ;;  %v2207_v48 = vld [vmem:[#allocation11 + $0x130] sm:$0xff] }
 0x43a   :  { %2052 = vmatpush.msrb.mxu2 %v5486_v16  ;;  %2072 = vmatpush.msrb.mxu3 %v5488_v21  ;;  %v6902_v16 = vld [vmem:[#allocation41_spill] sm:$0xff]  ;;  %v6903_v21 = vld [vmem:[#allocation42_spill] sm:$0xff]  ;;  %v2206_v47 = vld [vmem:[#allocation11 + $0x128] sm:$0xff] }
 0x43b   :  { %v5621_v61 = vadd.f32 %v1692_v20, %v1691_v58  ;;  %v1676_v62 = vadd.f32 %v5597_v31, %v1675_v55  ;;  %2033 = vmatpush.msrb.mxu1 %v5495_v63  ;;  %2014 = vmatpush.msrb.mxu0 %v6896_v50  ;;  %v6904_v63 = vld [vmem:[#allocation43_spill] sm:$0xff]  ;;  %v2208_v35 = vld [vmem:[#allocation11 + $0x138] sm:$0xff]  ;;  %v2203_v58 = vld [vmem:[#allocation11 + $0x110] sm:$0xff] }
 0x43c   :  { %2053 = vmatpush.msrb.mxu2 %v5497_v5  ;;  %2073 = vmatpush.msrb.mxu3 %v5499_v6  ;;  %v2229_v5 = vld [vmem:[#allocation11 + $0x1e0] sm:$0xff]  ;;  %v2230_v6 = vld [vmem:[#allocation11 + $0x1e8] sm:$0xff]  ;;  %v2204_v55 = vld [vmem:[#allocation11 + $0x118] sm:$0xff] }
 0x43d   :  { %4098 = vtanh.f32 %v5621_v61  ;;  %v1680_v53 = vsel %vm1679_vm11, %v5597_v31, %v1676_v62  ;;  %2034 = vmatpush.msrb.mxu1 %v6897_v33  ;;  %2015 = vmatpush.msrb.mxu0 %v6900_v2  ;;  %v2209_v31 = vld [vmem:[#allocation11 + $0x140] sm:$0xff]  ;;  %v2202_v20 = vld [vmem:[#allocation11 + $0x108] sm:$0xff] }
 0x43e   :  { %2054 = vmatpush.msrb.mxu2 %v6898_v44  ;;  %2074 = vmatpush.msrb.mxu3 %v6899_v0  ;;  %v1685_v43 = vsel %vm1682_vm12, %v1684_v23, %v1680_v53  ;;  %v2205_v46 = vld [vmem:[#allocation11 + $0x120] sm:$0xff]  ;;  %v2198_v34 = vld [vmem:[#allocation11 + $0xe8] sm:$0xff]  ;;  %v2199_v53 = vld [vmem:[#allocation11 + $0xf0] sm:$0xff] }
 0x43f   :  { %2035 = vmatpush.msrb.mxu1 %v6901_v18  ;;  %2016 = vmatpush.msrb.mxu0 %v5527_v60  ;;  %v2231_v60 = vld [vmem:[#allocation11 + $0x1f0] sm:$0xff]  ;;  %v2201_v37 = vld [vmem:[#allocation11 + $0x100] sm:$0xff]  ;;  %v2200_v23 = vld [vmem:[#allocation11 + $0xf8] sm:$0xff] }
 0x440   :  { %2055 = vmatpush.msrb.mxu2 %v6902_v16  ;;  %2075 = vmatpush.msrb.mxu3 %v6903_v21  ;;  %v2197_v32 = vld [vmem:[#allocation11 + $0xe0] sm:$0xff]  ;;  %v2194_v33 = vld [vmem:[#allocation11 + $0xc8] sm:$0xff]  ;;  %v2195_v0 = vld [vmem:[#allocation11 + $0xd0] sm:$0xff] }
 0x441   :  { %2036 = vmatpush.msrb.mxu1 %v5529_v4  ;;  %2017 = vmatpush.msrb.mxu0 %v5540_v51  ;;  %v2232_v4 = vld [vmem:[#allocation11 + $0x1f8] sm:$0xff]  ;;  %v2226_v51 = vld [vmem:[#allocation11 + $0x1c8] sm:$0xff]  ;;  %v2193_v50 = vld [vmem:[#allocation11 + $0xc0] sm:$0xff] }
 0x442   :  { %2056 = vmatpush.msrb.mxu2 %v5534_v57  ;;  %2076 = vmatpush.msrb.mxu3 %v5536_v7  ;;  %v2225_v57 = vld [vmem:[#allocation11 + $0x1c0] sm:$0xff]  ;;  %v2227_v7 = vld [vmem:[#allocation11 + $0x1d0] sm:$0xff]  ;;  %v2190_v2 = vld [vmem:[#allocation11 + $0xa8] sm:$0xff] }
 0x443   :  { %v4099_v38 = vpop.eup %4098  ;;  %2037 = vmatpush.msrb.mxu1 %v6904_v63  ;;  %v2192_v16 = vld [vmem:[#allocation11 + $0xb8] sm:$0xff]  ;;  %v2186_v63 = vld [vmem:[#allocation11 + $0x88] sm:$0xff] }
 0x444   :  { %v1695_v11 = vmul.f32 %v4099_v38, %v1685_v43  ;;  %2057 = vmatpush.msrb.mxu2 %v5548_v49  ;;  %2077 = vmatpush.msrb.mxu3 %v5550_v52  ;;  %v2222_v49 = vld [vmem:[#allocation11 + $0x1a8] sm:$0xff]  ;;  %v2224_v52 = vld [vmem:[#allocation11 + $0x1b8] sm:$0xff]  ;;  %v2189_v43 = vld [vmem:[#allocation11 + $0xa0] sm:$0xff] }
 0x445   :  { %v2196_v38 = vld [vmem:[#allocation11 + $0xd8] sm:$0xff] }
 0x446   :  { %1696 = vst [vmem:[#allocation3 + $0x8] sm:$0xc] %v1695_v11  ;;  %v1766_v1 = vrot.slane %v1695_v11, 2  ;;  %v2191_v11 = vld [vmem:[#allocation11 + $0xb0] sm:$0xff] }
 0x448   :  { %1784 = vmatmul.f32.vlgmr.msra.gmra.mxu0 %v1766_v1  ;;  %1804 = vmatmul.f32.vlgmr.msra.gmra.mxu1 %v1766_v1 }
 0x449   :  { %1824 = vmatmul.f32.vlgmr.msra.gmra.mxu2 %v1766_v1  ;;  %1844 = vmatmul.f32.vlgmr.msra.gmra.mxu3 %v1766_v1  ;;  %v2185_v1 = vld [vmem:[#allocation11 + $0x80] sm:$0xff] }
 0x44a   :  { %2243 = vmatpush.msra.mxu0 %v2229_v5  ;;  %2266 = vmatpush.msra.mxu1 %v2230_v6 }
 0x44b   :  { %2289 = vmatpush.msra.mxu2 %v2231_v60  ;;  %2312 = vmatpush.msra.mxu3 %v2232_v4  ;;  %v2187_v60 = vld [vmem:[#allocation11 + $0x90] sm:$0xff]  ;;  %v2188_v4 = vld [vmem:[#allocation11 + $0x98] sm:$0xff] }
 0x44c   :  { %2244 = vmatpush.msra.mxu0 %v2225_v57  ;;  %2267 = vmatpush.msra.mxu1 %v2226_v51 }
 0x44d   :  { %2290 = vmatpush.msra.mxu2 %v2227_v7  ;;  %2313 = vmatpush.msra.mxu3 %v2228_v22  ;;  %v1700_v7 = vld [vmem:[#allocation2 + $0x38] sm:$0x30] }
 0x44e   :  { %2245 = vmatpush.msra.mxu0 %v2221_v59  ;;  %2268 = vmatpush.msra.mxu1 %v2222_v49  ;;  %v2181_v59 = vld [vmem:[#allocation11 + $0x60] sm:$0xff]  ;;  %v2182_v49 = vld [vmem:[#allocation11 + $0x68] sm:$0xff] }
 0x44f   :  { %2291 = vmatpush.msra.mxu2 %v2223_v8  ;;  %2314 = vmatpush.msra.mxu3 %v2224_v52  ;;  %v2183_v8 = vld [vmem:[#allocation11 + $0x70] sm:$0xff]  ;;  %v2184_v52 = vld [vmem:[#allocation11 + $0x78] sm:$0xff] }
 0x450   :  { %2246 = vmatpush.msra.mxu0 %v2217_v3  ;;  %2269 = vmatpush.msra.mxu1 %v2218_v27  ;;  %v2177_v3 = vld [vmem:[#allocation11 + $0x40] sm:$0xff]  ;;  %v2178_v27 = vld [vmem:[#allocation11 + $0x48] sm:$0xff] }
 0x451   :  { %2292 = vmatpush.msra.mxu2 %v2219_v9  ;;  %2315 = vmatpush.msra.mxu3 %v2220_v15  ;;  %v2174_v15 = vld [vmem:[#allocation11 + $0x28] sm:$0xff] }
 0x452   :  { %2247 = vmatpush.msra.mxu0 %v2213_v24  ;;  %2270 = vmatpush.msra.mxu1 %v2214_v25 }
 0x453   :  { %2293 = vmatpush.msra.mxu2 %v2215_v26  ;;  %2316 = vmatpush.msra.mxu3 %v2216_v28  ;;  %v2169_v26 = vld [vmem:[#allocation11] sm:$0xff]  ;;  %v2170_v28 = vld [vmem:[#allocation11 + $0x8] sm:$0xff] }
 0x454   :  { %2248 = vmatpush.msra.mxu0 %v2209_v31  ;;  %2271 = vmatpush.msra.mxu1 %v2210_v36  ;;  %v2171_v31 = vld [vmem:[#allocation11 + $0x10] sm:$0xff]  ;;  %v2172_v36 = vld [vmem:[#allocation11 + $0x18] sm:$0xff] }
 0x455   :  { %2294 = vmatpush.msra.mxu2 %v2211_v39  ;;  %2317 = vmatpush.msra.mxu3 %v2212_v40 }
 0x456   :  { %2249 = vmatpush.msra.mxu0 %v2205_v46  ;;  %2272 = vmatpush.msra.mxu1 %v2206_v47  ;;  %v310_v47 = vld [vmem:[%s309_s4] ss:$8 sm:$0xf] }
 0x457   :  { %2295 = vmatpush.msra.mxu2 %v2207_v48  ;;  %2318 = vmatpush.msra.mxu3 %v2208_v35  ;;  %312 = vst.msk [vmem:[#allocation2 + $0x26] ss:$8 sm:$0xf] %vm4741_vm0, %v310_v47  ;;  %v323_v35 = vld [vmem:[%s322_s17] ss:$8 sm:$0xf] }
 0x458   :  { %2250 = vmatpush.msra.mxu0 %v2201_v37  ;;  %2273 = vmatpush.msra.mxu1 %v2202_v20  ;;  %325 = vst.msk [vmem:[#allocation2 + $0x27] ss:$8 sm:$0xf] %vm4741_vm0, %v323_v35  ;;  %v5748_v47 = vld [vmem:[#allocation12 + $0x188] sm:$0xff]  ;;  %s4526_s17 = smov [#allocation14]  }
 0x459   :  { %2296 = vmatpush.msra.mxu2 %v2203_v58  ;;  %2319 = vmatpush.msra.mxu3 %v2204_v55  ;;  %s3781_s18 = sshll.u32 %s4526_s17, 4  ;;  %s3782_s18 = int_to_ptr.vmem [resolvable:$true] %s3781_s18 }
 0x45a   :  { %2251 = vmatpush.msra.mxu0 %v2197_v32  ;;  %2274 = vmatpush.msra.mxu1 %v2198_v34  ;;  %v1923_v34 = vrot.slane %v5621_v61, 6 }
 0x45b   :  { %2297 = vmatpush.msra.mxu2 %v2199_v53  ;;  %2320 = vmatpush.msra.mxu3 %v2200_v23 }
 0x45c   :  { %2252 = vmatpush.msra.mxu0 %v2193_v50  ;;  %2275 = vmatpush.msra.mxu1 %v2194_v33 }
 0x45d   :  { %2298 = vmatpush.msra.mxu2 %v2195_v0  ;;  %2321 = vmatpush.msra.mxu3 %v2196_v38 }
 0x45e   :  { %2253 = vmatpush.msra.mxu0 %v2189_v43  ;;  %2276 = vmatpush.msra.mxu1 %v2190_v2 }
 0x45f   :  { %2299 = vmatpush.msra.mxu2 %v2191_v11  ;;  %2322 = vmatpush.msra.mxu3 %v2192_v16 }
 0x460   :  { %2254 = vmatpush.msra.mxu0 %v2185_v1  ;;  %2277 = vmatpush.msra.mxu1 %v2186_v63 }
 0x461   :  { %2300 = vmatpush.msra.mxu2 %v2187_v60  ;;  %2323 = vmatpush.msra.mxu3 %v2188_v4  ;;  %v2167_v4 = vld [vmem:[#allocation3] sm:$0xff] }
 0x462   :  { %2255 = vmatpush.msra.mxu0 %v2181_v59  ;;  %2278 = vmatpush.msra.mxu1 %v2182_v49 }
 0x463   :  { %2301 = vmatpush.msra.mxu2 %v2183_v8  ;;  %2324 = vmatpush.msra.mxu3 %v2184_v52  ;;  %v5704_v8 = vld [vmem:[%s6661_s7] sm:$0xf]  ;;  %v5706_v52 = vld [vmem:[#allocation12 + $0x1e0] sm:$0xff] }
 0x464   :  { %2256 = vmatpush.msra.mxu0 %v2177_v3  ;;  %2279 = vmatpush.msra.mxu1 %v2178_v27  ;;  %6905 = vst [vmem:[#allocation44_spill] sm:$0xff] %v5704_v8  ;;  %v5708_v3 = vld [vmem:[#allocation12 + $0x1e8] sm:$0xff]  ;;  %v5710_v27 = vld [vmem:[#allocation12 + $0x1f0] sm:$0xff] }
 0x466   :  { %2280 = vmatpush.msra.mxu1 %v2174_v15  ;;  %v5721_v15 = vld [vmem:[#allocation12 + $0x1c8] sm:$0xff] }
 0x468   :  { %2281 = vmatpush.msra.mxu1 %v2170_v28  ;;  %v5732_v28 = vld [vmem:[#allocation12 + $0x1a0] sm:$0xff] }
 0x4c5   :  { %v1785_v12 = vpop.f32.mrf.mxu0  ;;  %v1805_v14 = vpop.f32.mrf.mxu1 }
 0x4c6   :  { %v1852_v17 = vrot.slane %v1785_v12, 4  ;;  %v1853_v19 = vrot.slane %v1805_v14, 4  ;;  %v2180_v12 = vld [vmem:[#allocation11 + $0x58] sm:$0xff] }
 0x4c7   :  { %2325 = vmatpush.msra.mxu3 %v2180_v12  ;;  %v5714_v12 = vld [vmem:[#allocation12 + $0x1f8] sm:$0xff] }
 0x4c8   :  { %v1860_v29 = vadd.f32 %v1852_v17, %v1697_v10  ;;  %v1861_v30 = vadd.f32 %v1853_v19, %v1698_v13  ;;  %v2179_v10 = vld [vmem:[#allocation11 + $0x50] sm:$0xff]  ;;  %v2173_v13 = vld [vmem:[#allocation11 + $0x20] sm:$0xff]  ;;  %v2176_v19 = vld [vmem:[#allocation11 + $0x38] sm:$0xff] }
 0x4c9   :  { %v2175_v17 = vld [vmem:[#allocation11 + $0x30] sm:$0xff]  ;;  %2302 = vmatpush.msra.mxu2 %v2179_v10  ;;  %2257 = vmatpush.msra.mxu0 %v2173_v13  ;;  %v6713_v13 = vperm.slane %v5704_v8, 0 }
 0x4ca   :  { %v3944_v41 = vmul.f32 -1.442695, %v1860_v29  ;;  %v3945_v42 = vmul.f32 -1.442695, %v1861_v30  ;;  %2326 = vmatpush.msra.mxu3 %v2176_v19 }
 0x4cb   :  { %2303 = vmatpush.msra.mxu2 %v2175_v17  ;;  %2258 = vmatpush.msra.mxu0 %v2169_v26  ;;  %v5723_v17 = vld [vmem:[#allocation12 + $0x1d0] sm:$0xff]  ;;  %v5728_v26 = vld [vmem:[#allocation12 + $0x1d8] sm:$0xff] }
 0x4cc   :  { %4100 = vpow2.f32 %v3944_v41  ;;  %v1825_v56 = vpop.f32.mrf.mxu2  ;;  %v1845_v51 = vpop.f32.mrf.mxu3  ;;  %2327 = vmatpush.msra.mxu3 %v2172_v36 }
 0x4cd   :  { %4102 = vpow2.f32 %v3945_v42  ;;  %v1854_v62 = vrot.slane %v1825_v56, 4  ;;  %v1855_v22 = vrot.slane %v1845_v51, 4  ;;  %2304 = vmatpush.msra.mxu2 %v2171_v31  ;;  %v1933_v31 = vld [vmem:[#allocation2 + $0x30] sm:$0xc0] }
 0x4cf   :  { %v1862_v44 = vadd.f32 %v1854_v62, %v1699_v45  ;;  %v1863_v25 = vadd.f32 %v1855_v22, %v1700_v7  ;;  %v1932_v7 = vld [vmem:[#allocation2 + $0x28] sm:$0xc0] }
 0x4d1   :  { %v3946_v18 = vmul.f32 -1.442695, %v1862_v44 }
 0x4d2   :  { %v4101_v21 = vpop.eup %4100 }
 0x4d3   :  { %v4103_v5 = vpop.eup %4102  ;;  %v5662_v6 = vadd.f32 1.0, %v4101_v21  ;;  %4104 = vpow2.f32 %v3946_v18 }
 0x4d4   :  { %v5665_v57 = vadd.f32 1.0, %v4103_v5 }
 0x4d5   :  { %4106 = vrcp.f32 %v5662_v6  ;;  %v1885_v41 = vand.u32 2147483647, %v5662_v6  ;;  %v1887_v46 = vand.u32 2147483648, %v5662_v6  ;;  %vm1881_vm15 = vweird.f32 %v5662_v6 }
 0x4d6   :  { %4108 = vrcp.f32 %v5665_v57  ;;  %v1902_v45 = vand.u32 2147483648, %v5665_v57  ;;  %v1900_v56 = vand.u32 2147483647, %v5665_v57  ;;  %vm1896_vm1 = vweird.f32 %v5665_v57 }
 0x4d7   :  { %v1888_v62 = vor.u32 1.1754944e-38, %v1887_v46  ;;  %vm1886_vm4 = vcmp.eq.f32.partialorder %v1885_v41, 8.507059e+37  ;;  %v5746_v46 = vld [vmem:[#allocation12 + $0x180] sm:$0xff] }
 0x4d8   :  { %v1903_v53 = vor.u32 1.1754944e-38, %v1902_v45  ;;  %vm1901_vm0 = vcmp.eq.f32.partialorder %v1900_v56, 8.507059e+37  ;;  %v5758_v56 = vld [vmem:[#allocation12 + $0x198] sm:$0xff] }
 0x4d9   :  { %v4105_v9 = vpop.eup %4104 }
 0x4da   :  { %v5674_v14 = vadd.f32 1.0, %v4105_v9 }
 0x4db   :  { %v4107_v24 = vpop.eup %4106 }
 0x4dc   :  { %v4109_v29 = vpop.eup %4108  ;;  %v1877_v30 = vmul.f32 %v4107_v24, %v5662_v6  ;;  %4110 = vrcp.f32 %v5674_v14  ;;  %vm1882_vm13 = vweird.f32 %v4107_v24  ;;  %v1917_v61 = vand.u32 2147483648, %v5674_v14 }
 0x4dd   :  { %v1892_v39 = vmul.f32 %v4109_v29, %v5665_v57  ;;  %4112 = vtanh.f32 %v1863_v25  ;;  %vm1897_vm14 = vweird.f32 %v4109_v29  ;;  %vm1883_vm2 = vmor %vm1881_vm15, %vm1882_vm13  ;;  %vm1911_vm6 = vweird.f32 %v5674_v14  ;;  %v1931_v57 = vld [vmem:[#allocation2 + $0x20] sm:$0xc0] }
 0x4de   :  { %v1878_v40 = vsub.f32 1.0, %v1877_v30  ;;  %vm1898_vm3 = vmor %vm1896_vm1, %vm1897_vm14  ;;  %v1915_v16 = vand.u32 2147483647, %v5674_v14  ;;  %v1918_v1 = vor.u32 1.1754944e-38, %v1917_v61  ;;  %v6712_v25 = vperm.slane %v5704_v8, 1  ;;  %v5736_v30 = vld [vmem:[#allocation12 + $0x1b0] sm:$0xff] }
 0x4df   :  { %v1893_v42 = vsub.f32 1.0, %v1892_v39  ;;  %v5794_v61 = vld [vmem:[#allocation12 + $0x130] sm:$0xff] }
 0x4e0   :  { %v1879_v48 = vmul.f32 %v4107_v24, %v1878_v40  ;;  %vm1916_vm8 = vcmp.eq.f32.partialorder %v1915_v16, 8.507059e+37  ;;  %v5742_v40 = vld [vmem:[#allocation12 + $0x1b8] sm:$0xff] }
 0x4e1   :  { %v1894_v37 = vmul.f32 %v4109_v29, %v1893_v42 }
 0x4e2   :  { %v4111_v20 = vpop.eup %4110  ;;  %v1880_v58 = vadd.f32 %v4107_v24, %v1879_v48  ;;  %v5750_v48 = vld [vmem:[#allocation12 + $0x190] sm:$0xff] }
 0x4e3   :  { %v1907_v55 = vmul.f32 %v4111_v20, %v5674_v14  ;;  %v1895_v32 = vadd.f32 %v4109_v29, %v1894_v37  ;;  %v4113_v50 = vpop.eup %4112  ;;  %vm1912_vm5 = vweird.f32 %v4111_v20  ;;  %v5719_v14 = vld [vmem:[#allocation12 + $0x1c0] sm:$0xff] }
 0x4e4   :  { %v1884_v23 = vsel %vm1883_vm2, %v4107_v24, %v1880_v58  ;;  %vm1913_vm7 = vmor %vm1911_vm6, %vm1912_vm5  ;;  %v5762_v58 = vld [vmem:[#allocation12 + $0x160] sm:$0xff] }
 0x4e5   :  { %v1908_v54 = vsub.f32 1.0, %v1907_v55  ;;  %v1889_v33 = vsel %vm1886_vm4, %v1888_v62, %v1884_v23  ;;  %v1899_v44 = vsel %vm1898_vm3, %v4109_v29, %v1895_v32  ;;  %v5734_v29 = vld [vmem:[#allocation12 + $0x1a8] sm:$0xff]  ;;  %v5766_v62 = vld [vmem:[#allocation12 + $0x170] sm:$0xff]  ;;  %v5770_v32 = vld [vmem:[#allocation12 + $0x178] sm:$0xff] }
 0x4e6   :  { %v1904_v0 = vsel %vm1901_vm0, %v1903_v53, %v1899_v44  ;;  %v1926_v38 = vmul.f32 %v4113_v50, %v1889_v33  ;;  %v5764_v55 = vld [vmem:[#allocation12 + $0x168] sm:$0xff]  ;;  %v5774_v53 = vld [vmem:[#allocation12 + $0x140] sm:$0xff]  ;;  %v5778_v50 = vld [vmem:[#allocation12 + $0x150] sm:$0xff] }
 0x4e7   :  { %v1925_v43 = vmul.f32 %v1923_v34, %v1904_v0  ;;  %v1909_v2 = vmul.f32 %v4111_v20, %v1908_v54  ;;  %v5776_v23 = vld [vmem:[#allocation12 + $0x148] sm:$0xff]  ;;  %v5782_v33 = vld [vmem:[#allocation12 + $0x158] sm:$0xff] }
 0x4e9   :  { %v5695_v18 = vadd.f32 %v1926_v38, %v1925_v43  ;;  %v1910_v11 = vadd.f32 %v4111_v20, %v1909_v2  ;;  %v6711_v38 = vperm.slane %v5704_v8, 2  ;;  %v6710_v43 = vperm.slane %v5704_v8, 3  ;;  %v5790_v2 = vld [vmem:[#allocation12 + $0x120] sm:$0xff] }
 0x4eb   :  { %4114 = vtanh.f32 %v5695_v18  ;;  %v1914_v21 = vsel %vm1913_vm7, %v4111_v20, %v1910_v11  ;;  %v5792_v11 = vld [vmem:[#allocation12 + $0x128] sm:$0xff] }
 0x4ec   :  { %v1919_v5 = vsel %vm1916_vm8, %v1918_v1, %v1914_v21 }
 0x4f1   :  { %v4115_v63 = vpop.eup %4114 }
 0x4f2   :  { %v1929_v6 = vmul.f32 %v4115_v63, %v1919_v5  ;;  %v5800_v63 = vld [vmem:[#allocation12 + $0x138] sm:$0xff]  ;;  %v5805_v5 = vld [vmem:[#allocation12 + $0x100] sm:$0xff] }
 0x4f4   :  { %1930 = vst [vmem:[#allocation3 + $0x8] sm:$0x30] %v1929_v6  ;;  %v2000_v60 = vrot.slane %v1929_v6, 4  ;;  %v5807_v6 = vld [vmem:[#allocation12 + $0x108] sm:$0xff] }
 0x4f6   :  { %2018 = vmatmul.f32.vlgmr.msrb.gmra.mxu0 %v2000_v60  ;;  %2038 = vmatmul.f32.vlgmr.msrb.gmra.mxu1 %v2000_v60 }
 0x4f7   :  { %2058 = vmatmul.f32.vlgmr.msrb.gmra.mxu2 %v2000_v60  ;;  %2078 = vmatmul.f32.vlgmr.msrb.gmra.mxu3 %v2000_v60  ;;  %v5809_v60 = vld [vmem:[#allocation12 + $0x110] sm:$0xff] }
 0x4f8   :  { %2415 = vmatpush.msrb.mxu0 %v5706_v52  ;;  %2435 = vmatpush.msrb.mxu1 %v5708_v3 }
 0x4f9   :  { %2455 = vmatpush.msrb.mxu2 %v5710_v27  ;;  %2475 = vmatpush.msrb.mxu3 %v5714_v12 }
 0x4fa   :  { %2416 = vmatpush.msrb.mxu0 %v5719_v14  ;;  %2436 = vmatpush.msrb.mxu1 %v5721_v15 }
 0x4fb   :  { %2456 = vmatpush.msrb.mxu2 %v5723_v17  ;;  %2476 = vmatpush.msrb.mxu3 %v5728_v26 }
 0x4fc   :  { %2417 = vmatpush.msrb.mxu0 %v5732_v28  ;;  %2437 = vmatpush.msrb.mxu1 %v5734_v29 }
 0x4fd   :  { %2457 = vmatpush.msrb.mxu2 %v5736_v30  ;;  %2477 = vmatpush.msrb.mxu3 %v5742_v40 }
 0x4fe   :  { %2259 = vmatmul.f32.vlgmr.msra.gmra.mxu0 %v2167_v4  ;;  %2282 = vmatmul.f32.vlgmr.msra.gmra.mxu1 %v2167_v4 }
 0x4ff   :  { %2305 = vmatmul.f32.vlgmr.msra.gmra.mxu2 %v2167_v4  ;;  %2328 = vmatmul.f32.vlgmr.msra.gmra.mxu3 %v2167_v4  ;;  %v1934_v4 = vld [vmem:[#allocation2 + $0x38] sm:$0xc0] }
 0x500   :  { %2418 = vmatpush.msrb.mxu0 %v5746_v46  ;;  %2438 = vmatpush.msrb.mxu1 %v5748_v47 }
 0x501   :  { %2458 = vmatpush.msrb.mxu2 %v5750_v48  ;;  %2478 = vmatpush.msrb.mxu3 %v5758_v56 }
 0x502   :  { %2419 = vmatpush.msrb.mxu0 %v5762_v58  ;;  %2439 = vmatpush.msrb.mxu1 %v5764_v55 }
 0x503   :  { %2459 = vmatpush.msrb.mxu2 %v5766_v62  ;;  %2479 = vmatpush.msrb.mxu3 %v5770_v32 }
 0x504   :  { %2420 = vmatpush.msrb.mxu0 %v5774_v53  ;;  %2440 = vmatpush.msrb.mxu1 %v5776_v23 }
 0x505   :  { %2460 = vmatpush.msrb.mxu2 %v5778_v50  ;;  %2480 = vmatpush.msrb.mxu3 %v5782_v33 }
 0x506   :  { %2421 = vmatpush.msrb.mxu0 %v5790_v2  ;;  %2441 = vmatpush.msrb.mxu1 %v5792_v11 }
 0x507   :  { %2461 = vmatpush.msrb.mxu2 %v5794_v61  ;;  %2481 = vmatpush.msrb.mxu3 %v5800_v63 }
 0x508   :  { %2422 = vmatpush.msrb.mxu0 %v5805_v5  ;;  %2442 = vmatpush.msrb.mxu1 %v5807_v6 }
 0x509   :  { %2462 = vmatpush.msrb.mxu2 %v5809_v60 }
 0x573   :  { %v2019_v51 = vpop.f32.mrf.mxu0  ;;  %v2039_v22 = vpop.f32.mrf.mxu1 }
 0x574   :  { %v2086_v59 = vrot.slane %v2019_v51, 2  ;;  %v2087_v49 = vrot.slane %v2039_v22, 2  ;;  %v5816_v51 = vld [vmem:[#allocation12 + $0xe0] sm:$0xff] }
 0x575   :  { %2423 = vmatpush.msrb.mxu0 %v5816_v51 }
 0x576   :  { %v2094_v9 = vadd.f32 %v2086_v59, %v1931_v57  ;;  %v2095_v10 = vadd.f32 %v2087_v49, %v1932_v7  ;;  %v5814_v57 = vld [vmem:[#allocation12 + $0x118] sm:$0xff]  ;;  %v5818_v7 = vld [vmem:[#allocation12 + $0xe8] sm:$0xff] }
 0x577   :  { %2482 = vmatpush.msrb.mxu3 %v5814_v57  ;;  %2443 = vmatpush.msrb.mxu1 %v5818_v7 }
 0x578   :  { %v3947_v19 = vmul.f32 -1.442695, %v2094_v9  ;;  %v3948_v24 = vmul.f32 -1.442695, %v2095_v10  ;;  %v5827_v9 = vld [vmem:[#allocation12 + $0xf0] sm:$0xff]  ;;  %v5829_v10 = vld [vmem:[#allocation12 + $0xf8] sm:$0xff] }
 0x579   :  { %2463 = vmatpush.msrb.mxu2 %v5827_v9  ;;  %2483 = vmatpush.msrb.mxu3 %v5829_v10 }
 0x57a   :  { %4116 = vpow2.f32 %v3947_v19  ;;  %v2059_v36 = vpop.f32.mrf.mxu2  ;;  %v5738_v39 = vpop.f32.mrf.mxu3  ;;  %v5831_v19 = vld [vmem:[#allocation12 + $0xc0] sm:$0xff] }
 0x57b   :  { %4118 = vpow2.f32 %v3948_v24  ;;  %v2088_v41 = vrot.slane %v2059_v36, 2  ;;  %v2260_v42 = vpop.f32.mrf.mxu0  ;;  %v2283_v45 = vpop.f32.mrf.mxu1  ;;  %v2089_v22 = vrot.slane %v5738_v39, 2  ;;  %v5835_v24 = vld [vmem:[#allocation12 + $0xc8] sm:$0xff]  ;;  %v5839_v36 = vld [vmem:[#allocation12 + $0xd8] sm:$0xff]  ;;  %2424 = vmatpush.msrb.mxu0 %v5831_v19 }
 0x57c   :  { %v2261_v35 = vadd.f32 %v2260_v42, %v6713_v13  ;;  %v2284_v37 = vadd.f32 %v2283_v45, %v6712_v25  ;;  %6906 = vst [vmem:[#allocation24_spill] sm:$0xff] %v5835_v24  ;;  %v5845_v42 = vld [vmem:[#allocation12 + $0xa8] sm:$0xff]  ;;  %2444 = vmatpush.msrb.mxu1 %v5835_v24  ;;  %2484 = vmatpush.msrb.mxu3 %v5839_v36  ;;  %v5886_v25 = vld [vmem:[#allocation12 + $0x78] sm:$0xff] }
 0x57d   :  { %v2096_v20 = vadd.f32 %v2088_v41, %v1933_v31  ;;  %v5837_v31 = vld [vmem:[#allocation12 + $0xd0] sm:$0xff]  ;;  %6908 = vst [vmem:[#allocation27_spill] sm:$0xff] %v5839_v36  ;;  %v5843_v41 = vld [vmem:[#allocation12 + $0xa0] sm:$0xff] }
 0x57e   :  { %2335 = vst [vmem:[#allocation2] sm:$0xff] %v2261_v35  ;;  %v5851_v35 = vld [vmem:[#allocation12 + $0xb0] sm:$0xff]  ;;  %2464 = vmatpush.msrb.mxu2 %v5837_v31  ;;  %2425 = vmatpush.msrb.mxu0 %v5843_v41 }
 0x57f   :  { %v3949_v34 = vmul.f32 -1.442695, %v2096_v20  ;;  %2336 = vst [vmem:[#allocation2 + $0x8] sm:$0xff] %v2284_v37  ;;  %v5853_v37 = vld [vmem:[#allocation12 + $0xb8] sm:$0xff]  ;;  %2445 = vmatpush.msrb.mxu1 %v5845_v42 }
 0x580   :  { %v4117_v54 = vpop.eup %4116  ;;  %6907 = vst [vmem:[#allocation26_spill] sm:$0xff] %v5837_v31  ;;  %2465 = vmatpush.msrb.mxu2 %v5851_v35  ;;  %2485 = vmatpush.msrb.mxu3 %v5853_v37 }
 0x581   :  { %v4119_v44 = vpop.eup %4118  ;;  %v5784_v0 = vadd.f32 1.0, %v4117_v54  ;;  %4120 = vpow2.f32 %v3949_v34  ;;  %6909 = vst [vmem:[#allocation28_spill] sm:$0xff] %v5843_v41  ;;  %v2097_v34 = vadd.f32 %v2089_v22, %v1934_v4  ;;  %v5859_v54 = vld [vmem:[#allocation12 + $0x80] sm:$0xff]  ;;  %v5870_v4 = vld [vmem:[#allocation12 + $0x90] sm:$0xff]  ;;  %v5872_v22 = vld [vmem:[#allocation12 + $0x98] sm:$0xff] }
 0x582   :  { %v5796_v16 = vadd.f32 1.0, %v4119_v44  ;;  %v2306_v21 = vpop.f32.mrf.mxu2  ;;  %v2329_v1 = vpop.f32.mrf.mxu3  ;;  %6910 = vst [vmem:[#allocation29_spill] sm:$0xff] %v5845_v42  ;;  %v5861_v44 = vld [vmem:[#allocation12 + $0x88] sm:$0xff]  ;;  %2426 = vmatpush.msrb.mxu0 %v5859_v54  ;;  %2466 = vmatpush.msrb.mxu2 %v5870_v4  ;;  %v5922_v41 = vld [vmem:[#allocation12 + $0x38] sm:$0xff] }
 0x583   :  { %4122 = vrcp.f32 %v5784_v0  ;;  %v2307_v59 = vadd.f32 %v2306_v21, %v6711_v38  ;;  %v2330_v49 = vadd.f32 %v2329_v1, %v6710_v43  ;;  %6911 = vst [vmem:[#allocation30_spill] sm:$0xff] %v5851_v35  ;;  %2446 = vmatpush.msrb.mxu1 %v5861_v44  ;;  %v5884_v38 = vld [vmem:[#allocation12 + $0x70] sm:$0xff]  ;;  %v2121_v8 = vand.u32 2147483648, %v5784_v0  ;;  %2486 = vmatpush.msrb.mxu3 %v5872_v22  ;;  %v5893_v35 = vld [vmem:[#allocation12 + $0x48] sm:$0xff] }
 0x584   :  { %4124 = vrcp.f32 %v5796_v16  ;;  %6912 = vst [vmem:[#allocation31_spill] sm:$0xff] %v5853_v37  ;;  %v5891_v37 = vld [vmem:[#allocation12 + $0x40] sm:$0xff]  ;;  %2467 = vmatpush.msrb.mxu2 %v5884_v38  ;;  %v5912_v42 = vld [vmem:[#allocation12 + $0x28] sm:$0xff]  ;;  %vm2115_vm11 = vweird.f32 %v5784_v0  ;;  %vm2130_vm12 = vweird.f32 %v5796_v16 }
 0x585   :  { %2337 = vst [vmem:[#allocation2 + $0x10] sm:$0xff] %v2307_v59  ;;  %2487 = vmatpush.msrb.mxu3 %v5886_v25 }
 0x586   :  { %2338 = vst [vmem:[#allocation2 + $0x18] sm:$0xff] %v2330_v49  ;;  %v5878_v49 = vld [vmem:[#allocation12 + $0x60] sm:$0xff] }
 0x587   :  { %v4121_v39 = vpop.eup %4120  ;;  %6913 = vst [vmem:[#allocation32_spill] sm:$0xff] %v5859_v54  ;;  %v2119_v54 = vand.u32 2147483647, %v5784_v0  ;;  %2427 = vmatpush.msrb.mxu0 %v5878_v49 }
 0x588   :  { %v5847_v45 = vadd.f32 1.0, %v4121_v39  ;;  %6914 = vst [vmem:[#allocation33_spill] sm:$0xff] %v5861_v44  ;;  %v5880_v39 = vld [vmem:[#allocation12 + $0x68] sm:$0xff] }
 0x589   :  { %v5855_v20 = vpop.eup %4122  ;;  %6915 = vst [vmem:[#allocation34_spill] sm:$0xff] %v5870_v4  ;;  %2447 = vmatpush.msrb.mxu1 %v5880_v39  ;;  %v2134_v4 = vand.u32 2147483647, %v5796_v16  ;;  %2428 = vmatpush.msrb.mxu0 %v5891_v37  ;;  %vm2120_vm15 = vcmp.eq.f32.partialorder %v2119_v54, 8.507059e+37 }
 0x58a   :  { %v5863_v21 = vpop.eup %4124  ;;  %v2111_v1 = vmul.f32 %v5855_v20, %v5784_v0  ;;  %4126 = vrcp.f32 %v5847_v45  ;;  %6916 = vst [vmem:[#allocation25_spill] sm:$0xff] %v5872_v22  ;;  %vm2116_vm9 = vweird.f32 %v5855_v20  ;;  %v2122_v0 = vor.u32 1.1754944e-38, %v2121_v8 }
 0x58b   :  { %v2126_v59 = vmul.f32 %v5863_v21, %v5796_v16  ;;  %6917 = vst [vmem:[#allocation35_spill] sm:$0xff] %v5878_v49  ;;  %4128 = vtanh.f32 %v2097_v34  ;;  %v5901_v34 = vld [vmem:[#allocation12 + $0x50] sm:$0xff]  ;;  %vm2131_vm10 = vweird.f32 %v5863_v21  ;;  %2448 = vmatpush.msrb.mxu1 %v5893_v35  ;;  %vm5929_vm13 = vmor %vm2115_vm11, %vm2116_vm9  ;;  %vm2135_vm1 = vcmp.eq.f32.partialorder %v2134_v4, 8.507059e+37 }
 0x58c   :  { %6918 = vst [vmem:[#allocation36_spill] sm:$0xff] %v5880_v39  ;;  %v2112_v43 = vsub.f32 1.0, %v2111_v1  ;;  %v2136_v1 = vand.u32 2147483648, %v5796_v16  ;;  %2468 = vmatpush.msrb.mxu2 %v5901_v34  ;;  %v2157_v16 = vrot.slane %v5695_v18, 6  ;;  %vm5943_vm14 = vmor %vm2130_vm12, %vm2131_vm10  ;;  %vm2145_vm3 = vweird.f32 %v5847_v45 }
 0x58d   :  { %6919 = vst [vmem:[#allocation37_spill] sm:$0xff] %v5884_v38  ;;  %v2127_v13 = vsub.f32 1.0, %v2126_v59  ;;  %v5903_v59 = vld [vmem:[#allocation12 + $0x58] sm:$0xff]  ;;  %2449 = vmatpush.msrb.mxu1 %v5912_v42  ;;  %v2149_v36 = vand.u32 2147483647, %v5847_v45 }
 0x58e   :  { %6920 = vst [vmem:[#allocation38_spill] sm:$0xff] %v5886_v25  ;;  %v2113_v44 = vmul.f32 %v5855_v20, %v2112_v43  ;;  %v5910_v43 = vld [vmem:[#allocation12 + $0x20] sm:$0xff]  ;;  %2488 = vmatpush.msrb.mxu3 %v5903_v59  ;;  %v2137_v31 = vor.u32 1.1754944e-38, %v2136_v1 }
 0x58f   :  { %6921 = vst [vmem:[#allocation39_spill] sm:$0xff] %v5891_v37  ;;  %v2128_v22 = vmul.f32 %v5863_v21, %v2127_v13  ;;  %v5920_v13 = vld [vmem:[#allocation12 + $0x30] sm:$0xff]  ;;  %v5938_v37 = vld [vmem:[#allocation12 + $0x8] sm:$0xff]  ;;  %2429 = vmatpush.msrb.mxu0 %v5910_v43  ;;  %vm2150_vm0 = vcmp.eq.f32.partialorder %v2149_v36, 8.507059e+37 }
 0x590   :  { %6922 = vst [vmem:[#allocation40_spill] sm:$0xff] %v5893_v35  ;;  %v5914_v49 = vpop.eup %4126  ;;  %v2114_v39 = vadd.f32 %v5855_v20, %v2113_v44  ;;  %v5936_v35 = vld [vmem:[#allocation12] sm:$0xff]  ;;  %2469 = vmatpush.msrb.mxu2 %v5920_v13  ;;  %2489 = vmatpush.msrb.mxu3 %v5922_v41 }
 0x591   :  { %6923 = vst [vmem:[#allocation41_spill] sm:$0xff] %v5901_v34  ;;  %v2141_v25 = vmul.f32 %v5914_v49, %v5847_v45  ;;  %v2129_v44 = vadd.f32 %v5863_v21, %v2128_v22  ;;  %v5952_v22 = vld [vmem:[#allocation12 + $0x10] sm:$0xff]  ;;  %v4129_v18 = vpop.eup %4128  ;;  %2430 = vmatpush.msrb.mxu0 %v5936_v35  ;;  %2450 = vmatpush.msrb.mxu1 %v5938_v37  ;;  %vm2146_vm2 = vweird.f32 %v5914_v49 }
 0x592   :  { %6924 = vst [vmem:[#allocation42_spill] sm:$0xff] %v5903_v59  ;;  %v2118_v8 = vsel %vm5929_vm13, %v5855_v20, %v2114_v39  ;;  %v5954_v59 = vld [vmem:[#allocation12 + $0x18] sm:$0xff]  ;;  %2470 = vmatpush.msrb.mxu2 %v5952_v22  ;;  %vm2147_vm4 = vmor %vm2145_vm3, %vm2146_vm2  ;;  %v6948_v36 = vld [vmem:[#allocation35_spill] sm:$0xff] }
 0x593   :  { %6925 = vst [vmem:[#allocation43_spill] sm:$0xff] %v5910_v43  ;;  %v2142_v34 = vsub.f32 1.0, %v2141_v25  ;;  %v2123_v24 = vsel %vm2120_vm15, %v2122_v0, %v2118_v8  ;;  %v2133_v1 = vsel %vm5943_vm14, %v5863_v21, %v2129_v44  ;;  %2490 = vmatpush.msrb.mxu3 %v5954_v59  ;;  %2566 = vmatpush.msra.mxu0 %v5706_v52  ;;  %v6937_v0 = vld [vmem:[#allocation24_spill] sm:$0xff]  ;;  %v6939_v8 = vld [vmem:[#allocation27_spill] sm:$0xff] }
 0x594   :  { %6926 = vst [vmem:[#allocation45_spill] sm:$0xff] %v5912_v42  ;;  %v2138_v38 = vsel %vm2135_vm1, %v2137_v31, %v2133_v1  ;;  %v2160_v20 = vmul.f32 %v4129_v18, %v2123_v24  ;;  %2586 = vmatpush.msra.mxu1 %v5708_v3  ;;  %2606 = vmatpush.msra.mxu2 %v5710_v27  ;;  %v2151_v31 = vand.u32 2147483648, %v5847_v45  ;;  %v6940_v18 = vld [vmem:[#allocation28_spill] sm:$0xff]  ;;  %v6941_v1 = vld [vmem:[#allocation29_spill] sm:$0xff] }
 0x595   :  { %6927 = vst [vmem:[#allocation46_spill] sm:$0xff] %v5920_v13  ;;  %v2143_v54 = vmul.f32 %v5914_v49, %v2142_v34  ;;  %v2159_v39 = vmul.f32 %v2157_v16, %v2138_v38  ;;  %2626 = vmatpush.msra.mxu3 %v5714_v12  ;;  %2567 = vmatpush.msra.mxu0 %v5719_v14  ;;  %v6938_v16 = vld [vmem:[#allocation26_spill] sm:$0xff] }
 0x596   :  { %6928 = vst [vmem:[#allocation47_spill] sm:$0xff] %v5922_v41  ;;  %2587 = vmatpush.msra.mxu1 %v5721_v15  ;;  %2607 = vmatpush.msra.mxu2 %v5723_v17  ;;  %v2152_v4 = vor.u32 1.1754944e-38, %v2151_v31  ;;  %v6942_v38 = vld [vmem:[#allocation30_spill] sm:$0xff]  ;;  %v6947_v31 = vld [vmem:[#allocation25_spill] sm:$0xff] }
 0x597   :  { %6931 = vst [vmem:[#allocation48_spill] sm:$0xff] %v5936_v35  ;;  %v2161_v25 = vadd.f32 %v2160_v20, %v2159_v39  ;;  %v2144_v24 = vadd.f32 %v5914_v49, %v2143_v54  ;;  %2627 = vmatpush.msra.mxu3 %v5728_v26  ;;  %2568 = vmatpush.msra.mxu0 %v5732_v28  ;;  %v6943_v20 = vld [vmem:[#allocation31_spill] sm:$0xff]  ;;  %v6944_v54 = vld [vmem:[#allocation32_spill] sm:$0xff]  ;;  %v6945_v39 = vld [vmem:[#allocation33_spill] sm:$0xff] }
 0x598   :  { %6932 = vst [vmem:[#allocation49_spill] sm:$0xff] %v5938_v37  ;;  %2588 = vmatpush.msra.mxu1 %v5734_v29  ;;  %2608 = vmatpush.msra.mxu2 %v5736_v30 }
 0x599   :  { %6935 = vst [vmem:[#allocation50_spill] sm:$0xff] %v5952_v22  ;;  %4130 = vtanh.f32 %v2161_v25  ;;  %2628 = vmatpush.msra.mxu3 %v5742_v40  ;;  %v2148_v21 = vsel %vm2147_vm4, %v5914_v49, %v2144_v24  ;;  %2569 = vmatpush.msra.mxu0 %v5746_v46  ;;  %v6946_v24 = vld [vmem:[#allocation34_spill] sm:$0xff] }
 0x59a   :  { %6936 = vst [vmem:[#allocation51_spill] sm:$0xff] %v5954_v59  ;;  %2589 = vmatpush.msra.mxu1 %v5748_v47  ;;  %2609 = vmatpush.msra.mxu2 %v5750_v48  ;;  %v2153_v34 = vsel %vm2150_vm0, %v2152_v4, %v2148_v21  ;;  %v6949_v21 = vld [vmem:[#allocation36_spill] sm:$0xff]  ;;  %v6950_v4 = vld [vmem:[#allocation37_spill] sm:$0xff] }
 0x59b   :  { %2166 = vst [vmem:[#allocation17 - $0x6] sm:$0xc0] %v2161_v25  ;;  %2629 = vmatpush.msra.mxu3 %v5758_v56  ;;  %2570 = vmatpush.msra.mxu0 %v5762_v58  ;;  %v3950_v25 = vld [vmem:[%s6655_s1 + $0x2] sm:$0x3] }
 0x59c   :  { %2590 = vmatpush.msra.mxu1 %v5764_v55  ;;  %2610 = vmatpush.msra.mxu2 %v5766_v62 }
 0x59d   :  { %2630 = vmatpush.msra.mxu3 %v5770_v32  ;;  %2571 = vmatpush.msra.mxu0 %v5774_v53 }
 0x59e   :  { %2591 = vmatpush.msra.mxu1 %v5776_v23  ;;  %2611 = vmatpush.msra.mxu2 %v5778_v50 }
 0x59f   :  { %v4131_v45 = vpop.eup %4130  ;;  %2631 = vmatpush.msra.mxu3 %v5782_v33  ;;  %2572 = vmatpush.msra.mxu0 %v5790_v2 }
 0x5a0   :  { %v2163_v49 = vmul.f32 %v4131_v45, %v2153_v34  ;;  %2592 = vmatpush.msra.mxu1 %v5792_v11  ;;  %2612 = vmatpush.msra.mxu2 %v5794_v61  ;;  %v6951_v45 = vld [vmem:[#allocation38_spill] sm:$0xff]  ;;  %v6952_v34 = vld [vmem:[#allocation39_spill] sm:$0xff] }
 0x5a1   :  { %2632 = vmatpush.msra.mxu3 %v5800_v63  ;;  %2573 = vmatpush.msra.mxu0 %v5805_v5 }
 0x5a2   :  { %2164 = vst [vmem:[#allocation3 + $0x8] sm:$0xc0] %v2163_v49  ;;  %2593 = vmatpush.msra.mxu1 %v5807_v6  ;;  %2613 = vmatpush.msra.mxu2 %v5809_v60 }
 0x5a3   :  { %2165 = vst [vmem:[#allocation15 - $0x6] sm:$0xc0] %v2163_v49  ;;  %2633 = vmatpush.msra.mxu3 %v5814_v57  ;;  %2574 = vmatpush.msra.mxu0 %v5816_v51  ;;  %v6953_v49 = vld [vmem:[#allocation40_spill] sm:$0xff] }
 0x5a4   :  { %2594 = vmatpush.msra.mxu1 %v5818_v7  ;;  %2614 = vmatpush.msra.mxu2 %v5827_v9 }
 0x5a5   :  { %2634 = vmatpush.msra.mxu3 %v5829_v10  ;;  %2575 = vmatpush.msra.mxu0 %v5831_v19 }
 0x5a6   :  { %2595 = vmatpush.msra.mxu1 %v6937_v0  ;;  %2615 = vmatpush.msra.mxu2 %v6938_v16 }
 0x5a7   :  { %2635 = vmatpush.msra.mxu3 %v6939_v8  ;;  %2576 = vmatpush.msra.mxu0 %v6940_v18 }
 0x5a8   :  { %2596 = vmatpush.msra.mxu1 %v6941_v1  ;;  %2616 = vmatpush.msra.mxu2 %v6942_v38 }
 0x5a9   :  { %v2168_v44 = vld [vmem:[#allocation3 + $0x8] sm:$0xff]  ;;  %2636 = vmatpush.msra.mxu3 %v6943_v20  ;;  %2577 = vmatpush.msra.mxu0 %v6944_v54 }
 0x5aa   :  { %2262 = vmatmul.f32.gmra.mxu0 %v2168_v44  ;;  %2285 = vmatmul.f32.gmra.mxu1 %v2168_v44 }
 0x5ab   :  { %2308 = vmatmul.f32.gmra.mxu2 %v2168_v44  ;;  %2331 = vmatmul.f32.gmra.mxu3 %v2168_v44  ;;  %v6954_v44 = vld [vmem:[#allocation41_spill] sm:$0xff] }
 0x5ac   :  { %2597 = vmatpush.msra.mxu1 %v6945_v39  ;;  %2617 = vmatpush.msra.mxu2 %v6946_v24  ;;  %v6955_v24 = vld [vmem:[#allocation42_spill] sm:$0xff] }
 0x5ad   :  { %2637 = vmatpush.msra.mxu3 %v6947_v31  ;;  %2578 = vmatpush.msra.mxu0 %v6948_v36 }
 0x5ae   :  { %2598 = vmatpush.msra.mxu1 %v6949_v21  ;;  %2618 = vmatpush.msra.mxu2 %v6950_v4 }
 0x5af   :  { %2638 = vmatpush.msra.mxu3 %v6951_v45  ;;  %2579 = vmatpush.msra.mxu0 %v6952_v34 }
 0x5b0   :  { %2599 = vmatpush.msra.mxu1 %v6953_v49  ;;  %2619 = vmatpush.msra.mxu2 %v6954_v44 }
 0x5b1   :  { %2639 = vmatpush.msra.mxu3 %v6955_v24  ;;  %2580 = vmatpush.msra.mxu0 %v5910_v43 }
 0x5b2   :  { %2431 = vmatmul.f32.vlgmr.msrb.gmra.mxu0 %v3950_v25  ;;  %2451 = vmatmul.f32.vlgmr.msrb.gmra.mxu1 %v3950_v25 }
 0x5b3   :  { %2471 = vmatmul.f32.vlgmr.msrb.gmra.mxu2 %v3950_v25  ;;  %2491 = vmatmul.f32.vlgmr.msrb.gmra.mxu3 %v3950_v25  ;;  %v6956_v25 = vld [vmem:[#allocation34_spill] sm:$0xff] }
 0x5b4   :  { %2600 = vmatpush.msra.mxu1 %v5912_v42  ;;  %2620 = vmatpush.msra.mxu2 %v5920_v13 }
 0x5b5   :  { %2640 = vmatpush.msra.mxu3 %v5922_v41  ;;  %2581 = vmatpush.msra.mxu0 %v5936_v35 }
 0x5b6   :  { %2601 = vmatpush.msra.mxu1 %v5938_v37  ;;  %2621 = vmatpush.msra.mxu2 %v5952_v22 }
 0x5b7   :  { %2641 = vmatpush.msra.mxu3 %v5954_v59  ;;  %2735 = vmatpush.msrb.mxu0 %v5706_v52 }
 0x5b8   :  { %2755 = vmatpush.msrb.mxu1 %v5708_v3  ;;  %2775 = vmatpush.msrb.mxu2 %v5710_v27 }
 0x5b9   :  { %2795 = vmatpush.msrb.mxu3 %v5714_v12  ;;  %2736 = vmatpush.msrb.mxu0 %v5719_v14 }
 0x5ba   :  { %2756 = vmatpush.msrb.mxu1 %v5721_v15  ;;  %2776 = vmatpush.msrb.mxu2 %v5723_v17 }
 0x5bb   :  { %2796 = vmatpush.msrb.mxu3 %v5728_v26  ;;  %2737 = vmatpush.msrb.mxu0 %v5732_v28 }
 0x5bc   :  { %2757 = vmatpush.msrb.mxu1 %v5734_v29  ;;  %2777 = vmatpush.msrb.mxu2 %v5736_v30 }
 0x5bd   :  { %2797 = vmatpush.msrb.mxu3 %v5742_v40  ;;  %2738 = vmatpush.msrb.mxu0 %v5746_v46 }
 0x5be   :  { %2758 = vmatpush.msrb.mxu1 %v5748_v47  ;;  %2778 = vmatpush.msrb.mxu2 %v5750_v48 }
 0x5bf   :  { %2798 = vmatpush.msrb.mxu3 %v5758_v56  ;;  %2739 = vmatpush.msrb.mxu0 %v5762_v58 }
 0x5c0   :  { %2759 = vmatpush.msrb.mxu1 %v5764_v55  ;;  %2779 = vmatpush.msrb.mxu2 %v5766_v62 }
 0x5c1   :  { %2799 = vmatpush.msrb.mxu3 %v5770_v32  ;;  %2740 = vmatpush.msrb.mxu0 %v5774_v53 }
 0x5c2   :  { %2760 = vmatpush.msrb.mxu1 %v5776_v23  ;;  %2780 = vmatpush.msrb.mxu2 %v5778_v50 }
 0x5c3   :  { %2800 = vmatpush.msrb.mxu3 %v5782_v33  ;;  %2741 = vmatpush.msrb.mxu0 %v5790_v2 }
 0x5c4   :  { %2761 = vmatpush.msrb.mxu1 %v5792_v11  ;;  %2781 = vmatpush.msrb.mxu2 %v5794_v61 }
 0x5c5   :  { %2801 = vmatpush.msrb.mxu3 %v5800_v63  ;;  %2742 = vmatpush.msrb.mxu0 %v5805_v5 }
 0x5c6   :  { %2762 = vmatpush.msrb.mxu1 %v5807_v6  ;;  %2782 = vmatpush.msrb.mxu2 %v5809_v60 }
 0x5c7   :  { %2802 = vmatpush.msrb.mxu3 %v5814_v57  ;;  %2743 = vmatpush.msrb.mxu0 %v5816_v51 }
 0x5c8   :  { %2763 = vmatpush.msrb.mxu1 %v5818_v7  ;;  %2783 = vmatpush.msrb.mxu2 %v5827_v9 }
 0x5c9   :  { %2803 = vmatpush.msrb.mxu3 %v5829_v10  ;;  %2744 = vmatpush.msrb.mxu0 %v5831_v19 }
 0x5ca   :  { %2764 = vmatpush.msrb.mxu1 %v6937_v0  ;;  %2784 = vmatpush.msrb.mxu2 %v6938_v16 }
 0x5cb   :  { %2804 = vmatpush.msrb.mxu3 %v6939_v8  ;;  %2745 = vmatpush.msrb.mxu0 %v6940_v18 }
 0x5cc   :  { %2765 = vmatpush.msrb.mxu1 %v6941_v1  ;;  %2785 = vmatpush.msrb.mxu2 %v6942_v38 }
 0x5cd   :  { %2805 = vmatpush.msrb.mxu3 %v6943_v20  ;;  %2746 = vmatpush.msrb.mxu0 %v6944_v54 }
 0x5ce   :  { %2766 = vmatpush.msrb.mxu1 %v6945_v39  ;;  %2786 = vmatpush.msrb.mxu2 %v6956_v25 }
 0x5cf   :  { %2806 = vmatpush.msrb.mxu3 %v6947_v31  ;;  %2747 = vmatpush.msrb.mxu0 %v6948_v36  ;;  %v2348_v36 = vld [vmem:[#allocation2 + $0x8] sm:$0x3] }
 0x5d0   :  { %2767 = vmatpush.msrb.mxu1 %v6949_v21  ;;  %2787 = vmatpush.msrb.mxu2 %v6950_v4  ;;  %v2347_v21 = vld [vmem:[#allocation2] sm:$0x3] }
 0x5d1   :  { %2807 = vmatpush.msrb.mxu3 %v6951_v45  ;;  %2748 = vmatpush.msrb.mxu0 %v6952_v34  ;;  %v6957_v34 = vld [vmem:[#allocation44_spill] sm:$0xff] }
 0x5d2   :  { %2768 = vmatpush.msrb.mxu1 %v6953_v49  ;;  %2788 = vmatpush.msrb.mxu2 %v6954_v44 }
 0x5d3   :  { %2808 = vmatpush.msrb.mxu3 %v6955_v24  ;;  %2749 = vmatpush.msrb.mxu0 %v5910_v43  ;;  %v6958_v24 = vperm.slane %v6957_v34, 0  ;;  %v6959_v43 = vperm.slane %v6957_v34, 1 }
 0x5d4   :  { %2769 = vmatpush.msrb.mxu1 %v5912_v42  ;;  %2789 = vmatpush.msrb.mxu2 %v5920_v13 }
 0x5d5   :  { %2809 = vmatpush.msrb.mxu3 %v5922_v41  ;;  %2750 = vmatpush.msrb.mxu0 %v5936_v35  ;;  %v6960_v35 = vperm.slane %v6957_v34, 2 }
 0x5d6   :  { %2770 = vmatpush.msrb.mxu1 %v5938_v37  ;;  %2790 = vmatpush.msrb.mxu2 %v5952_v22  ;;  %v6961_v37 = vperm.slane %v6957_v34, 3 }
 0x5d7   :  { %2810 = vmatpush.msrb.mxu3 %v5954_v59 }
 0x627   :  { %v2263_v49 = vpop.f32.mrf.mxu0  ;;  %v2286_v44 = vpop.f32.mrf.mxu1 }
 0x628   :  { %v2264_v45 = vadd.f32 %v2263_v49, %v6958_v24  ;;  %v2287_v42 = vadd.f32 %v2286_v44, %v6959_v43 }
 0x62a   :  { %2339 = vst [vmem:[#allocation2 + $0x20] sm:$0xff] %v2264_v45 }
 0x62b   :  { %2340 = vst [vmem:[#allocation2 + $0x28] sm:$0xff] %v2287_v42  ;;  %v2349_v42 = vld [vmem:[#allocation2 + $0x10] sm:$0x3] }
 0x62e   :  { %v2309_v13 = vpop.f32.mrf.mxu2  ;;  %v2332_v41 = vpop.f32.mrf.mxu3 }
 0x62f   :  { %v2310_v4 = vadd.f32 %v2309_v13, %v6960_v35  ;;  %v2333_v22 = vadd.f32 %v2332_v41, %v6961_v37  ;;  %v2432_v59 = vpop.f32.mrf.mxu0  ;;  %v2452_v31 = vpop.f32.mrf.mxu1 }
 0x630   :  { %v2495_v25 = vadd.f32 %v2432_v59, %v2347_v21  ;;  %v2496_v39 = vadd.f32 %v2452_v31, %v2348_v36  ;;  %v2350_v36 = vld [vmem:[#allocation2 + $0x18] sm:$0x3] }
 0x631   :  { %2341 = vst [vmem:[#allocation2 + $0x30] sm:$0xff] %v2310_v4 }
 0x632   :  { %2342 = vst [vmem:[#allocation2 + $0x38] sm:$0xff] %v2333_v22  ;;  %v3952_v24 = vmul.f32 -1.442695, %v2495_v25  ;;  %v3953_v43 = vmul.f32 -1.442695, %v2496_v39 }
 0x634   :  { %4132 = vpow2.f32 %v3952_v24 }
 0x635   :  { %4134 = vpow2.f32 %v3953_v43 }
 0x636   :  { %v2472_v45 = vpop.f32.mrf.mxu2  ;;  %v2492_v37 = vpop.f32.mrf.mxu3 }
 0x637   :  { %v2497_v49 = vadd.f32 %v2472_v45, %v2349_v42  ;;  %v2498_v21 = vadd.f32 %v2492_v37, %v2350_v36 }
 0x639   :  { %v3954_v44 = vmul.f32 -1.442695, %v2497_v49 }
 0x63a   :  { %v4133_v35 = vpop.eup %4132 }
 0x63b   :  { %v4135_v13 = vpop.eup %4134  ;;  %v2508_v34 = vadd.f32 1.0, %v4133_v35  ;;  %4136 = vpow2.f32 %v3954_v44 }
 0x63c   :  { %v2509_v41 = vadd.f32 1.0, %v4135_v13 }
 0x63d   :  { %4138 = vrcp.f32 %v2508_v34  ;;  %v2522_v42 = vand.u32 2147483648, %v2508_v34  ;;  %v2520_v44 = vand.u32 2147483647, %v2508_v34  ;;  %vm2516_vm7 = vweird.f32 %v2508_v34 }
 0x63e   :  { %4140 = vrcp.f32 %v2509_v41  ;;  %v2537_v45 = vand.u32 2147483648, %v2509_v41  ;;  %v2535_v13 = vand.u32 2147483647, %v2509_v41  ;;  %vm2531_vm8 = vweird.f32 %v2509_v41 }
 0x63f   :  { %v2523_v36 = vor.u32 1.1754944e-38, %v2522_v42  ;;  %vm2521_vm11 = vcmp.eq.f32.partialorder %v2520_v44, 8.507059e+37 }
 0x640   :  { %vm2536_vm12 = vcmp.eq.f32.partialorder %v2535_v13, 8.507059e+37 }
 0x641   :  { %v4137_v59 = vpop.eup %4136 }
 0x642   :  { %v2510_v31 = vadd.f32 1.0, %v4137_v59 }
 0x643   :  { %v4139_v22 = vpop.eup %4138 }
 0x644   :  { %v4141_v39 = vpop.eup %4140  ;;  %v2512_v4 = vmul.f32 %v4139_v22, %v2508_v34  ;;  %4142 = vrcp.f32 %v2510_v31  ;;  %vm2517_vm5 = vweird.f32 %v4139_v22  ;;  %vm2546_vm14 = vweird.f32 %v2510_v31 }
 0x645   :  { %v2527_v25 = vmul.f32 %v4141_v39, %v2509_v41  ;;  %4144 = vtanh.f32 %v2498_v21  ;;  %vm2532_vm6 = vweird.f32 %v4141_v39  ;;  %vm2518_vm9 = vmor %vm2516_vm7, %vm2517_vm5  ;;  %v3951_v21 = vld [vmem:[%s6656_s2 + $0x2] sm:$0x3] }
 0x646   :  { %v2513_v24 = vsub.f32 1.0, %v2512_v4  ;;  %vm2533_vm10 = vmor %vm2531_vm8, %vm2532_vm6  ;;  %v2538_v4 = vor.u32 1.1754944e-38, %v2537_v45  ;;  %v2552_v45 = vand.u32 2147483648, %v2510_v31 }
 0x647   :  { %v2528_v43 = vsub.f32 1.0, %v2527_v25 }
 0x648   :  { %v2514_v49 = vmul.f32 %v4139_v22, %v2513_v24  ;;  %v2553_v44 = vor.u32 1.1754944e-38, %v2552_v45 }
 0x649   :  { %v2529_v35 = vmul.f32 %v4141_v39, %v2528_v43 }
 0x64a   :  { %v4143_v54 = vpop.eup %4142  ;;  %v2515_v59 = vadd.f32 %v4139_v22, %v2514_v49 }
 0x64b   :  { %v2542_v37 = vmul.f32 %v4143_v54, %v2510_v31  ;;  %v2530_v20 = vadd.f32 %v4141_v39, %v2529_v35  ;;  %v4145_v24 = vpop.eup %4144  ;;  %vm2547_vm13 = vweird.f32 %v4143_v54  ;;  %v2550_v35 = vand.u32 2147483647, %v2510_v31 }
 0x64c   :  { %v2519_v25 = vsel %vm2518_vm9, %v4139_v22, %v2515_v59  ;;  %vm2548_vm15 = vmor %vm2546_vm14, %vm2547_vm13 }
 0x64d   :  { %v2543_v43 = vsub.f32 1.0, %v2542_v37  ;;  %v2524_v38 = vsel %vm2521_vm11, %v2523_v36, %v2519_v25  ;;  %v2534_v1 = vsel %vm2533_vm10, %v4141_v39, %v2530_v20  ;;  %vm2551_vm1 = vcmp.eq.f32.partialorder %v2550_v35, 8.507059e+37 }
 0x64e   :  { %v2539_v49 = vsel %vm2536_vm12, %v2538_v4, %v2534_v1  ;;  %v2558_v34 = vmul.f32 %v4145_v24, %v2524_v38 }
 0x64f   :  { %v2557_v41 = vmul.f32 %v3951_v21, %v2539_v49  ;;  %v2544_v18 = vmul.f32 %v4143_v54, %v2543_v43  ;;  %v2565_v21 = vld [vmem:[#allocation2 + $0x18] sm:$0xc] }
 0x651   :  { %v6114_v8 = vadd.f32 %v2558_v34, %v2557_v41  ;;  %v2545_v42 = vadd.f32 %v4143_v54, %v2544_v18 }
 0x653   :  { %4146 = vtanh.f32 %v6114_v8  ;;  %v2549_v22 = vsel %vm2548_vm15, %v4143_v54, %v2545_v42 }
 0x654   :  { %v2554_v20 = vsel %vm2551_vm1, %v2553_v44, %v2549_v22 }
 0x659   :  { %v4147_v59 = vpop.eup %4146 }
 0x65a   :  { %v2561_v39 = vmul.f32 %v4147_v59, %v2554_v20 }
 0x65c   :  { %2582 = vmatmul.f32.vlgmr.msra.gmra.mxu0 %v2561_v39  ;;  %2602 = vmatmul.f32.vlgmr.msra.gmra.mxu1 %v2561_v39 }
 0x65d   :  { %2622 = vmatmul.f32.vlgmr.msra.gmra.mxu2 %v2561_v39  ;;  %2642 = vmatmul.f32.vlgmr.msra.gmra.mxu3 %v2561_v39 }
 0x65e   :  { %2904 = vmatpush.msra.mxu0 %v5706_v52  ;;  %2924 = vmatpush.msra.mxu1 %v5708_v3  ;;  %v6962_v52 = vld [vmem:[#allocation27_spill] sm:$0xff]  ;;  %v6963_v3 = vld [vmem:[#allocation28_spill] sm:$0xff] }
 0x65f   :  { %2944 = vmatpush.msra.mxu2 %v5710_v27  ;;  %2964 = vmatpush.msra.mxu3 %v5714_v12  ;;  %v6964_v27 = vld [vmem:[#allocation29_spill] sm:$0xff]  ;;  %v6965_v12 = vld [vmem:[#allocation30_spill] sm:$0xff] }
 0x660   :  { %2905 = vmatpush.msra.mxu0 %v5719_v14  ;;  %2925 = vmatpush.msra.mxu1 %v5721_v15  ;;  %v6966_v14 = vld [vmem:[#allocation31_spill] sm:$0xff]  ;;  %v6967_v15 = vld [vmem:[#allocation32_spill] sm:$0xff] }
 0x661   :  { %2945 = vmatpush.msra.mxu2 %v5723_v17  ;;  %2965 = vmatpush.msra.mxu3 %v5728_v26  ;;  %v6968_v17 = vld [vmem:[#allocation33_spill] sm:$0xff]  ;;  %v6969_v26 = vld [vmem:[#allocation34_spill] sm:$0xff] }
 0x662   :  { %2906 = vmatpush.msra.mxu0 %v5732_v28  ;;  %2926 = vmatpush.msra.mxu1 %v5734_v29  ;;  %v6970_v28 = vld [vmem:[#allocation25_spill] sm:$0xff]  ;;  %v6971_v29 = vld [vmem:[#allocation35_spill] sm:$0xff] }
 0x663   :  { %2946 = vmatpush.msra.mxu2 %v5736_v30  ;;  %2966 = vmatpush.msra.mxu3 %v5742_v40  ;;  %v6972_v30 = vld [vmem:[#allocation36_spill] sm:$0xff]  ;;  %v6973_v40 = vld [vmem:[#allocation37_spill] sm:$0xff] }
 0x664   :  { %2907 = vmatpush.msra.mxu0 %v5746_v46  ;;  %2927 = vmatpush.msra.mxu1 %v5748_v47  ;;  %v6974_v46 = vld [vmem:[#allocation38_spill] sm:$0xff]  ;;  %v6975_v47 = vld [vmem:[#allocation39_spill] sm:$0xff] }
 0x665   :  { %2947 = vmatpush.msra.mxu2 %v5750_v48  ;;  %2967 = vmatpush.msra.mxu3 %v5758_v56  ;;  %v6976_v48 = vld [vmem:[#allocation40_spill] sm:$0xff]  ;;  %v6977_v56 = vld [vmem:[#allocation41_spill] sm:$0xff] }
 0x666   :  { %2908 = vmatpush.msra.mxu0 %v5762_v58  ;;  %2928 = vmatpush.msra.mxu1 %v5764_v55  ;;  %v6978_v58 = vld [vmem:[#allocation42_spill] sm:$0xff]  ;;  %v6979_v55 = vld [vmem:[#allocation43_spill] sm:$0xff] }
 0x667   :  { %2948 = vmatpush.msra.mxu2 %v5766_v62  ;;  %2968 = vmatpush.msra.mxu3 %v5770_v32  ;;  %v6980_v62 = vld [vmem:[#allocation45_spill] sm:$0xff]  ;;  %v6981_v32 = vld [vmem:[#allocation46_spill] sm:$0xff] }
 0x668   :  { %2909 = vmatpush.msra.mxu0 %v5774_v53  ;;  %2929 = vmatpush.msra.mxu1 %v5776_v23  ;;  %v6982_v53 = vld [vmem:[#allocation47_spill] sm:$0xff]  ;;  %v6983_v23 = vld [vmem:[#allocation48_spill] sm:$0xff] }
 0x669   :  { %2949 = vmatpush.msra.mxu2 %v5778_v50  ;;  %2969 = vmatpush.msra.mxu3 %v5782_v33  ;;  %v6984_v50 = vld [vmem:[#allocation49_spill] sm:$0xff]  ;;  %v6985_v33 = vld [vmem:[#allocation50_spill] sm:$0xff] }
 0x66a   :  { %2910 = vmatpush.msra.mxu0 %v5790_v2  ;;  %2930 = vmatpush.msra.mxu1 %v5792_v11  ;;  %v6986_v2 = vld [vmem:[#allocation51_spill] sm:$0xff] }
 0x66b   :  { %2950 = vmatpush.msra.mxu2 %v5794_v61  ;;  %2970 = vmatpush.msra.mxu3 %v5800_v63 }
 0x66c   :  { %2911 = vmatpush.msra.mxu0 %v5805_v5  ;;  %2931 = vmatpush.msra.mxu1 %v5807_v6  ;;  %v2562_v6 = vld [vmem:[#allocation2] sm:$0xc] }
 0x66d   :  { %2951 = vmatpush.msra.mxu2 %v5809_v60  ;;  %2971 = vmatpush.msra.mxu3 %v5814_v57  ;;  %v2563_v60 = vld [vmem:[#allocation2 + $0x8] sm:$0xc] }
 0x66e   :  { %2912 = vmatpush.msra.mxu0 %v5816_v51  ;;  %2932 = vmatpush.msra.mxu1 %v5818_v7 }
 0x66f   :  { %2952 = vmatpush.msra.mxu2 %v5827_v9  ;;  %2972 = vmatpush.msra.mxu3 %v5829_v10 }
 0x670   :  { %2913 = vmatpush.msra.mxu0 %v5831_v19  ;;  %2933 = vmatpush.msra.mxu1 %v6937_v0  ;;  %v2564_v0 = vld [vmem:[#allocation2 + $0x10] sm:$0xc] }
 0x671   :  { %2953 = vmatpush.msra.mxu2 %v6938_v16  ;;  %2973 = vmatpush.msra.mxu3 %v6962_v52 }
 0x672   :  { %2914 = vmatpush.msra.mxu0 %v6963_v3  ;;  %2934 = vmatpush.msra.mxu1 %v6964_v27 }
 0x673   :  { %2954 = vmatpush.msra.mxu2 %v6965_v12  ;;  %2974 = vmatpush.msra.mxu3 %v6966_v14  ;;  %v2721_v14 = vrot.slane %v6114_v8, 6 }
 0x674   :  { %2915 = vmatpush.msra.mxu0 %v6967_v15  ;;  %2935 = vmatpush.msra.mxu1 %v6968_v17 }
 0x675   :  { %2955 = vmatpush.msra.mxu2 %v6969_v26  ;;  %2975 = vmatpush.msra.mxu3 %v6970_v28 }
 0x676   :  { %2916 = vmatpush.msra.mxu0 %v6971_v29  ;;  %2936 = vmatpush.msra.mxu1 %v6972_v30 }
 0x677   :  { %2956 = vmatpush.msra.mxu2 %v6973_v40  ;;  %2976 = vmatpush.msra.mxu3 %v6974_v46 }
 0x678   :  { %2917 = vmatpush.msra.mxu0 %v6975_v47  ;;  %2937 = vmatpush.msra.mxu1 %v6976_v48 }
 0x679   :  { %2957 = vmatpush.msra.mxu2 %v6977_v56  ;;  %2977 = vmatpush.msra.mxu3 %v6978_v58 }
 0x67a   :  { %2918 = vmatpush.msra.mxu0 %v6979_v55  ;;  %2938 = vmatpush.msra.mxu1 %v6980_v62 }
 0x67b   :  { %2958 = vmatpush.msra.mxu2 %v6981_v32  ;;  %2978 = vmatpush.msra.mxu3 %v6982_v53 }
 0x67c   :  { %2919 = vmatpush.msra.mxu0 %v6983_v23  ;;  %2939 = vmatpush.msra.mxu1 %v6984_v50 }
 0x67d   :  { %2959 = vmatpush.msra.mxu2 %v6985_v33  ;;  %2979 = vmatpush.msra.mxu3 %v6986_v2 }
 0x6d9   :  { %v2583_v11 = vpop.f32.mrf.mxu0  ;;  %v2603_v61 = vpop.f32.mrf.mxu1 }
 0x6da   :  { %v2650_v63 = vrot.slane %v2583_v11, 6  ;;  %v2651_v5 = vrot.slane %v2603_v61, 6 }
 0x6dc   :  { %v2658_v57 = vadd.f32 %v2650_v63, %v2562_v6  ;;  %v2659_v51 = vadd.f32 %v2651_v5, %v2563_v60 }
 0x6de   :  { %v3955_v7 = vmul.f32 -1.442695, %v2658_v57  ;;  %v3956_v9 = vmul.f32 -1.442695, %v2659_v51 }
 0x6e0   :  { %4148 = vpow2.f32 %v3955_v7  ;;  %v2623_v10 = vpop.f32.mrf.mxu2  ;;  %v2643_v13 = vpop.f32.mrf.mxu3 }
 0x6e1   :  { %4150 = vpow2.f32 %v3956_v9  ;;  %v2652_v19 = vrot.slane %v2623_v10, 6  ;;  %v2653_v37 = vrot.slane %v2643_v13, 6  ;;  %v6209_v13 = vld [vmem:[#allocation12 + $0x1a0] sm:$0xff] }
 0x6e3   :  { %v2660_v16 = vadd.f32 %v2652_v19, %v2564_v0  ;;  %v2661_v24 = vadd.f32 %v2653_v37, %v2565_v21  ;;  %v6185_v19 = vld [vmem:[#allocation12 + $0x1e0] sm:$0xff]  ;;  %v6188_v0 = vld [vmem:[#allocation12 + $0x1e8] sm:$0xff] }
 0x6e4   :  { %v6212_v37 = vld [vmem:[#allocation12 + $0x1a8] sm:$0xff]  ;;  %v6221_v21 = vld [vmem:[#allocation12 + $0x180] sm:$0xff] }
 0x6e5   :  { %v3957_v18 = vmul.f32 -1.442695, %v2660_v16  ;;  %v6191_v16 = vld [vmem:[#allocation12 + $0x1f0] sm:$0xff] }
 0x6e6   :  { %v4149_v1 = vpop.eup %4148 }
 0x6e7   :  { %v4151_v38 = vpop.eup %4150  ;;  %v2671_v54 = vadd.f32 1.0, %v4149_v1  ;;  %4152 = vpow2.f32 %v3957_v18  ;;  %v6194_v18 = vld [vmem:[#allocation12 + $0x1f8] sm:$0xff]  ;;  %v6197_v1 = vld [vmem:[#allocation12 + $0x1c0] sm:$0xff] }
 0x6e8   :  { %v2672_v31 = vadd.f32 1.0, %v4151_v38  ;;  %v6200_v38 = vld [vmem:[#allocation12 + $0x1c8] sm:$0xff] }
 0x6e9   :  { %4154 = vrcp.f32 %v2671_v54  ;;  %v2685_v45 = vand.u32 2147483648, %v2671_v54  ;;  %v2683_v44 = vand.u32 2147483647, %v2671_v54  ;;  %vm2679_vm4 = vweird.f32 %v2671_v54 }
 0x6ea   :  { %4156 = vrcp.f32 %v2672_v31  ;;  %v2700_v35 = vand.u32 2147483648, %v2672_v31  ;;  %v2698_v20 = vand.u32 2147483647, %v2672_v31  ;;  %vm2694_vm0 = vweird.f32 %v2672_v31 }
 0x6eb   :  { %v2686_v27 = vor.u32 1.1754944e-38, %v2685_v45  ;;  %vm2684_vm7 = vcmp.eq.f32.partialorder %v2683_v44, 8.507059e+37  ;;  %v6245_v45 = vld [vmem:[#allocation12 + $0x140] sm:$0xff]  ;;  %v6254_v44 = vld [vmem:[#allocation12 + $0x158] sm:$0xff] }
 0x6ec   :  { %v2701_v15 = vor.u32 1.1754944e-38, %v2700_v35  ;;  %vm2699_vm8 = vcmp.eq.f32.partialorder %v2698_v20, 8.507059e+37  ;;  %v6248_v35 = vld [vmem:[#allocation12 + $0x148] sm:$0xff] }
 0x6ed   :  { %v4153_v36 = vpop.eup %4152  ;;  %v6260_v20 = vld [vmem:[#allocation12 + $0x128] sm:$0xff] }
 0x6ee   :  { %v2673_v4 = vadd.f32 1.0, %v4153_v36  ;;  %v6215_v36 = vld [vmem:[#allocation12 + $0x1b0] sm:$0xff] }
 0x6ef   :  { %v4155_v25 = vpop.eup %4154 }
 0x6f0   :  { %v4157_v43 = vpop.eup %4156  ;;  %v2675_v49 = vmul.f32 %v4155_v25, %v2671_v54  ;;  %4158 = vrcp.f32 %v2673_v4  ;;  %vm2680_vm2 = vweird.f32 %v4155_v25  ;;  %v2715_v8 = vand.u32 2147483648, %v2673_v4  ;;  %v6203_v54 = vld [vmem:[#allocation12 + $0x1d0] sm:$0xff] }
 0x6f1   :  { %v2690_v34 = vmul.f32 %v4157_v43, %v2672_v31  ;;  %4160 = vtanh.f32 %v2661_v24  ;;  %vm2695_vm3 = vweird.f32 %v4157_v43  ;;  %vm2681_vm5 = vmor %vm2679_vm4, %vm2680_vm2  ;;  %vm2709_vm10 = vweird.f32 %v2673_v4  ;;  %v6206_v31 = vld [vmem:[#allocation12 + $0x1d8] sm:$0xff]  ;;  %v6227_v24 = vld [vmem:[#allocation12 + $0x190] sm:$0xff] }
 0x6f2   :  { %v2676_v41 = vsub.f32 1.0, %v2675_v49  ;;  %vm2696_vm6 = vmor %vm2694_vm0, %vm2695_vm3  ;;  %v2713_v6 = vand.u32 2147483647, %v2673_v4  ;;  %v2716_v57 = vor.u32 1.1754944e-38, %v2715_v8  ;;  %v6233_v49 = vld [vmem:[#allocation12 + $0x160] sm:$0xff]  ;;  %v6314_v8 = vld [vmem:[#allocation12 + $0xb8] sm:$0xff] }
 0x6f3   :  { %v2691_v42 = vsub.f32 1.0, %v2690_v34  ;;  %v6236_v34 = vld [vmem:[#allocation12 + $0x168] sm:$0xff]  ;;  %6993 = vst [vmem:[#allocation30_spill] sm:$0xff] %v6314_v8 }
 0x6f4   :  { %v2677_v22 = vmul.f32 %v4155_v25, %v2676_v41  ;;  %vm2714_vm12 = vcmp.eq.f32.partialorder %v2713_v6, 8.507059e+37  ;;  %v6239_v41 = vld [vmem:[#allocation12 + $0x170] sm:$0xff]  ;;  %v6317_v6 = vld [vmem:[#allocation12 + $0x80] sm:$0xff] }
 0x6f5   :  { %v2692_v59 = vmul.f32 %v4157_v43, %v2691_v42  ;;  %v6242_v42 = vld [vmem:[#allocation12 + $0x178] sm:$0xff]  ;;  %6994 = vst [vmem:[#allocation31_spill] sm:$0xff] %v6317_v6 }
 0x6f6   :  { %v4159_v39 = vpop.eup %4158  ;;  %v2678_v52 = vadd.f32 %v4155_v25, %v2677_v22  ;;  %v6251_v22 = vld [vmem:[#allocation12 + $0x150] sm:$0xff] }
 0x6f7   :  { %v2705_v3 = vmul.f32 %v4159_v39, %v2673_v4  ;;  %v2693_v12 = vadd.f32 %v4157_v43, %v2692_v59  ;;  %v4161_v26 = vpop.eup %4160  ;;  %vm2710_vm9 = vweird.f32 %v4159_v39  ;;  %v6218_v4 = vld [vmem:[#allocation12 + $0x1b8] sm:$0xff]  ;;  %v6257_v59 = vld [vmem:[#allocation12 + $0x120] sm:$0xff] }
 0x6f8   :  { %v2682_v17 = vsel %vm2681_vm5, %v4155_v25, %v2678_v52  ;;  %vm2711_vm11 = vmor %vm2709_vm10, %vm2710_vm9  ;;  %v6224_v25 = vld [vmem:[#allocation12 + $0x188] sm:$0xff]  ;;  %v6266_v52 = vld [vmem:[#allocation12 + $0x138] sm:$0xff] }
 0x6f9   :  { %v2706_v28 = vsub.f32 1.0, %v2705_v3  ;;  %v2687_v29 = vsel %vm2684_vm7, %v2686_v27, %v2682_v17  ;;  %v2697_v30 = vsel %vm2696_vm6, %v4157_v43, %v2693_v12  ;;  %v6230_v43 = vld [vmem:[#allocation12 + $0x198] sm:$0xff]  ;;  %v6269_v3 = vld [vmem:[#allocation12 + $0x100] sm:$0xff]  ;;  %v6272_v27 = vld [vmem:[#allocation12 + $0x108] sm:$0xff] }
 0x6fa   :  { %v2702_v40 = vsel %vm2699_vm8, %v2701_v15, %v2697_v30  ;;  %v2724_v46 = vmul.f32 %v4161_v26, %v2687_v29  ;;  %v6275_v12 = vld [vmem:[#allocation12 + $0x110] sm:$0xff]  ;;  %v6281_v15 = vld [vmem:[#allocation12 + $0xe0] sm:$0xff]  ;;  %v6284_v17 = vld [vmem:[#allocation12 + $0xe8] sm:$0xff] }
 0x6fb   :  { %v2723_v11 = vmul.f32 %v2721_v14, %v2702_v40  ;;  %v2707_v61 = vmul.f32 %v4159_v39, %v2706_v28  ;;  %v6278_v14 = vld [vmem:[#allocation12 + $0x118] sm:$0xff]  ;;  %v6287_v26 = vld [vmem:[#allocation12 + $0xf0] sm:$0xff]  ;;  %v6293_v29 = vld [vmem:[#allocation12 + $0xc0] sm:$0xff] }
 0x6fc   :  { %v6290_v28 = vld [vmem:[#allocation12 + $0xf8] sm:$0xff]  ;;  %v6296_v30 = vld [vmem:[#allocation12 + $0xc8] sm:$0xff]  ;;  %v6299_v40 = vld [vmem:[#allocation12 + $0xd0] sm:$0xff] }
 0x6fd   :  { %v6182_v63 = vadd.f32 %v2724_v46, %v2723_v11  ;;  %v2708_v5 = vadd.f32 %v4159_v39, %v2707_v61  ;;  %6987 = vst [vmem:[#allocation24_spill] sm:$0xff] %v6296_v30  ;;  %v6302_v46 = vld [vmem:[#allocation12 + $0xd8] sm:$0xff]  ;;  %v6305_v11 = vld [vmem:[#allocation12 + $0xa0] sm:$0xff]  ;;  %v6308_v61 = vld [vmem:[#allocation12 + $0xa8] sm:$0xff] }
 0x6fe   :  { %6988 = vst [vmem:[#allocation26_spill] sm:$0xff] %v6299_v40 }
 0x6ff   :  { %4162 = vtanh.f32 %v6182_v63  ;;  %v2712_v60 = vsel %vm2711_vm11, %v4159_v39, %v2708_v5  ;;  %v6263_v39 = vld [vmem:[#allocation12 + $0x130] sm:$0xff]  ;;  %6989 = vst [vmem:[#allocation44_spill] sm:$0xff] %v6302_v46 }
 0x700   :  { %v2717_v7 = vsel %vm2714_vm12, %v2716_v57, %v2712_v60  ;;  %6990 = vst [vmem:[#allocation27_spill] sm:$0xff] %v6305_v11  ;;  %v6311_v5 = vld [vmem:[#allocation12 + $0xb0] sm:$0xff]  ;;  %v6320_v60 = vld [vmem:[#allocation12 + $0x88] sm:$0xff] }
 0x701   :  { %6991 = vst [vmem:[#allocation28_spill] sm:$0xff] %v6308_v61  ;;  %v6323_v57 = vld [vmem:[#allocation12 + $0x90] sm:$0xff] }
 0x702   :  { %6992 = vst [vmem:[#allocation29_spill] sm:$0xff] %v6311_v5 }
 0x703   :  { %6995 = vst [vmem:[#allocation32_spill] sm:$0xff] %v6320_v60 }
 0x704   :  { %6996 = vst [vmem:[#allocation33_spill] sm:$0xff] %v6323_v57 }
 0x705   :  { %v4163_v51 = vpop.eup %4162 }
 0x706   :  { %v2727_v9 = vmul.f32 %v4163_v51, %v2717_v7  ;;  %v6326_v51 = vld [vmem:[#allocation12 + $0x98] sm:$0xff]  ;;  %v6329_v7 = vld [vmem:[#allocation12 + $0x60] sm:$0xff] }
 0x707   :  { %6997 = vst [vmem:[#allocation34_spill] sm:$0xff] %v6326_v51 }
 0x708   :  { %v2733_v10 = vrot.slane %v2727_v9, 2  ;;  %6998 = vst [vmem:[#allocation25_spill] sm:$0xff] %v6329_v7  ;;  %v6332_v9 = vld [vmem:[#allocation12 + $0x68] sm:$0xff] }
 0x709   :  { %6999 = vst [vmem:[#allocation35_spill] sm:$0xff] %v6332_v9 }
 0x70a   :  { %2751 = vmatmul.f32.vlgmr.msrb.gmra.mxu0 %v2733_v10  ;;  %2771 = vmatmul.f32.vlgmr.msrb.gmra.mxu1 %v2733_v10 }
 0x70b   :  { %2791 = vmatmul.f32.vlgmr.msrb.gmra.mxu2 %v2733_v10  ;;  %2811 = vmatmul.f32.vlgmr.msrb.gmra.mxu3 %v2733_v10  ;;  %v6335_v10 = vld [vmem:[#allocation12 + $0x70] sm:$0xff] }
 0x70c   :  { %3073 = vmatpush.msrb.mxu0 %v6185_v19  ;;  %3093 = vmatpush.msrb.mxu1 %v6188_v0  ;;  %7000 = vst [vmem:[#allocation36_spill] sm:$0xff] %v6335_v10 }
 0x70d   :  { %3113 = vmatpush.msrb.mxu2 %v6191_v16  ;;  %3133 = vmatpush.msrb.mxu3 %v6194_v18 }
 0x70e   :  { %3074 = vmatpush.msrb.mxu0 %v6197_v1  ;;  %3094 = vmatpush.msrb.mxu1 %v6200_v38 }
 0x70f   :  { %3114 = vmatpush.msrb.mxu2 %v6203_v54  ;;  %3134 = vmatpush.msrb.mxu3 %v6206_v31 }
 0x710   :  { %3075 = vmatpush.msrb.mxu0 %v6209_v13  ;;  %3095 = vmatpush.msrb.mxu1 %v6212_v37 }
 0x711   :  { %3115 = vmatpush.msrb.mxu2 %v6215_v36  ;;  %3135 = vmatpush.msrb.mxu3 %v6218_v4 }
 0x712   :  { %3076 = vmatpush.msrb.mxu0 %v6221_v21  ;;  %3096 = vmatpush.msrb.mxu1 %v6224_v25 }
 0x713   :  { %3116 = vmatpush.msrb.mxu2 %v6227_v24  ;;  %3136 = vmatpush.msrb.mxu3 %v6230_v43 }
 0x714   :  { %3077 = vmatpush.msrb.mxu0 %v6233_v49  ;;  %3097 = vmatpush.msrb.mxu1 %v6236_v34 }
 0x715   :  { %3117 = vmatpush.msrb.mxu2 %v6239_v41  ;;  %3137 = vmatpush.msrb.mxu3 %v6242_v42 }
 0x716   :  { %3078 = vmatpush.msrb.mxu0 %v6245_v45  ;;  %3098 = vmatpush.msrb.mxu1 %v6248_v35 }
 0x717   :  { %3118 = vmatpush.msrb.mxu2 %v6251_v22  ;;  %3138 = vmatpush.msrb.mxu3 %v6254_v44 }
 0x718   :  { %3079 = vmatpush.msrb.mxu0 %v6257_v59  ;;  %3099 = vmatpush.msrb.mxu1 %v6260_v20 }
 0x719   :  { %3119 = vmatpush.msrb.mxu2 %v6263_v39  ;;  %3139 = vmatpush.msrb.mxu3 %v6266_v52 }
 0x71a   :  { %3080 = vmatpush.msrb.mxu0 %v6269_v3  ;;  %3100 = vmatpush.msrb.mxu1 %v6272_v27 }
 0x71b   :  { %3120 = vmatpush.msrb.mxu2 %v6275_v12  ;;  %3140 = vmatpush.msrb.mxu3 %v6278_v14 }
 0x71c   :  { %3081 = vmatpush.msrb.mxu0 %v6281_v15  ;;  %3101 = vmatpush.msrb.mxu1 %v6284_v17 }
 0x71d   :  { %3121 = vmatpush.msrb.mxu2 %v6287_v26  ;;  %3141 = vmatpush.msrb.mxu3 %v6290_v28 }
 0x71e   :  { %3082 = vmatpush.msrb.mxu0 %v6293_v29  ;;  %3102 = vmatpush.msrb.mxu1 %v6296_v30 }
 0x71f   :  { %3122 = vmatpush.msrb.mxu2 %v6299_v40  ;;  %3142 = vmatpush.msrb.mxu3 %v6302_v46 }
 0x720   :  { %3083 = vmatpush.msrb.mxu0 %v6305_v11  ;;  %3103 = vmatpush.msrb.mxu1 %v6308_v61 }
 0x721   :  { %3123 = vmatpush.msrb.mxu2 %v6311_v5  ;;  %3143 = vmatpush.msrb.mxu3 %v6314_v8 }
 0x722   :  { %3084 = vmatpush.msrb.mxu0 %v6317_v6  ;;  %3104 = vmatpush.msrb.mxu1 %v6320_v60  ;;  %v6338_v60 = vld [vmem:[#allocation12 + $0x78] sm:$0xff] }
 0x723   :  { %3124 = vmatpush.msrb.mxu2 %v6323_v57  ;;  %3144 = vmatpush.msrb.mxu3 %v6326_v51  ;;  %7001 = vst [vmem:[#allocation37_spill] sm:$0xff] %v6338_v60 }
 0x724   :  { %3085 = vmatpush.msrb.mxu0 %v6329_v7  ;;  %3105 = vmatpush.msrb.mxu1 %v6332_v9  ;;  %v2730_v7 = vld [vmem:[#allocation2 + $0x10] sm:$0x30] }
 0x725   :  { %3125 = vmatpush.msrb.mxu2 %v6335_v10  ;;  %3145 = vmatpush.msrb.mxu3 %v6338_v60  ;;  %v2728_v60 = vld [vmem:[#allocation2] sm:$0x30] }
 0x726   :  { %3086 = vmatpush.msrb.mxu0 %v6975_v47  ;;  %3106 = vmatpush.msrb.mxu1 %v6976_v48 }
 0x727   :  { %3126 = vmatpush.msrb.mxu2 %v6977_v56  ;;  %3146 = vmatpush.msrb.mxu3 %v6978_v58 }
 0x728   :  { %3087 = vmatpush.msrb.mxu0 %v6979_v55  ;;  %3107 = vmatpush.msrb.mxu1 %v6980_v62  ;;  %v2729_v55 = vld [vmem:[#allocation2 + $0x8] sm:$0x30] }
 0x729   :  { %3127 = vmatpush.msrb.mxu2 %v6981_v32  ;;  %3147 = vmatpush.msrb.mxu3 %v6982_v53 }
 0x72a   :  { %3088 = vmatpush.msrb.mxu0 %v6983_v23  ;;  %3108 = vmatpush.msrb.mxu1 %v6984_v50 }
 0x72b   :  { %3128 = vmatpush.msrb.mxu2 %v6985_v33  ;;  %3148 = vmatpush.msrb.mxu3 %v6986_v2 }
 0x787   :  { %v2752_v47 = vpop.f32.mrf.mxu0  ;;  %v2772_v48 = vpop.f32.mrf.mxu1 }
 0x788   :  { %v2819_v56 = vrot.slane %v2752_v47, 4  ;;  %v2820_v58 = vrot.slane %v2772_v48, 4 }
 0x78a   :  { %v2827_v10 = vadd.f32 %v2819_v56, %v2728_v60  ;;  %v2828_v62 = vadd.f32 %v2820_v58, %v2729_v55 }
 0x78c   :  { %v3958_v9 = vmul.f32 -1.442695, %v2827_v10  ;;  %v3959_v32 = vmul.f32 -1.442695, %v2828_v62  ;;  %v2731_v10 = vld [vmem:[#allocation2 + $0x18] sm:$0x30] }
 0x78e   :  { %4164 = vpow2.f32 %v3958_v9  ;;  %v2792_v53 = vpop.f32.mrf.mxu2  ;;  %v2812_v47 = vpop.f32.mrf.mxu3 }
 0x78f   :  { %4166 = vpow2.f32 %v3959_v32  ;;  %v2821_v23 = vrot.slane %v2792_v53, 4  ;;  %v2822_v48 = vrot.slane %v2812_v47, 4 }
 0x791   :  { %v2829_v50 = vadd.f32 %v2821_v23, %v2730_v7  ;;  %v2830_v9 = vadd.f32 %v2822_v48, %v2731_v10 }
 0x793   :  { %v3960_v51 = vmul.f32 -1.442695, %v2829_v50 }
 0x794   :  { %v4165_v33 = vpop.eup %4164 }
 0x795   :  { %v4167_v57 = vpop.eup %4166  ;;  %v2840_v2 = vadd.f32 1.0, %v4165_v33  ;;  %4168 = vpow2.f32 %v3960_v51 }
 0x796   :  { %v2841_v6 = vadd.f32 1.0, %v4167_v57 }
 0x797   :  { %4170 = vrcp.f32 %v2840_v2  ;;  %v2854_v23 = vand.u32 2147483648, %v2840_v2  ;;  %v2852_v57 = vand.u32 2147483647, %v2840_v2  ;;  %vm2848_vm15 = vweird.f32 %v2840_v2 }
 0x798   :  { %4172 = vrcp.f32 %v2841_v6  ;;  %v2869_v50 = vand.u32 2147483648, %v2841_v6  ;;  %v2867_v47 = vand.u32 2147483647, %v2841_v6  ;;  %vm2863_vm1 = vweird.f32 %v2841_v6 }
 0x799   :  { %v2855_v10 = vor.u32 1.1754944e-38, %v2854_v23  ;;  %vm2853_vm4 = vcmp.eq.f32.partialorder %v2852_v57, 8.507059e+37 }
 0x79a   :  { %vm2868_vm0 = vcmp.eq.f32.partialorder %v2867_v47, 8.507059e+37  ;;  %v7009_v47 = vld [vmem:[#allocation31_spill] sm:$0xff] }
 0x79b   :  { %v4169_v60 = vpop.eup %4168 }
 0x79c   :  { %v2842_v56 = vadd.f32 1.0, %v4169_v60 }
 0x79d   :  { %v4171_v58 = vpop.eup %4170 }
 0x79e   :  { %v4173_v55 = vpop.eup %4172  ;;  %v2844_v62 = vmul.f32 %v4171_v58, %v2840_v2  ;;  %4174 = vrcp.f32 %v2842_v56  ;;  %vm2849_vm13 = vweird.f32 %v4171_v58  ;;  %vm2878_vm6 = vweird.f32 %v2842_v56 }
 0x79f   :  { %v2859_v32 = vmul.f32 %v4173_v55, %v2841_v6  ;;  %4176 = vtanh.f32 %v2830_v9  ;;  %vm2864_vm14 = vweird.f32 %v4173_v55  ;;  %vm2850_vm2 = vmor %vm2848_vm15, %vm2849_vm13  ;;  %v2882_v23 = vand.u32 2147483647, %v2842_v56 }
 0x7a0   :  { %v2845_v7 = vsub.f32 1.0, %v2844_v62  ;;  %v2890_v62 = vrot.slane %v6182_v63, 6  ;;  %vm2865_vm3 = vmor %vm2863_vm1, %vm2864_vm14  ;;  %v2884_v63 = vand.u32 2147483648, %v2842_v56 }
 0x7a1   :  { %v2860_v53 = vsub.f32 1.0, %v2859_v32  ;;  %v2870_v32 = vor.u32 1.1754944e-38, %v2869_v50  ;;  %vm2883_vm8 = vcmp.eq.f32.partialorder %v2882_v23, 8.507059e+37  ;;  %v6421_v23 = vld [vmem:[#allocation12 + $0x20] sm:$0xff] }
 0x7a2   :  { %v2846_v51 = vmul.f32 %v4171_v58, %v2845_v7  ;;  %v2885_v50 = vor.u32 1.1754944e-38, %v2884_v63  ;;  %v6418_v63 = vld [vmem:[#allocation12 + $0x58] sm:$0xff]  ;;  %7021 = vst [vmem:[#allocation42_spill] sm:$0xff] %v6421_v23 }
 0x7a3   :  { %v2861_v33 = vmul.f32 %v4173_v55, %v2860_v53  ;;  %7020 = vst [vmem:[#allocation41_spill] sm:$0xff] %v6418_v63 }
 0x7a4   :  { %v4175_v8 = vpop.eup %4174  ;;  %v2847_v60 = vadd.f32 %v4171_v58, %v2846_v51 }
 0x7a5   :  { %v2874_v48 = vmul.f32 %v4175_v8, %v2842_v56  ;;  %v2862_v5 = vadd.f32 %v4173_v55, %v2861_v33  ;;  %v4177_v7 = vpop.eup %4176  ;;  %vm2879_vm5 = vweird.f32 %v4175_v8  ;;  %v7008_v56 = vld [vmem:[#allocation30_spill] sm:$0xff] }
 0x7a6   :  { %v2851_v9 = vsel %vm2850_vm2, %v4171_v58, %v2847_v60  ;;  %vm2880_vm7 = vmor %vm2878_vm6, %vm2879_vm5  ;;  %v7010_v60 = vld [vmem:[#allocation32_spill] sm:$0xff] }
 0x7a7   :  { %v2875_v61 = vsub.f32 1.0, %v2874_v48  ;;  %v2856_v11 = vsel %vm2853_vm4, %v2855_v10, %v2851_v9  ;;  %v2866_v53 = vsel %vm2865_vm3, %v4173_v55, %v2862_v5  ;;  %v7011_v48 = vld [vmem:[#allocation33_spill] sm:$0xff]  ;;  %v7012_v10 = vld [vmem:[#allocation34_spill] sm:$0xff]  ;;  %v7015_v9 = vld [vmem:[#allocation36_spill] sm:$0xff] }
 0x7a8   :  { %v2871_v46 = vsel %vm2868_vm0, %v2870_v32, %v2866_v53  ;;  %v2893_v40 = vmul.f32 %v4177_v7, %v2856_v11  ;;  %v7005_v11 = vld [vmem:[#allocation27_spill] sm:$0xff]  ;;  %v7016_v7 = vld [vmem:[#allocation37_spill] sm:$0xff] }
 0x7a9   :  { %v2892_v51 = vmul.f32 %v2890_v62, %v2871_v46  ;;  %v2876_v2 = vmul.f32 %v4175_v8, %v2875_v61  ;;  %v7004_v46 = vld [vmem:[#allocation44_spill] sm:$0xff]  ;;  %v7013_v62 = vld [vmem:[#allocation25_spill] sm:$0xff]  ;;  %v7014_v32 = vld [vmem:[#allocation35_spill] sm:$0xff] }
 0x7aa   :  { %v7006_v61 = vld [vmem:[#allocation28_spill] sm:$0xff]  ;;  %v6409_v53 = vld [vmem:[#allocation12 + $0x40] sm:$0xff] }
 0x7ab   :  { %v6354_v6 = vadd.f32 %v2893_v40, %v2892_v51  ;;  %v2877_v30 = vadd.f32 %v4175_v8, %v2876_v2  ;;  %v7003_v40 = vld [vmem:[#allocation26_spill] sm:$0xff]  ;;  %7017 = vst [vmem:[#allocation38_spill] sm:$0xff] %v6409_v53  ;;  %v6412_v51 = vld [vmem:[#allocation12 + $0x48] sm:$0xff]  ;;  %v6415_v2 = vld [vmem:[#allocation12 + $0x50] sm:$0xff] }
 0x7ac   :  { %7018 = vst [vmem:[#allocation39_spill] sm:$0xff] %v6412_v51 }
 0x7ad   :  { %4178 = vtanh.f32 %v6354_v6  ;;  %v2881_v58 = vsel %vm2880_vm7, %v4175_v8, %v2877_v30  ;;  %v7002_v30 = vld [vmem:[#allocation24_spill] sm:$0xff]  ;;  %v7007_v8 = vld [vmem:[#allocation29_spill] sm:$0xff]  ;;  %7019 = vst [vmem:[#allocation40_spill] sm:$0xff] %v6415_v2 }
 0x7ae   :  { %v2886_v5 = vsel %vm2883_vm8, %v2885_v50, %v2881_v58  ;;  %v6424_v58 = vld [vmem:[#allocation12 + $0x28] sm:$0xff]  ;;  %v6427_v50 = vld [vmem:[#allocation12 + $0x30] sm:$0xff] }
 0x7af   :  { %7022 = vst [vmem:[#allocation43_spill] sm:$0xff] %v6424_v58 }
 0x7b0   :  { %7023 = vst [vmem:[#allocation45_spill] sm:$0xff] %v6427_v50 }
 0x7b3   :  { %v4179_v57 = vpop.eup %4178 }
 0x7b4   :  { %v2896_v55 = vmul.f32 %v4179_v57, %v2886_v5  ;;  %v6430_v57 = vld [vmem:[#allocation12 + $0x38] sm:$0xff]  ;;  %v6433_v5 = vld [vmem:[#allocation12] sm:$0xff] }
 0x7b5   :  { %7024 = vst [vmem:[#allocation46_spill] sm:$0xff] %v6430_v57 }
 0x7b6   :  { %v2902_v33 = vrot.slane %v2896_v55, 4  ;;  %7025 = vst [vmem:[#allocation47_spill] sm:$0xff] %v6433_v5  ;;  %v6436_v55 = vld [vmem:[#allocation12 + $0x8] sm:$0xff] }
 0x7b7   :  { %7026 = vst [vmem:[#allocation48_spill] sm:$0xff] %v6436_v55 }
 0x7b8   :  { %2920 = vmatmul.f32.vlgmr.msra.gmra.mxu0 %v2902_v33  ;;  %2940 = vmatmul.f32.vlgmr.msra.gmra.mxu1 %v2902_v33 }
 0x7b9   :  { %2960 = vmatmul.f32.vlgmr.msra.gmra.mxu2 %v2902_v33  ;;  %2980 = vmatmul.f32.vlgmr.msra.gmra.mxu3 %v2902_v33  ;;  %v6439_v33 = vld [vmem:[#allocation12 + $0x10] sm:$0xff] }
 0x7ba   :  { %3227 = vmatpush.msra.mxu0 %v6185_v19  ;;  %3247 = vmatpush.msra.mxu1 %v6188_v0  ;;  %7027 = vst [vmem:[#allocation49_spill] sm:$0xff] %v6439_v33 }
 0x7bb   :  { %3267 = vmatpush.msra.mxu2 %v6191_v16  ;;  %3287 = vmatpush.msra.mxu3 %v6194_v18 }
 0x7bc   :  { %3228 = vmatpush.msra.mxu0 %v6197_v1  ;;  %3248 = vmatpush.msra.mxu1 %v6200_v38 }
 0x7bd   :  { %3268 = vmatpush.msra.mxu2 %v6203_v54  ;;  %3288 = vmatpush.msra.mxu3 %v6206_v31 }
 0x7be   :  { %3229 = vmatpush.msra.mxu0 %v6209_v13  ;;  %3249 = vmatpush.msra.mxu1 %v6212_v37 }
 0x7bf   :  { %3269 = vmatpush.msra.mxu2 %v6215_v36  ;;  %3289 = vmatpush.msra.mxu3 %v6218_v4 }
 0x7c0   :  { %3230 = vmatpush.msra.mxu0 %v6221_v21  ;;  %3250 = vmatpush.msra.mxu1 %v6224_v25 }
 0x7c1   :  { %3270 = vmatpush.msra.mxu2 %v6227_v24  ;;  %3290 = vmatpush.msra.mxu3 %v6230_v43 }
 0x7c2   :  { %3231 = vmatpush.msra.mxu0 %v6233_v49  ;;  %3251 = vmatpush.msra.mxu1 %v6236_v34 }
 0x7c3   :  { %3271 = vmatpush.msra.mxu2 %v6239_v41  ;;  %3291 = vmatpush.msra.mxu3 %v6242_v42 }
 0x7c4   :  { %3232 = vmatpush.msra.mxu0 %v6245_v45  ;;  %3252 = vmatpush.msra.mxu1 %v6248_v35 }
 0x7c5   :  { %3272 = vmatpush.msra.mxu2 %v6251_v22  ;;  %3292 = vmatpush.msra.mxu3 %v6254_v44 }
 0x7c6   :  { %3233 = vmatpush.msra.mxu0 %v6257_v59  ;;  %3253 = vmatpush.msra.mxu1 %v6260_v20 }
 0x7c7   :  { %3273 = vmatpush.msra.mxu2 %v6263_v39  ;;  %3293 = vmatpush.msra.mxu3 %v6266_v52 }
 0x7c8   :  { %3234 = vmatpush.msra.mxu0 %v6269_v3  ;;  %3254 = vmatpush.msra.mxu1 %v6272_v27 }
 0x7c9   :  { %3274 = vmatpush.msra.mxu2 %v6275_v12  ;;  %3294 = vmatpush.msra.mxu3 %v6278_v14 }
 0x7ca   :  { %3235 = vmatpush.msra.mxu0 %v6281_v15  ;;  %3255 = vmatpush.msra.mxu1 %v6284_v17 }
 0x7cb   :  { %3275 = vmatpush.msra.mxu2 %v6287_v26  ;;  %3295 = vmatpush.msra.mxu3 %v6290_v28 }
 0x7cc   :  { %3236 = vmatpush.msra.mxu0 %v6293_v29  ;;  %3256 = vmatpush.msra.mxu1 %v7002_v30 }
 0x7cd   :  { %3276 = vmatpush.msra.mxu2 %v7003_v40  ;;  %3296 = vmatpush.msra.mxu3 %v7004_v46 }
 0x7ce   :  { %3237 = vmatpush.msra.mxu0 %v7005_v11  ;;  %3257 = vmatpush.msra.mxu1 %v7006_v61 }
 0x7cf   :  { %3277 = vmatpush.msra.mxu2 %v7007_v8  ;;  %3297 = vmatpush.msra.mxu3 %v7008_v56 }
 0x7d0   :  { %3238 = vmatpush.msra.mxu0 %v7009_v47  ;;  %3258 = vmatpush.msra.mxu1 %v7010_v60 }
 0x7d1   :  { %3278 = vmatpush.msra.mxu2 %v7011_v48  ;;  %3298 = vmatpush.msra.mxu3 %v7012_v10 }
 0x7d2   :  { %3239 = vmatpush.msra.mxu0 %v7013_v62  ;;  %3259 = vmatpush.msra.mxu1 %v7014_v32  ;;  %v2899_v62 = vld [vmem:[#allocation2 + $0x10] sm:$0xc0] }
 0x7d3   :  { %3279 = vmatpush.msra.mxu2 %v7015_v9  ;;  %3299 = vmatpush.msra.mxu3 %v7016_v7 }
 0x7d4   :  { %3240 = vmatpush.msra.mxu0 %v6409_v53  ;;  %3260 = vmatpush.msra.mxu1 %v6412_v51  ;;  %v2898_v51 = vld [vmem:[#allocation2 + $0x8] sm:$0xc0] }
 0x7d5   :  { %3280 = vmatpush.msra.mxu2 %v6415_v2  ;;  %3300 = vmatpush.msra.mxu3 %v6418_v63  ;;  %v2897_v2 = vld [vmem:[#allocation2] sm:$0xc0] }
 0x7d6   :  { %3241 = vmatpush.msra.mxu0 %v6421_v23  ;;  %3261 = vmatpush.msra.mxu1 %v6424_v58  ;;  %v6442_v58 = vld [vmem:[#allocation12 + $0x18] sm:$0xff] }
 0x7d7   :  { %3281 = vmatpush.msra.mxu2 %v6427_v50  ;;  %3301 = vmatpush.msra.mxu3 %v6430_v57  ;;  %7028 = vst [vmem:[#allocation50_spill] sm:$0xff] %v6442_v58 }
 0x7d8   :  { %3242 = vmatpush.msra.mxu0 %v6433_v5  ;;  %3262 = vmatpush.msra.mxu1 %v6436_v55 }
 0x7d9   :  { %3282 = vmatpush.msra.mxu2 %v6439_v33  ;;  %3302 = vmatpush.msra.mxu3 %v6442_v58 }
 0x835   :  { %v2921_v50 = vpop.f32.mrf.mxu0  ;;  %v2941_v23 = vpop.f32.mrf.mxu1 }
 0x836   :  { %v2988_v63 = vrot.slane %v2921_v50, 2  ;;  %v2989_v57 = vrot.slane %v2941_v23, 2 }
 0x838   :  { %v2996_v53 = vadd.f32 %v2988_v63, %v2897_v2  ;;  %v2997_v5 = vadd.f32 %v2989_v57, %v2898_v51 }
 0x83a   :  { %v3961_v7 = vmul.f32 -1.442695, %v2996_v53  ;;  %v3962_v9 = vmul.f32 -1.442695, %v2997_v5  ;;  %v2900_v53 = vld [vmem:[#allocation2 + $0x18] sm:$0xc0] }
 0x83c   :  { %4180 = vpow2.f32 %v3961_v7  ;;  %v2961_v55 = vpop.f32.mrf.mxu2  ;;  %v2981_v50 = vpop.f32.mrf.mxu3 }
 0x83d   :  { %4182 = vpow2.f32 %v3962_v9  ;;  %v2990_v32 = vrot.slane %v2961_v55, 2  ;;  %v2991_v23 = vrot.slane %v2981_v50, 2 }
 0x83f   :  { %v2998_v33 = vadd.f32 %v2990_v32, %v2899_v62  ;;  %v2999_v7 = vadd.f32 %v2991_v23, %v2900_v53 }
 0x841   :  { %v3963_v10 = vmul.f32 -1.442695, %v2998_v33 }
 0x842   :  { %v4181_v48 = vpop.eup %4180 }
 0x843   :  { %v4183_v60 = vpop.eup %4182  ;;  %v3009_v58 = vadd.f32 1.0, %v4181_v48  ;;  %4184 = vpow2.f32 %v3963_v10 }
 0x844   :  { %v3010_v47 = vadd.f32 1.0, %v4183_v60 }
 0x845   :  { %4186 = vrcp.f32 %v3009_v58  ;;  %v3023_v55 = vand.u32 2147483648, %v3009_v58  ;;  %v3021_v60 = vand.u32 2147483647, %v3009_v58  ;;  %vm3017_vm11 = vweird.f32 %v3009_v58 }
 0x846   :  { %4188 = vrcp.f32 %v3010_v47  ;;  %v3038_v48 = vand.u32 2147483648, %v3010_v47  ;;  %v3036_v50 = vand.u32 2147483647, %v3010_v47  ;;  %vm3032_vm12 = vweird.f32 %v3010_v47 }
 0x847   :  { %v3024_v53 = vor.u32 1.1754944e-38, %v3023_v55  ;;  %vm3022_vm15 = vcmp.eq.f32.partialorder %v3021_v60, 8.507059e+37 }
 0x848   :  { %vm3037_vm1 = vcmp.eq.f32.partialorder %v3036_v50, 8.507059e+37  ;;  %v7036_v50 = vld [vmem:[#allocation31_spill] sm:$0xff] }
 0x849   :  { %v4185_v2 = vpop.eup %4184 }
 0x84a   :  { %v3011_v51 = vadd.f32 1.0, %v4185_v2 }
 0x84b   :  { %v4187_v63 = vpop.eup %4186 }
 0x84c   :  { %v4189_v57 = vpop.eup %4188  ;;  %v3013_v9 = vmul.f32 %v4187_v63, %v3009_v58  ;;  %4190 = vrcp.f32 %v3011_v51  ;;  %vm3018_vm9 = vweird.f32 %v4187_v63  ;;  %vm3047_vm3 = vweird.f32 %v3011_v51 }
 0x84d   :  { %v3028_v5 = vmul.f32 %v4189_v57, %v3010_v47  ;;  %4192 = vtanh.f32 %v2999_v7  ;;  %vm3033_vm10 = vweird.f32 %v4189_v57  ;;  %vm3019_vm13 = vmor %vm3017_vm11, %vm3018_vm9  ;;  %v3051_v55 = vand.u32 2147483647, %v3011_v51 }
 0x84e   :  { %v3014_v62 = vsub.f32 1.0, %v3013_v9  ;;  %v3059_v9 = vrot.slane %v6354_v6, 6  ;;  %vm3034_vm14 = vmor %vm3032_vm12, %vm3033_vm10  ;;  %v3053_v6 = vand.u32 2147483648, %v3011_v51 }
 0x84f   :  { %v3029_v32 = vsub.f32 1.0, %v3028_v5  ;;  %v3039_v5 = vor.u32 1.1754944e-38, %v3038_v48  ;;  %vm3052_vm0 = vcmp.eq.f32.partialorder %v3051_v55, 8.507059e+37  ;;  %v7048_v55 = vld [vmem:[#allocation42_spill] sm:$0xff] }
 0x850   :  { %v3015_v10 = vmul.f32 %v4187_v63, %v3014_v62  ;;  %v3054_v48 = vor.u32 1.1754944e-38, %v3053_v6  ;;  %v7047_v6 = vld [vmem:[#allocation41_spill] sm:$0xff] }
 0x851   :  { %v3030_v33 = vmul.f32 %v4189_v57, %v3029_v32 }
 0x852   :  { %v4191_v56 = vpop.eup %4190  ;;  %v3016_v2 = vadd.f32 %v4187_v63, %v3015_v10 }
 0x853   :  { %v3043_v23 = vmul.f32 %v4191_v56, %v3011_v51  ;;  %v3031_v8 = vadd.f32 %v4189_v57, %v3030_v33  ;;  %v4193_v62 = vpop.eup %4192  ;;  %vm3048_vm2 = vweird.f32 %v4191_v56  ;;  %v7035_v51 = vld [vmem:[#allocation30_spill] sm:$0xff] }
 0x854   :  { %v3020_v7 = vsel %vm3019_vm13, %v4187_v63, %v3016_v2  ;;  %vm3049_vm4 = vmor %vm3047_vm3, %vm3048_vm2  ;;  %v7037_v2 = vld [vmem:[#allocation32_spill] sm:$0xff] }
 0x855   :  { %v3044_v61 = vsub.f32 1.0, %v3043_v23  ;;  %v3025_v11 = vsel %vm3022_vm15, %v3024_v53, %v3020_v7  ;;  %v3035_v32 = vsel %vm3034_vm14, %v4189_v57, %v3031_v8  ;;  %v7038_v23 = vld [vmem:[#allocation33_spill] sm:$0xff]  ;;  %v7039_v53 = vld [vmem:[#allocation34_spill] sm:$0xff]  ;;  %v7042_v7 = vld [vmem:[#allocation36_spill] sm:$0xff] }
 0x856   :  { %v3040_v46 = vsel %vm3037_vm1, %v3039_v5, %v3035_v32  ;;  %v3062_v40 = vmul.f32 %v4193_v62, %v3025_v11  ;;  %v7032_v11 = vld [vmem:[#allocation27_spill] sm:$0xff]  ;;  %v7043_v62 = vld [vmem:[#allocation37_spill] sm:$0xff]  ;;  %v7044_v32 = vld [vmem:[#allocation38_spill] sm:$0xff] }
 0x857   :  { %v3061_v10 = vmul.f32 %v3059_v9, %v3040_v46  ;;  %v3045_v58 = vmul.f32 %v4191_v56, %v3044_v61  ;;  %v7031_v46 = vld [vmem:[#allocation44_spill] sm:$0xff]  ;;  %v7040_v9 = vld [vmem:[#allocation25_spill] sm:$0xff]  ;;  %v7041_v5 = vld [vmem:[#allocation35_spill] sm:$0xff] }
 0x858   :  { %v7033_v61 = vld [vmem:[#allocation28_spill] sm:$0xff] }
 0x859   :  { %v6446_v47 = vadd.f32 %v3062_v40, %v3061_v10  ;;  %v3046_v30 = vadd.f32 %v4191_v56, %v3045_v58  ;;  %v7030_v40 = vld [vmem:[#allocation26_spill] sm:$0xff]  ;;  %v7045_v10 = vld [vmem:[#allocation39_spill] sm:$0xff]  ;;  %v7046_v58 = vld [vmem:[#allocation40_spill] sm:$0xff] }
 0x85b   :  { %4194 = vtanh.f32 %v6446_v47  ;;  %v3050_v63 = vsel %vm3049_vm4, %v4191_v56, %v3046_v30  ;;  %v7029_v30 = vld [vmem:[#allocation24_spill] sm:$0xff]  ;;  %v7034_v56 = vld [vmem:[#allocation29_spill] sm:$0xff] }
 0x85c   :  { %v3055_v8 = vsel %vm3052_vm0, %v3054_v48, %v3050_v63  ;;  %v7049_v63 = vld [vmem:[#allocation43_spill] sm:$0xff]  ;;  %v7050_v48 = vld [vmem:[#allocation45_spill] sm:$0xff] }
 0x861   :  { %v4195_v60 = vpop.eup %4194 }
 0x862   :  { %v3065_v57 = vmul.f32 %v4195_v60, %v3055_v8  ;;  %v7051_v60 = vld [vmem:[#allocation46_spill] sm:$0xff]  ;;  %v7052_v8 = vld [vmem:[#allocation47_spill] sm:$0xff] }
 0x864   :  { %v3071_v33 = vrot.slane %v3065_v57, 6  ;;  %v7053_v57 = vld [vmem:[#allocation48_spill] sm:$0xff] }
 0x866   :  { %3089 = vmatmul.f32.vlgmr.msrb.gmra.mxu0 %v3071_v33  ;;  %3109 = vmatmul.f32.vlgmr.msrb.gmra.mxu1 %v3071_v33 }
 0x867   :  { %3129 = vmatmul.f32.vlgmr.msrb.gmra.mxu2 %v3071_v33  ;;  %3149 = vmatmul.f32.vlgmr.msrb.gmra.mxu3 %v3071_v33  ;;  %v7054_v33 = vld [vmem:[#allocation49_spill] sm:$0xff] }
 0x868   :  { %3396 = vmatpush.msrb.mxu0 %v6185_v19  ;;  %3416 = vmatpush.msrb.mxu1 %v6188_v0 }
 0x869   :  { %3436 = vmatpush.msrb.mxu2 %v6191_v16  ;;  %3456 = vmatpush.msrb.mxu3 %v6194_v18 }
 0x86a   :  { %3397 = vmatpush.msrb.mxu0 %v6197_v1  ;;  %3417 = vmatpush.msrb.mxu1 %v6200_v38 }
 0x86b   :  { %3437 = vmatpush.msrb.mxu2 %v6203_v54  ;;  %3457 = vmatpush.msrb.mxu3 %v6206_v31 }
 0x86c   :  { %3398 = vmatpush.msrb.mxu0 %v6209_v13  ;;  %3418 = vmatpush.msrb.mxu1 %v6212_v37 }
 0x86d   :  { %3438 = vmatpush.msrb.mxu2 %v6215_v36  ;;  %3458 = vmatpush.msrb.mxu3 %v6218_v4 }
 0x86e   :  { %3399 = vmatpush.msrb.mxu0 %v6221_v21  ;;  %3419 = vmatpush.msrb.mxu1 %v6224_v25 }
 0x86f   :  { %3439 = vmatpush.msrb.mxu2 %v6227_v24  ;;  %3459 = vmatpush.msrb.mxu3 %v6230_v43 }
 0x870   :  { %3400 = vmatpush.msrb.mxu0 %v6233_v49  ;;  %3420 = vmatpush.msrb.mxu1 %v6236_v34 }
 0x871   :  { %3440 = vmatpush.msrb.mxu2 %v6239_v41  ;;  %3460 = vmatpush.msrb.mxu3 %v6242_v42 }
 0x872   :  { %3401 = vmatpush.msrb.mxu0 %v6245_v45  ;;  %3421 = vmatpush.msrb.mxu1 %v6248_v35 }
 0x873   :  { %3441 = vmatpush.msrb.mxu2 %v6251_v22  ;;  %3461 = vmatpush.msrb.mxu3 %v6254_v44 }
 0x874   :  { %3402 = vmatpush.msrb.mxu0 %v6257_v59  ;;  %3422 = vmatpush.msrb.mxu1 %v6260_v20 }
 0x875   :  { %3442 = vmatpush.msrb.mxu2 %v6263_v39  ;;  %3462 = vmatpush.msrb.mxu3 %v6266_v52 }
 0x876   :  { %3403 = vmatpush.msrb.mxu0 %v6269_v3  ;;  %3423 = vmatpush.msrb.mxu1 %v6272_v27 }
 0x877   :  { %3443 = vmatpush.msrb.mxu2 %v6275_v12  ;;  %3463 = vmatpush.msrb.mxu3 %v6278_v14 }
 0x878   :  { %3404 = vmatpush.msrb.mxu0 %v6281_v15  ;;  %3424 = vmatpush.msrb.mxu1 %v6284_v17 }
 0x879   :  { %3444 = vmatpush.msrb.mxu2 %v6287_v26  ;;  %3464 = vmatpush.msrb.mxu3 %v6290_v28 }
 0x87a   :  { %3405 = vmatpush.msrb.mxu0 %v6293_v29  ;;  %3425 = vmatpush.msrb.mxu1 %v7029_v30 }
 0x87b   :  { %3445 = vmatpush.msrb.mxu2 %v7030_v40  ;;  %3465 = vmatpush.msrb.mxu3 %v7031_v46 }
 0x87c   :  { %3406 = vmatpush.msrb.mxu0 %v7032_v11  ;;  %3426 = vmatpush.msrb.mxu1 %v7033_v61 }
 0x87d   :  { %3446 = vmatpush.msrb.mxu2 %v7034_v56  ;;  %3466 = vmatpush.msrb.mxu3 %v7035_v51 }
 0x87e   :  { %3407 = vmatpush.msrb.mxu0 %v7036_v50  ;;  %3427 = vmatpush.msrb.mxu1 %v7037_v2 }
 0x87f   :  { %3447 = vmatpush.msrb.mxu2 %v7038_v23  ;;  %3467 = vmatpush.msrb.mxu3 %v7039_v53 }
 0x880   :  { %3408 = vmatpush.msrb.mxu0 %v7040_v9  ;;  %3428 = vmatpush.msrb.mxu1 %v7041_v5 }
 0x881   :  { %3448 = vmatpush.msrb.mxu2 %v7042_v7  ;;  %3468 = vmatpush.msrb.mxu3 %v7043_v62  ;;  %v3067_v62 = vld [vmem:[#allocation2 + $0x28] sm:$0x3] }
 0x882   :  { %3409 = vmatpush.msrb.mxu0 %v7044_v32  ;;  %3429 = vmatpush.msrb.mxu1 %v7045_v10  ;;  %v7055_v32 = vld [vmem:[#allocation50_spill] sm:$0xff]  ;;  %v3066_v10 = vld [vmem:[#allocation2 + $0x20] sm:$0x3] }
 0x883   :  { %3449 = vmatpush.msrb.mxu2 %v7046_v58  ;;  %3469 = vmatpush.msrb.mxu3 %v7047_v6 }
 0x884   :  { %3410 = vmatpush.msrb.mxu0 %v7048_v55  ;;  %3430 = vmatpush.msrb.mxu1 %v7049_v63 }
 0x885   :  { %3450 = vmatpush.msrb.mxu2 %v7050_v48  ;;  %3470 = vmatpush.msrb.mxu3 %v7051_v60  ;;  %v3068_v48 = vld [vmem:[#allocation2 + $0x30] sm:$0x3] }
 0x886   :  { %3411 = vmatpush.msrb.mxu0 %v7052_v8  ;;  %3431 = vmatpush.msrb.mxu1 %v7053_v57 }
 0x887   :  { %3451 = vmatpush.msrb.mxu2 %v7054_v33  ;;  %3471 = vmatpush.msrb.mxu3 %v7055_v32 }
 0x8e3   :  { %v3090_v58 = vpop.f32.mrf.mxu0  ;;  %v3110_v6 = vpop.f32.mrf.mxu1 }
 0x8e4   :  { %v3153_v7 = vadd.f32 %v3090_v58, %v3066_v10  ;;  %v3154_v55 = vadd.f32 %v3110_v6, %v3067_v62  ;;  %v3069_v10 = vld [vmem:[#allocation2 + $0x38] sm:$0x3] }
 0x8e6   :  { %v3964_v5 = vmul.f32 -1.442695, %v3153_v7  ;;  %v3965_v63 = vmul.f32 -1.442695, %v3154_v55 }
 0x8e8   :  { %4196 = vpow2.f32 %v3964_v5 }
 0x8e9   :  { %4198 = vpow2.f32 %v3965_v63 }
 0x8ea   :  { %v3130_v60 = vpop.f32.mrf.mxu2  ;;  %v3150_v32 = vpop.f32.mrf.mxu3 }
 0x8eb   :  { %v3155_v9 = vadd.f32 %v3130_v60, %v3068_v48  ;;  %v3156_v7 = vadd.f32 %v3150_v32, %v3069_v10 }
 0x8ed   :  { %v3966_v8 = vmul.f32 -1.442695, %v3155_v9 }
 0x8ee   :  { %v4197_v53 = vpop.eup %4196 }
 0x8ef   :  { %v4199_v57 = vpop.eup %4198  ;;  %v3166_v23 = vadd.f32 1.0, %v4197_v53  ;;  %4200 = vpow2.f32 %v3966_v8 }
 0x8f0   :  { %v3167_v33 = vadd.f32 1.0, %v4199_v57 }
 0x8f1   :  { %4202 = vrcp.f32 %v3166_v23  ;;  %v3180_v9 = vand.u32 2147483648, %v3166_v23  ;;  %v3178_v60 = vand.u32 2147483647, %v3166_v23  ;;  %vm3174_vm7 = vweird.f32 %v3166_v23 }
 0x8f2   :  { %4204 = vrcp.f32 %v3167_v33  ;;  %v3195_v48 = vand.u32 2147483648, %v3167_v33  ;;  %v3193_v57 = vand.u32 2147483647, %v3167_v33  ;;  %vm3189_vm8 = vweird.f32 %v3167_v33 }
 0x8f3   :  { %v3181_v10 = vor.u32 1.1754944e-38, %v3180_v9  ;;  %vm3179_vm11 = vcmp.eq.f32.partialorder %v3178_v60, 8.507059e+37 }
 0x8f4   :  { %vm3194_vm12 = vcmp.eq.f32.partialorder %v3193_v57, 8.507059e+37 }
 0x8f5   :  { %v4201_v2 = vpop.eup %4200 }
 0x8f6   :  { %v3168_v50 = vadd.f32 1.0, %v4201_v2 }
 0x8f7   :  { %v4203_v62 = vpop.eup %4202 }
 0x8f8   :  { %v4205_v58 = vpop.eup %4204  ;;  %v3170_v5 = vmul.f32 %v4203_v62, %v3166_v23  ;;  %4206 = vrcp.f32 %v3168_v50  ;;  %vm3175_vm5 = vweird.f32 %v4203_v62  ;;  %v3210_v9 = vand.u32 2147483648, %v3168_v50 }
 0x8f9   :  { %v3185_v6 = vmul.f32 %v4205_v58, %v3167_v33  ;;  %4208 = vtanh.f32 %v3156_v7  ;;  %vm3190_vm6 = vweird.f32 %v4205_v58  ;;  %vm3176_vm9 = vmor %vm3174_vm7, %vm3175_vm5  ;;  %v3216_v7 = vrot.slane %v6446_v47, 6 }
 0x8fa   :  { %v3171_v55 = vsub.f32 1.0, %v3170_v5  ;;  %vm3191_vm10 = vmor %vm3189_vm8, %vm3190_vm6  ;;  %v3196_v5 = vor.u32 1.1754944e-38, %v3195_v48  ;;  %vm3204_vm14 = vweird.f32 %v3168_v50  ;;  %v3211_v48 = vor.u32 1.1754944e-38, %v3210_v9 }
 0x8fb   :  { %v3186_v63 = vsub.f32 1.0, %v3185_v6 }
 0x8fc   :  { %v3172_v53 = vmul.f32 %v4203_v62, %v3171_v55 }
 0x8fd   :  { %v3187_v8 = vmul.f32 %v4205_v58, %v3186_v63 }
 0x8fe   :  { %v4207_v51 = vpop.eup %4206  ;;  %v3173_v2 = vadd.f32 %v4203_v62, %v3172_v53 }
 0x8ff   :  { %v3200_v32 = vmul.f32 %v4207_v51, %v3168_v50  ;;  %v3188_v56 = vadd.f32 %v4205_v58, %v3187_v8  ;;  %v4209_v55 = vpop.eup %4208  ;;  %vm3205_vm13 = vweird.f32 %v4207_v51 }
 0x900   :  { %v3177_v6 = vsel %vm3176_vm9, %v4203_v62, %v3173_v2  ;;  %v3208_v62 = vand.u32 2147483647, %v3168_v50  ;;  %vm3206_vm15 = vmor %vm3204_vm14, %vm3205_vm13 }
 0x901   :  { %v3201_v61 = vsub.f32 1.0, %v3200_v32  ;;  %v3182_v11 = vsel %vm3179_vm11, %v3181_v10, %v3177_v6  ;;  %v3192_v63 = vsel %vm3191_vm10, %v4205_v58, %v3188_v56  ;;  %v3226_v6 = vld [vmem:[#allocation2 + $0x38] sm:$0xc] }
 0x902   :  { %v3197_v46 = vsel %vm3194_vm12, %v3196_v5, %v3192_v63  ;;  %v3219_v40 = vmul.f32 %v4209_v55, %v3182_v11  ;;  %vm3209_vm1 = vcmp.eq.f32.partialorder %v3208_v62, 8.507059e+37 }
 0x903   :  { %v3218_v53 = vmul.f32 %v3216_v7, %v3197_v46  ;;  %v3202_v23 = vmul.f32 %v4207_v51, %v3201_v61  ;;  %v3225_v46 = vld [vmem:[#allocation2 + $0x30] sm:$0xc] }
 0x905   :  { %v6514_v33 = vadd.f32 %v3219_v40, %v3218_v53  ;;  %v3203_v30 = vadd.f32 %v4207_v51, %v3202_v23 }
 0x907   :  { %4210 = vtanh.f32 %v6514_v33  ;;  %v3207_v47 = vsel %vm3206_vm15, %v4207_v51, %v3203_v30 }
 0x908   :  { %v3212_v56 = vsel %vm3209_vm1, %v3211_v48, %v3207_v47 }
 0x90d   :  { %v4211_v60 = vpop.eup %4210 }
 0x90e   :  { %v3222_v58 = vmul.f32 %v4211_v60, %v3212_v56 }
 0x910   :  { %3243 = vmatmul.f32.vlgmr.msra.gmra.mxu0 %v3222_v58  ;;  %3263 = vmatmul.f32.vlgmr.msra.gmra.mxu1 %v3222_v58 }
 0x911   :  { %3283 = vmatmul.f32.vlgmr.msra.gmra.mxu2 %v3222_v58  ;;  %3303 = vmatmul.f32.vlgmr.msra.gmra.mxu3 %v3222_v58 }
 0x912   :  { %3565 = vmatpush.msra.mxu0 %v6185_v19  ;;  %3585 = vmatpush.msra.mxu1 %v6188_v0  ;;  %v7056_v19 = vld [vmem:[#allocation24_spill] sm:$0xff]  ;;  %v7057_v0 = vld [vmem:[#allocation26_spill] sm:$0xff] }
 0x913   :  { %3605 = vmatpush.msra.mxu2 %v6191_v16  ;;  %3625 = vmatpush.msra.mxu3 %v6194_v18  ;;  %v7058_v16 = vld [vmem:[#allocation44_spill] sm:$0xff]  ;;  %v7059_v18 = vld [vmem:[#allocation27_spill] sm:$0xff] }
 0x914   :  { %3566 = vmatpush.msra.mxu0 %v6197_v1  ;;  %3586 = vmatpush.msra.mxu1 %v6200_v38  ;;  %v7060_v1 = vld [vmem:[#allocation28_spill] sm:$0xff]  ;;  %v7061_v38 = vld [vmem:[#allocation29_spill] sm:$0xff] }
 0x915   :  { %3606 = vmatpush.msra.mxu2 %v6203_v54  ;;  %3626 = vmatpush.msra.mxu3 %v6206_v31  ;;  %v7062_v54 = vld [vmem:[#allocation30_spill] sm:$0xff]  ;;  %v7063_v31 = vld [vmem:[#allocation31_spill] sm:$0xff] }
 0x916   :  { %3567 = vmatpush.msra.mxu0 %v6209_v13  ;;  %3587 = vmatpush.msra.mxu1 %v6212_v37  ;;  %v7064_v13 = vld [vmem:[#allocation32_spill] sm:$0xff]  ;;  %v7065_v37 = vld [vmem:[#allocation33_spill] sm:$0xff] }
 0x917   :  { %3607 = vmatpush.msra.mxu2 %v6215_v36  ;;  %3627 = vmatpush.msra.mxu3 %v6218_v4  ;;  %v7066_v36 = vld [vmem:[#allocation34_spill] sm:$0xff]  ;;  %v7067_v4 = vld [vmem:[#allocation25_spill] sm:$0xff] }
 0x918   :  { %3568 = vmatpush.msra.mxu0 %v6221_v21  ;;  %3588 = vmatpush.msra.mxu1 %v6224_v25  ;;  %v7068_v21 = vld [vmem:[#allocation35_spill] sm:$0xff]  ;;  %v7069_v25 = vld [vmem:[#allocation36_spill] sm:$0xff] }
 0x919   :  { %3608 = vmatpush.msra.mxu2 %v6227_v24  ;;  %3628 = vmatpush.msra.mxu3 %v6230_v43  ;;  %v7070_v24 = vld [vmem:[#allocation37_spill] sm:$0xff]  ;;  %v7071_v43 = vld [vmem:[#allocation38_spill] sm:$0xff] }
 0x91a   :  { %3569 = vmatpush.msra.mxu0 %v6233_v49  ;;  %3589 = vmatpush.msra.mxu1 %v6236_v34  ;;  %v7072_v49 = vld [vmem:[#allocation39_spill] sm:$0xff]  ;;  %v7073_v34 = vld [vmem:[#allocation40_spill] sm:$0xff] }
 0x91b   :  { %3609 = vmatpush.msra.mxu2 %v6239_v41  ;;  %3629 = vmatpush.msra.mxu3 %v6242_v42  ;;  %v7074_v41 = vld [vmem:[#allocation41_spill] sm:$0xff]  ;;  %v7075_v42 = vld [vmem:[#allocation42_spill] sm:$0xff] }
 0x91c   :  { %3570 = vmatpush.msra.mxu0 %v6245_v45  ;;  %3590 = vmatpush.msra.mxu1 %v6248_v35  ;;  %v7076_v45 = vld [vmem:[#allocation43_spill] sm:$0xff]  ;;  %v7077_v35 = vld [vmem:[#allocation45_spill] sm:$0xff] }
 0x91d   :  { %3610 = vmatpush.msra.mxu2 %v6251_v22  ;;  %3630 = vmatpush.msra.mxu3 %v6254_v44  ;;  %v7078_v22 = vld [vmem:[#allocation46_spill] sm:$0xff]  ;;  %v7079_v44 = vld [vmem:[#allocation47_spill] sm:$0xff] }
 0x91e   :  { %3571 = vmatpush.msra.mxu0 %v6257_v59  ;;  %3591 = vmatpush.msra.mxu1 %v6260_v20  ;;  %v7080_v59 = vld [vmem:[#allocation48_spill] sm:$0xff]  ;;  %v7081_v20 = vld [vmem:[#allocation49_spill] sm:$0xff] }
 0x91f   :  { %3611 = vmatpush.msra.mxu2 %v6263_v39  ;;  %3631 = vmatpush.msra.mxu3 %v6266_v52  ;;  %v7082_v39 = vld [vmem:[#allocation50_spill] sm:$0xff] }
 0x920   :  { %3572 = vmatpush.msra.mxu0 %v6269_v3  ;;  %3592 = vmatpush.msra.mxu1 %v6272_v27 }
 0x921   :  { %3612 = vmatpush.msra.mxu2 %v6275_v12  ;;  %3632 = vmatpush.msra.mxu3 %v6278_v14  ;;  %v3223_v14 = vld [vmem:[#allocation2 + $0x20] sm:$0xc] }
 0x922   :  { %3573 = vmatpush.msra.mxu0 %v6281_v15  ;;  %3593 = vmatpush.msra.mxu1 %v6284_v17  ;;  %v3224_v15 = vld [vmem:[#allocation2 + $0x28] sm:$0xc] }
 0x923   :  { %3613 = vmatpush.msra.mxu2 %v6287_v26  ;;  %3633 = vmatpush.msra.mxu3 %v6290_v28 }
 0x924   :  { %3574 = vmatpush.msra.mxu0 %v6293_v29  ;;  %3594 = vmatpush.msra.mxu1 %v7056_v19 }
 0x925   :  { %3614 = vmatpush.msra.mxu2 %v7057_v0  ;;  %3634 = vmatpush.msra.mxu3 %v7058_v16 }
 0x926   :  { %3575 = vmatpush.msra.mxu0 %v7059_v18  ;;  %3595 = vmatpush.msra.mxu1 %v7060_v1 }
 0x927   :  { %3615 = vmatpush.msra.mxu2 %v7061_v38  ;;  %3635 = vmatpush.msra.mxu3 %v7062_v54  ;;  %v3382_v54 = vrot.slane %v6514_v33, 6 }
 0x928   :  { %3576 = vmatpush.msra.mxu0 %v7063_v31  ;;  %3596 = vmatpush.msra.mxu1 %v7064_v13 }
 0x929   :  { %3616 = vmatpush.msra.mxu2 %v7065_v37  ;;  %3636 = vmatpush.msra.mxu3 %v7066_v36 }
 0x92a   :  { %3577 = vmatpush.msra.mxu0 %v7067_v4  ;;  %3597 = vmatpush.msra.mxu1 %v7068_v21 }
 0x92b   :  { %3617 = vmatpush.msra.mxu2 %v7069_v25  ;;  %3637 = vmatpush.msra.mxu3 %v7070_v24 }
 0x92c   :  { %3578 = vmatpush.msra.mxu0 %v7071_v43  ;;  %3598 = vmatpush.msra.mxu1 %v7072_v49 }
 0x92d   :  { %3618 = vmatpush.msra.mxu2 %v7073_v34  ;;  %3638 = vmatpush.msra.mxu3 %v7074_v41 }
 0x92e   :  { %3579 = vmatpush.msra.mxu0 %v7075_v42  ;;  %3599 = vmatpush.msra.mxu1 %v7076_v45 }
 0x92f   :  { %3619 = vmatpush.msra.mxu2 %v7077_v35  ;;  %3639 = vmatpush.msra.mxu3 %v7078_v22 }
 0x930   :  { %3580 = vmatpush.msra.mxu0 %v7079_v44  ;;  %3600 = vmatpush.msra.mxu1 %v7080_v59 }
 0x931   :  { %3620 = vmatpush.msra.mxu2 %v7081_v20  ;;  %3640 = vmatpush.msra.mxu3 %v7082_v39 }
 0x98d   :  { %v3244_v52 = vpop.f32.mrf.mxu0  ;;  %v3264_v3 = vpop.f32.mrf.mxu1 }
 0x98e   :  { %v3311_v27 = vrot.slane %v3244_v52, 6  ;;  %v3312_v12 = vrot.slane %v3264_v3, 6 }
 0x990   :  { %v3319_v17 = vadd.f32 %v3311_v27, %v3223_v14  ;;  %v3320_v26 = vadd.f32 %v3312_v12, %v3224_v15  ;;  %v3389_v12 = vld [vmem:[#allocation2 + $0x20] sm:$0x30]  ;;  %v3390_v14 = vld [vmem:[#allocation2 + $0x28] sm:$0x30] }
 0x992   :  { %v3967_v28 = vmul.f32 -1.442695, %v3319_v17  ;;  %v3968_v29 = vmul.f32 -1.442695, %v3320_v26 }
 0x994   :  { %4212 = vpow2.f32 %v3967_v28  ;;  %v3284_v30 = vpop.f32.mrf.mxu2  ;;  %v3304_v2 = vpop.f32.mrf.mxu3 }
 0x995   :  { %4214 = vpow2.f32 %v3968_v29  ;;  %v3313_v40 = vrot.slane %v3284_v30, 6  ;;  %v3314_v32 = vrot.slane %v3304_v2, 6 }
 0x997   :  { %v3321_v11 = vadd.f32 %v3313_v40, %v3225_v46  ;;  %v3322_v55 = vadd.f32 %v3314_v32, %v3226_v6  ;;  %v3391_v40 = vld [vmem:[#allocation2 + $0x30] sm:$0x30] }
 0x999   :  { %v3969_v61 = vmul.f32 -1.442695, %v3321_v11 }
 0x99a   :  { %v4213_v51 = vpop.eup %4212 }
 0x99b   :  { %v4215_v50 = vpop.eup %4214  ;;  %v3332_v8 = vadd.f32 1.0, %v4213_v51  ;;  %4216 = vpow2.f32 %v3969_v61 }
 0x99c   :  { %v3333_v57 = vadd.f32 1.0, %v4215_v50 }
 0x99d   :  { %4218 = vrcp.f32 %v3332_v8  ;;  %v3346_v47 = vand.u32 2147483648, %v3332_v8  ;;  %v3344_v56 = vand.u32 2147483647, %v3332_v8  ;;  %vm3340_vm4 = vweird.f32 %v3332_v8 }
 0x99e   :  { %4220 = vrcp.f32 %v3333_v57  ;;  %v3361_v48 = vand.u32 2147483648, %v3333_v57  ;;  %v3359_v19 = vand.u32 2147483647, %v3333_v57  ;;  %vm3355_vm0 = vweird.f32 %v3333_v57 }
 0x99f   :  { %v3347_v1 = vor.u32 1.1754944e-38, %v3346_v47  ;;  %vm3345_vm7 = vcmp.eq.f32.partialorder %v3344_v56, 8.507059e+37 }
 0x9a0   :  { %v3362_v31 = vor.u32 1.1754944e-38, %v3361_v48  ;;  %vm3360_vm8 = vcmp.eq.f32.partialorder %v3359_v19, 8.507059e+37 }
 0x9a1   :  { %v4217_v10 = vpop.eup %4216 }
 0x9a2   :  { %v3334_v5 = vadd.f32 1.0, %v4217_v10 }
 0x9a3   :  { %v4219_v7 = vpop.eup %4218 }
 0x9a4   :  { %v4221_v63 = vpop.eup %4220  ;;  %v3336_v53 = vmul.f32 %v4219_v7, %v3332_v8  ;;  %4222 = vrcp.f32 %v3334_v5  ;;  %vm3341_vm2 = vweird.f32 %v4219_v7  ;;  %v3376_v33 = vand.u32 2147483648, %v3334_v5 }
 0x9a5   :  { %v3351_v23 = vmul.f32 %v4221_v63, %v3333_v57  ;;  %4224 = vtanh.f32 %v3322_v55  ;;  %vm3356_vm3 = vweird.f32 %v4221_v63  ;;  %vm3342_vm5 = vmor %vm3340_vm4, %vm3341_vm2  ;;  %vm3370_vm10 = vweird.f32 %v3334_v5 }
 0x9a6   :  { %v3337_v9 = vsub.f32 1.0, %v3336_v53  ;;  %vm3357_vm6 = vmor %vm3355_vm0, %vm3356_vm3  ;;  %v3374_v42 = vand.u32 2147483647, %v3334_v5  ;;  %v3377_v35 = vor.u32 1.1754944e-38, %v3376_v33 }
 0x9a7   :  { %v3352_v62 = vsub.f32 1.0, %v3351_v23 }
 0x9a8   :  { %v3338_v60 = vmul.f32 %v4219_v7, %v3337_v9  ;;  %vm3375_vm12 = vcmp.eq.f32.partialorder %v3374_v42, 8.507059e+37 }
 0x9a9   :  { %v3353_v58 = vmul.f32 %v4221_v63, %v3352_v62 }
 0x9aa   :  { %v4223_v0 = vpop.eup %4222  ;;  %v3339_v16 = vadd.f32 %v4219_v7, %v3338_v60 }
 0x9ab   :  { %v3366_v18 = vmul.f32 %v4223_v0, %v3334_v5  ;;  %v3354_v38 = vadd.f32 %v4221_v63, %v3353_v58  ;;  %v4225_v37 = vpop.eup %4224  ;;  %vm3371_vm9 = vweird.f32 %v4223_v0  ;;  %v3392_v5 = vld [vmem:[#allocation2 + $0x38] sm:$0x30] }
 0x9ac   :  { %v3343_v13 = vsel %vm3342_vm5, %v4219_v7, %v3339_v16  ;;  %vm3372_vm11 = vmor %vm3370_vm10, %vm3371_vm9 }
 0x9ad   :  { %v3367_v36 = vsub.f32 1.0, %v3366_v18  ;;  %v3348_v4 = vsel %vm3345_vm7, %v3347_v1, %v3343_v13  ;;  %v3358_v21 = vsel %vm3357_vm6, %v4221_v63, %v3354_v38 }
 0x9ae   :  { %v3363_v25 = vsel %vm3360_vm8, %v3362_v31, %v3358_v21  ;;  %v3385_v24 = vmul.f32 %v4225_v37, %v3348_v4 }
 0x9af   :  { %v3384_v43 = vmul.f32 %v3382_v54, %v3363_v25  ;;  %v3368_v49 = vmul.f32 %v4223_v0, %v3367_v36 }
 0x9b1   :  { %v6582_v34 = vadd.f32 %v3385_v24, %v3384_v43  ;;  %v3369_v41 = vadd.f32 %v4223_v0, %v3368_v49 }
 0x9b3   :  { %4226 = vtanh.f32 %v6582_v34  ;;  %v3373_v45 = vsel %vm3372_vm11, %v4223_v0, %v3369_v41  ;;  %v3551_v38 = vrot.slane %v6582_v34, 6 }
 0x9b4   :  { %v3378_v44 = vsel %vm3375_vm12, %v3377_v35, %v3373_v45 }
 0x9b9   :  { %v4227_v22 = vpop.eup %4226 }
 0x9ba   :  { %v3388_v59 = vmul.f32 %v4227_v22, %v3378_v44 }
 0x9bc   :  { %v3394_v20 = vrot.slane %v3388_v59, 2 }
 0x9be   :  { %3412 = vmatmul.f32.vlgmr.msrb.gmra.mxu0 %v3394_v20  ;;  %3432 = vmatmul.f32.vlgmr.msrb.gmra.mxu1 %v3394_v20 }
 0x9bf   :  { %3452 = vmatmul.f32.vlgmr.msrb.gmra.mxu2 %v3394_v20  ;;  %3472 = vmatmul.f32.vlgmr.msrb.gmra.mxu3 %v3394_v20  ;;  %v3746_v20 = vld [vmem:[%s6662_s8 + $0x78] sm:$0xff] }
 0x9c0   :  { %3754 = vmatpush.msrb.mxu0 %v3746_v20 }
 0xa3b   :  { %v3413_v39 = vpop.f32.mrf.mxu0  ;;  %v3433_v52 = vpop.f32.mrf.mxu1 }
 0xa3c   :  { %v3480_v3 = vrot.slane %v3413_v39, 4  ;;  %v3481_v27 = vrot.slane %v3433_v52, 4  ;;  %v3745_v39 = vld [vmem:[%s6662_s8 + $0x70] sm:$0xff]  ;;  %v3744_v52 = vld [vmem:[%s6662_s8 + $0x68] sm:$0xff] }
 0xa3d   :  { %3755 = vmatpush.msrb.mxu0 %v3745_v39 }
 0xa3e   :  { %v3488_v15 = vadd.f32 %v3480_v3, %v3389_v12  ;;  %v3489_v17 = vadd.f32 %v3481_v27, %v3390_v14  ;;  %v3743_v3 = vld [vmem:[%s6662_s8 + $0x60] sm:$0xff]  ;;  %v3742_v14 = vld [vmem:[%s6662_s8 + $0x58] sm:$0xff] }
 0xa3f   :  { %3756 = vmatpush.msrb.mxu0 %v3744_v52 }
 0xa40   :  { %v3970_v26 = vmul.f32 -1.442695, %v3488_v15  ;;  %v3971_v28 = vmul.f32 -1.442695, %v3489_v17 }
 0xa41   :  { %3757 = vmatpush.msrb.mxu0 %v3743_v3 }
 0xa42   :  { %4228 = vpow2.f32 %v3970_v26  ;;  %v3453_v29 = vpop.f32.mrf.mxu2  ;;  %v3473_v57 = vpop.f32.mrf.mxu3  ;;  %v3558_v26 = vld [vmem:[#allocation2 + $0x20] sm:$0xc0] }
 0xa43   :  { %4230 = vpow2.f32 %v3971_v28  ;;  %v3482_v30 = vrot.slane %v3453_v29, 4  ;;  %v3483_v2 = vrot.slane %v3473_v57, 4  ;;  %3758 = vmatpush.msrb.mxu0 %v3742_v14  ;;  %v3559_v28 = vld [vmem:[#allocation2 + $0x28] sm:$0xc0]  ;;  %v3741_v29 = vld [vmem:[%s6662_s8 + $0x50] sm:$0xff] }
 0xa45   :  { %v3490_v46 = vadd.f32 %v3482_v30, %v3391_v40  ;;  %v3491_v7 = vadd.f32 %v3483_v2, %v3392_v5  ;;  %3759 = vmatpush.msrb.mxu0 %v3741_v29  ;;  %v3737_v2 = vld [vmem:[%s6662_s8 + $0x30] sm:$0xff]  ;;  %v3736_v5 = vld [vmem:[%s6662_s8 + $0x28] sm:$0xff] }
 0xa47   :  { %v3972_v11 = vmul.f32 -1.442695, %v3490_v46  ;;  %v3740_v46 = vld [vmem:[%s6662_s8 + $0x48] sm:$0xff] }
 0xa48   :  { %v4229_v61 = vpop.eup %4228  ;;  %3760 = vmatpush.msrb.mxu0 %v3740_v46 }
 0xa49   :  { %v4231_v51 = vpop.eup %4230  ;;  %v3501_v50 = vadd.f32 1.0, %v4229_v61  ;;  %4232 = vpow2.f32 %v3972_v11 }
 0xa4a   :  { %v3502_v8 = vadd.f32 1.0, %v4231_v51  ;;  %v3739_v51 = vld [vmem:[%s6662_s8 + $0x40] sm:$0xff] }
 0xa4b   :  { %4234 = vrcp.f32 %v3501_v50  ;;  %v3515_v62 = vand.u32 2147483648, %v3501_v50  ;;  %v3513_v60 = vand.u32 2147483647, %v3501_v50  ;;  %vm3509_vm15 = vweird.f32 %v3501_v50  ;;  %3761 = vmatpush.msrb.mxu0 %v3739_v51 }
 0xa4c   :  { %4236 = vrcp.f32 %v3502_v8  ;;  %v3530_v47 = vand.u32 2147483648, %v3502_v8  ;;  %v3528_v58 = vand.u32 2147483647, %v3502_v8  ;;  %vm3524_vm1 = vweird.f32 %v3502_v8 }
 0xa4d   :  { %v3516_v18 = vor.u32 1.1754944e-38, %v3515_v62  ;;  %vm3514_vm4 = vcmp.eq.f32.partialorder %v3513_v60, 8.507059e+37  ;;  %v3732_v60 = vld [vmem:[%s6662_s8 + $0x8] sm:$0xff] }
 0xa4e   :  { %v3531_v54 = vor.u32 1.1754944e-38, %v3530_v47  ;;  %vm3529_vm0 = vcmp.eq.f32.partialorder %v3528_v58, 8.507059e+37  ;;  %v3733_v47 = vld [vmem:[%s6662_s8 + $0x10] sm:$0xff]  ;;  %v3731_v58 = vld [vmem:[%s6662_s8] sm:$0xff] }
 0xa4f   :  { %v4233_v32 = vpop.eup %4232 }
 0xa50   :  { %v3503_v10 = vadd.f32 1.0, %v4233_v32  ;;  %v3560_v32 = vld [vmem:[#allocation2 + $0x30] sm:$0xc0] }
 0xa51   :  { %v4235_v6 = vpop.eup %4234 }
 0xa52   :  { %v4237_v55 = vpop.eup %4236  ;;  %v3505_v63 = vmul.f32 %v4235_v6, %v3501_v50  ;;  %4238 = vrcp.f32 %v3503_v10  ;;  %vm3510_vm13 = vweird.f32 %v4235_v6  ;;  %v3545_v34 = vand.u32 2147483648, %v3503_v10  ;;  %v3738_v50 = vld [vmem:[%s6662_s8 + $0x38] sm:$0xff] }
 0xa53   :  { %v3520_v53 = vmul.f32 %v4237_v55, %v3502_v8  ;;  %4240 = vtanh.f32 %v3491_v7  ;;  %vm3525_vm14 = vweird.f32 %v4237_v55  ;;  %vm3511_vm2 = vmor %vm3509_vm15, %vm3510_vm13  ;;  %vm3539_vm6 = vweird.f32 %v3503_v10  ;;  %3762 = vmatpush.msrb.mxu0 %v3738_v50  ;;  %v3735_v7 = vld [vmem:[%s6662_s8 + $0x20] sm:$0xff] }
 0xa54   :  { %v3506_v23 = vsub.f32 1.0, %v3505_v63  ;;  %vm3526_vm3 = vmor %vm3524_vm1, %vm3525_vm14  ;;  %v3543_v33 = vand.u32 2147483647, %v3503_v10  ;;  %v3546_v45 = vor.u32 1.1754944e-38, %v3545_v34 }
 0xa55   :  { %v3521_v9 = vsub.f32 1.0, %v3520_v53  ;;  %3763 = vmatpush.msrb.mxu0 %v3737_v2 }
 0xa56   :  { %v3507_v48 = vmul.f32 %v4235_v6, %v3506_v23  ;;  %vm3544_vm8 = vcmp.eq.f32.partialorder %v3543_v33, 8.507059e+37  ;;  %v3734_v23 = vld [vmem:[%s6662_s8 + $0x18] sm:$0xff] }
 0xa57   :  { %v3522_v56 = vmul.f32 %v4237_v55, %v3521_v9  ;;  %3764 = vmatpush.msrb.mxu0 %v3736_v5 }
 0xa58   :  { %v4239_v19 = vpop.eup %4238  ;;  %v3508_v0 = vadd.f32 %v4235_v6, %v3507_v48 }
 0xa59   :  { %v3535_v16 = vmul.f32 %v4239_v19, %v3503_v10  ;;  %v3523_v1 = vadd.f32 %v4237_v55, %v3522_v56  ;;  %v4241_v13 = vpop.eup %4240  ;;  %vm3540_vm5 = vweird.f32 %v4239_v19  ;;  %3765 = vmatpush.msrb.mxu0 %v3735_v7 }
 0xa5a   :  { %v3512_v31 = vsel %vm3511_vm2, %v4235_v6, %v3508_v0  ;;  %vm3541_vm7 = vmor %vm3539_vm6, %vm3540_vm5  ;;  %v3561_v0 = vld [vmem:[#allocation2 + $0x38] sm:$0xc0]  ;;  %vm3774_vm5 = vcmask 123904  }
 0xa5b   :  { %v3536_v37 = vsub.f32 1.0, %v3535_v16  ;;  %v3517_v36 = vsel %vm3514_vm4, %v3516_v18, %v3512_v31  ;;  %v3527_v4 = vsel %vm3526_vm3, %v4237_v55, %v3523_v1  ;;  %3766 = vmatpush.msrb.mxu0 %v3734_v23 }
 0xa5c   :  { %v3532_v21 = vsel %vm3529_vm0, %v3531_v54, %v3527_v4  ;;  %v3554_v25 = vmul.f32 %v4241_v13, %v3517_v36 }
 0xa5d   :  { %v3553_v24 = vmul.f32 %v3551_v38, %v3532_v21  ;;  %v3537_v43 = vmul.f32 %v4239_v19, %v3536_v37  ;;  %3767 = vmatpush.msrb.mxu0 %v3733_v47 }
 0xa5f   :  { %v6586_v49 = vadd.f32 %v3554_v25, %v3553_v24  ;;  %v3538_v41 = vadd.f32 %v4239_v19, %v3537_v43  ;;  %3768 = vmatpush.msrb.mxu0 %v3732_v60 }
 0xa61   :  { %4242 = vtanh.f32 %v6586_v49  ;;  %v3542_v42 = vsel %vm3541_vm7, %v4239_v19, %v3538_v41  ;;  %3769 = vmatpush.msrb.mxu0 %v3731_v58 }
 0xa62   :  { %v3547_v22 = vsel %vm3544_vm8, %v3546_v45, %v3542_v42  ;;  %v3720_v45 = vrot.slane %v6586_v49, 6 }
 0xa67   :  { %v4243_v35 = vpop.eup %4242 }
 0xa68   :  { %v3557_v44 = vmul.f32 %v4243_v35, %v3547_v22 }
 0xa6a   :  { %v3563_v59 = vrot.slane %v3557_v44, 4 }
 0xa6c   :  { %3581 = vmatmul.f32.vlgmr.msra.gmra.mxu0 %v3563_v59  ;;  %3601 = vmatmul.f32.vlgmr.msra.gmra.mxu1 %v3563_v59 }
 0xa6d   :  { %3621 = vmatmul.f32.vlgmr.msra.gmra.mxu2 %v3563_v59  ;;  %3641 = vmatmul.f32.vlgmr.msra.gmra.mxu3 %v3563_v59 }
 0xae9   :  { %v3582_v27 = vpop.f32.mrf.mxu0  ;;  %v3602_v12 = vpop.f32.mrf.mxu1 }
 0xaea   :  { %v3649_v15 = vrot.slane %v3582_v27, 2  ;;  %v3650_v17 = vrot.slane %v3602_v12, 2 }
 0xaec   :  { %v3657_v30 = vadd.f32 %v3649_v15, %v3558_v26  ;;  %v3658_v40 = vadd.f32 %v3650_v17, %v3559_v28 }
 0xaee   :  { %v3973_v11 = vmul.f32 -1.442695, %v3657_v30  ;;  %v3974_v61 = vmul.f32 -1.442695, %v3658_v40 }
 0xaf0   :  { %4244 = vpow2.f32 %v3973_v11  ;;  %v3622_v8 = vpop.f32.mrf.mxu2  ;;  %v3642_v62 = vpop.f32.mrf.mxu3  ;;  %v4003_v11 = vld [vmem:[%s6663_s9] ss:$0 sm:$0xff] }
 0xaf1   :  { %4246 = vpow2.f32 %v3974_v61  ;;  %v3651_v57 = vrot.slane %v3622_v8, 2  ;;  %v3652_v48 = vrot.slane %v3642_v62, 2 }
 0xaf3   :  { %v3659_v10 = vadd.f32 %v3651_v57, %v3560_v32  ;;  %v3660_v18 = vadd.f32 %v3652_v48, %v3561_v0 }
 0xaf5   :  { %v3975_v6 = vmul.f32 -1.442695, %v3659_v10 }
 0xaf6   :  { %v4245_v55 = vpop.eup %4244 }
 0xaf7   :  { %v4247_v63 = vpop.eup %4246  ;;  %v3670_v53 = vadd.f32 1.0, %v4245_v55  ;;  %4248 = vpow2.f32 %v3975_v6 }
 0xaf8   :  { %v3671_v9 = vadd.f32 1.0, %v4247_v63 }
 0xaf9   :  { %4250 = vrcp.f32 %v3670_v53  ;;  %v3684_v37 = vand.u32 2147483648, %v3670_v53  ;;  %v3682_v21 = vand.u32 2147483647, %v3670_v53  ;;  %vm3678_vm11 = vweird.f32 %v3670_v53 }
 0xafa   :  { %4252 = vrcp.f32 %v3671_v9  ;;  %v3699_v36 = vand.u32 2147483648, %v3671_v9  ;;  %v3697_v24 = vand.u32 2147483647, %v3671_v9  ;;  %vm3693_vm12 = vweird.f32 %v3671_v9 }
 0xafb   :  { %v3685_v33 = vor.u32 1.1754944e-38, %v3684_v37  ;;  %vm3683_vm15 = vcmp.eq.f32.partialorder %v3682_v21, 8.507059e+37 }
 0xafc   :  { %v3700_v35 = vor.u32 1.1754944e-38, %v3699_v36  ;;  %vm3698_vm1 = vcmp.eq.f32.partialorder %v3697_v24, 8.507059e+37 }
 0xafd   :  { %v4249_v56 = vpop.eup %4248 }
 0xafe   :  { %v3672_v19 = vadd.f32 1.0, %v4249_v56 }
 0xaff   :  { %v4251_v16 = vpop.eup %4250 }
 0xb00   :  { %v4253_v1 = vpop.eup %4252  ;;  %v3674_v38 = vmul.f32 %v4251_v16, %v3670_v53  ;;  %4254 = vrcp.f32 %v3672_v19  ;;  %vm3679_vm9 = vweird.f32 %v4251_v16  ;;  %v3714_v17 = vand.u32 2147483648, %v3672_v19 }
 0xb01   :  { %v3689_v54 = vmul.f32 %v4253_v1, %v3671_v9  ;;  %4256 = vtanh.f32 %v3660_v18  ;;  %vm3694_vm10 = vweird.f32 %v4253_v1  ;;  %vm3680_vm13 = vmor %vm3678_vm11, %vm3679_vm9  ;;  %vm3708_vm3 = vweird.f32 %v3672_v19 }
 0xb02   :  { %v3675_v31 = vsub.f32 1.0, %v3674_v38  ;;  %vm3695_vm14 = vmor %vm3693_vm12, %vm3694_vm10  ;;  %v3712_v49 = vand.u32 2147483647, %v3672_v19  ;;  %v3715_v28 = vor.u32 1.1754944e-38, %v3714_v17 }
 0xb03   :  { %v3690_v13 = vsub.f32 1.0, %v3689_v54 }
 0xb04   :  { %v3676_v4 = vmul.f32 %v4251_v16, %v3675_v31  ;;  %vm3713_vm0 = vcmp.eq.f32.partialorder %v3712_v49, 8.507059e+37 }
 0xb05   :  { %v3691_v25 = vmul.f32 %v4253_v1, %v3690_v13 }
 0xb06   :  { %v4255_v43 = vpop.eup %4254  ;;  %v3677_v41 = vadd.f32 %v4251_v16, %v3676_v4 }
 0xb07   :  { %v3704_v34 = vmul.f32 %v4255_v43, %v3672_v19  ;;  %v3692_v42 = vadd.f32 %v4253_v1, %v3691_v25  ;;  %v4257_v44 = vpop.eup %4256  ;;  %vm3709_vm2 = vweird.f32 %v4255_v43 }
 0xb08   :  { %v3681_v22 = vsel %vm3680_vm13, %v4251_v16, %v3677_v41  ;;  %vm3710_vm4 = vmor %vm3708_vm3, %vm3709_vm2 }
 0xb09   :  { %v3705_v59 = vsub.f32 1.0, %v3704_v34  ;;  %v3686_v20 = vsel %vm3683_vm15, %v3685_v33, %v3681_v22  ;;  %v3696_v39 = vsel %vm3695_vm14, %v4253_v1, %v3692_v42 }
 0xb0a   :  { %v3701_v52 = vsel %vm3698_vm1, %v3700_v35, %v3696_v39  ;;  %v3723_v3 = vmul.f32 %v4257_v44, %v3686_v20 }
 0xb0b   :  { %v3722_v27 = vmul.f32 %v3720_v45, %v3701_v52  ;;  %v3706_v12 = vmul.f32 %v4255_v43, %v3705_v59 }
 0xb0d   :  { %v3724_v14 = vadd.f32 %v3723_v3, %v3722_v27  ;;  %v3707_v15 = vadd.f32 %v4255_v43, %v3706_v12 }
 0xb0f   :  { %4258 = vtanh.f32 %v3724_v14  ;;  %3730 = vst [vmem:[#allocation17 - $0x4] sm:$0xc0] %v3724_v14  ;;  %v3711_v26 = vsel %vm3710_vm4, %v4255_v43, %v3707_v15 }
 0xb10   :  { %v3716_v30 = vsel %vm3713_vm0, %v3715_v28, %v3711_v26 }
 0xb15   :  { %v4259_v29 = vpop.eup %4258 }
 0xb16   :  { %v3726_v40 = vmul.f32 %v4259_v29, %v3716_v30 }
 0xb18   :  { %v3752_v46 = vrot.slane %v3726_v40, 6  ;;  %3728 = vst [vmem:[#allocation15 - $0x4] sm:$0xc0] %v3726_v40 }
 0xb19   :  { %3799 = dma.vmem_to_hbm [thread:$0]  %s3792_s27, 64, %s3794_s6, [#allocation16], %s4518_s30, %s4518_s30, %s4524_s28  }
 0xb1a   :  { %3770 = vmatmul.f32.vlgmr.msrb.gmra.mxu0 %v3752_v46  ;;  %3812 = dma.vmem_to_hbm [thread:$0]  %s3805_s13, 64, %s3807_s16, [#allocation16], %s4518_s30, %s4518_s30, %s4524_s28  }
 0xb97   :  { %v3771_v61 = vpop.f32.mrf.mxu0 }
 0xb98   :  { %v3772_v51 = vadd.f32 %v4003_v11, %v3771_v61 }
 0xb9a   :  { %3775 = vst.msk [vmem:[#allocation14] sm:$0x3] %vm3774_vm5, %v3772_v51 }
 0xb9b   :  { %3786 = dma.vmem_to_hbm [thread:$0]  %s3782_s18, 32, %s3784_s20, [#allocation6]  }
 0xb9c   :  { %4512 = dma.done.wait [#allocation6], 32  }
 0xb9d   :  { %4513 = vsyncadd [#allocation6], 4294967264 }
 0xb9e   :  { %4514 = dma.done.wait [#allocation16], 128  }
 0xb9f   :  { %4515 = vsyncadd [#allocation16], 4294967168 }
 0xba0   :  { %3825 = vsyncpa [#allocation5], 1 }
 0xba1   :  { %3826 = vsyncpa [#allocation10], 1 }
 0xba2   :  { %3827 = vsyncpa [#allocation13], 1 }
 0xba3   :  { %3828 = vsyncpa [#allocation6], 1 }
 0xba4   :  { %3829 = vsyncpa [#allocation16], 1 }
 0xba5   :  { %3830 = vsyncpa [#allocation7], 1 }

</bundles_post_ra>
